<compile_context>
chip_gen: v6e
topology: v6e:2x2x1
jax: 0.10.0
libtpu: 0.0.40
codegen_flags: <defaults>
</compile_context>

<pallas_src>
import numpy as np
import jax
import jax.numpy as jnp
from jax.experimental import pallas as pl
from jax.experimental.pallas import tpu as pltpu

C = 128            # channel count fixed by the module definition
NEG_SLOPE = 0.01   # ABN default leaky_relu slope
EPS = 1e-5         # ABN default eps
LEFT = 8           # column offset of the valid data inside the padded VMEM scratch
                   # (= 8 so the interior store is sublane-tile aligned)


# ----------------------------------------------------------------------------
# Fused kernel: sepconv1+ABN -> sepconv2+ABN -> 2x bilinear upsample
# ----------------------------------------------------------------------------
def _correction_kernel(x_ref, dw1_ref, pw1_ref, b1_ref,
                       dw2_ref, pw2_ref, b2_ref,
                       o_ref, pad_ref):
    """x_ref:   (Bt, H, W, C)       f32 input tile (Bt batch elements)
       dw*_ref: (3, 3, C)           f32 depthwise 3x3 weights (per-channel)
       pw*_ref: (C, C)              bf16 pointwise weights [c_in, c_out], BN scale folded in
       b*_ref:  (1, C)              f32 folded BN shift
       o_ref:   (Bt, H, 2, W, 2C)   parity-packed output: o[b,i,p,j,q*C+c] == out[b,2i+p,2j+q,c]
       pad_ref: (Bt, H+2, W+16, C)  f32 scratch holding the padded layer input; valid HxW
                data lives at rows [1:H+1], cols [LEFT:LEFT+W]."""
    Bt, H, W = x_ref.shape[0], x_ref.shape[1], x_ref.shape[2]

    # Clear only the zero border ring read by the 3x3 taps; the interior is fully
    # overwritten every layer and the dead alignment columns are never read.  Re-done every
    # grid step because the upsample stage overwrites the ring with clamped edge values.
    zrow = jnp.zeros((Bt, 1, W + 2, C), jnp.float32)
    zcol = jnp.zeros((Bt, H, 1, C), jnp.float32)
    pad_ref[:, 0:1, LEFT - 1:LEFT + W + 1, :] = zrow
    pad_ref[:, H + 1:H + 2, LEFT - 1:LEFT + W + 1, :] = zrow
    pad_ref[:, 1:H + 1, LEFT - 1:LEFT, :] = zcol
    pad_ref[:, 1:H + 1, LEFT + W:LEFT + W + 1, :] = zcol

    def col_slabs():
        # Hoist the three column-shifted views once: only the LEFT-1 / LEFT+1 reads are
        # sublane-unaligned (2 shifted extractions per layer instead of 6).
        colL = pad_ref[:, :, LEFT - 1:LEFT - 1 + W, :]   # (Bt, H+2, W, C)
        colC = pad_ref[:, :, LEFT:LEFT + W, :]
        colR = pad_ref[:, :, LEFT + 1:LEFT + 1 + W, :]
        return colL, colC, colR

    def sepconv_abn(x_bhwc, dw_ref, pw_ref, b_ref):
        # place the layer input inside the zero ring (sublane-tile-aligned interior store)
        pad_ref[:, 1:H + 1, LEFT:LEFT + W, :] = x_bhwc

        # depthwise 3x3, stride 1, pad 1: 9 shifted MACs on the VPU (f32); taps index only
        # along H (a major dim) of the hoisted column slabs.
        # TODO(synk): for very large Bt*H*W convert to a fori_loop over 8-16 row strips
        #             (unroll=True) to bound vreg live ranges.
        cols = col_slabs()
        acc = cols[0][:, 0:H] * dw_ref[0, 0, :]
        for kh in range(3):
            for kw in range(3):
                if kh == 0 and kw == 0:
                    continue
                acc = acc + cols[kw][:, kh:kh + H] * dw_ref[kh, kw, :]

        # pointwise 1x1 conv (BN scale pre-folded into the weights): bf16 MXU matmul,
        # f32 accumulation, flattened over the whole batch tile so M = Bt*H*W (>= 256).
        y = jnp.dot(acc.reshape(Bt * H * W, C).astype(jnp.bfloat16), pw_ref[...],
                    preferred_element_type=jnp.float32)

        # remaining ABN: folded shift + leaky_relu(0.01)
        y = y + b_ref[0]
        y = jnp.where(y > 0, y, NEG_SLOPE * y)
        return y.reshape(Bt, H, W, C)

    y1 = sepconv_abn(x_ref[...], dw1_ref, pw1_ref, b1_ref)
    y2 = sepconv_abn(y1, dw2_ref, pw2_ref, b2_ref)

    # ---- 2x bilinear upsample (align_corners=False) as a VPU shift-and-blend ----
    # Reuse the scratch: store y2 with an edge-replicated (clamped) 1-pixel border so every
    # neighbour of the fixed 0.75/0.25 bilinear stencil is a plain shifted slice read.
    pad_ref[:, 1:H + 1, LEFT:LEFT + W, :] = y2
    pad_ref[:, 0:1, LEFT:LEFT + W, :] = y2[:, 0:1]               # clamp top row
    pad_ref[:, H + 1:H + 2, LEFT:LEFT + W, :] = y2[:, H - 1:H]   # clamp bottom row
    pad_ref[:, :, LEFT - 1:LEFT, :] = pad_ref[:, :, LEFT:LEFT + 1, :]                  # left col
    pad_ref[:, :, LEFT + W:LEFT + W + 1, :] = pad_ref[:, :, LEFT + W - 1:LEFT + W, :]  # right col

    colL, colC, colR = col_slabs()
    wb0 = 0.75 * colC + 0.25 * colL            # even output columns (q=0), all H+2 rows
    wb1 = 0.75 * colC + 0.25 * colR            # odd  output columns (q=1)
    p00 = 0.75 * wb0[:, 1:H + 1] + 0.25 * wb0[:, 0:H]        # (row parity p=0, col parity q=0)
    p01 = 0.75 * wb1[:, 1:H + 1] + 0.25 * wb1[:, 0:H]        # (p=0, q=1)
    p10 = 0.75 * wb0[:, 1:H + 1] + 0.25 * wb0[:, 2:H + 2]    # (p=1, q=0)
    p11 = 0.75 * wb1[:, 1:H + 1] + 0.25 * wb1[:, 2:H + 2]    # (p=1, q=1)

    # Parity-packed, lane-dense stores: the block's last dim is 2C = 256 lanes and each store
    # is a full 128-lane tile at a 128-aligned lane offset (no masked vst).
    od = o_ref.dtype
    o_ref[:, :, 0, :, 0:C] = p00.astype(od)
    o_ref[:, :, 0, :, C:2 * C] = p01.astype(od)
    o_ref[:, :, 1, :, 0:C] = p10.astype(od)
    o_ref[:, :, 1, :, C:2 * C] = p11.astype(od)


# ----------------------------------------------------------------------------
# Wrapper
# ----------------------------------------------------------------------------
def _pick_block_batch(N, H, W, vmem_budget=24 << 20):
    """Smallest divisor Bt of N with Bt*H*W >= 256 (fills an MXU pass on v6e/v7x; v5e only
    needs 128), capped so the per-step working set stays within a conservative VMEM budget."""
    per_img = (2 * 4 * H * W * C             # double-buffered f32 input block
               + 2 * 16 * H * W * C          # double-buffered f32 output block (2H x 2W)
               + 4 * (H + 2) * (W + 16) * C  # padded scratch
               + 40 * H * W * C)             # live f32 intermediates (slabs, acc, planes)
    cap = max(1, vmem_budget // per_img)
    want = max(1, -(-256 // (H * W)))        # ceil(256 / (H*W))
    bt = 1
    for d in range(1, N + 1):
        if N % d == 0 and d <= cap:
            bt = d
            if d >= want:
                break
    return bt, per_img


def correction_module(x, params, out_dtype=jnp.float32):
    """x: (N, H, W, 128) f32 NHWC.  Returns (N, 2H, 2W, 128) in out_dtype.
    Pass out_dtype=jnp.bfloat16 to halve the dominant output HBM traffic if downstream
    tolerates it."""
    N, H, W, c = x.shape
    assert c == C
    # TODO(synk): W not a multiple of 8 (supported by the PyTorch module) would need
    #             unaligned/masked interior stores; not implemented.
    assert W % 8 == 0, "W must be a multiple of 8 for the aligned in-kernel padding store"

    bt, per_img = _pick_block_batch(N, H, W)
    weights_bytes = 2 * 2 * (3 * 3 * C * 4 + C * C * 2 + C * 4)   # two layers, double-buffered
    est = bt * per_img + weights_bytes
    vmem_limit = int(min(max(4 * est, 32 << 20), 56 << 20))       # headroom under v7x 64 MiB

    out = pl.pallas_call(
        _correction_kernel,
        out_shape=jax.ShapeDtypeStruct((N, H, 2, W, 2 * C), out_dtype),
        grid=(N // bt,),
        in_specs=[
            pl.BlockSpec((bt, H, W, C), lambda n: (n, 0, 0, 0)),
            pl.BlockSpec((3, 3, C), lambda n: (0, 0, 0)),
            pl.BlockSpec((C, C), lambda n: (0, 0)),
            pl.BlockSpec((1, C), lambda n: (0, 0)),
            pl.BlockSpec((3, 3, C), lambda n: (0, 0, 0)),
            pl.BlockSpec((C, C), lambda n: (0, 0)),
            pl.BlockSpec((1, C), lambda n: (0, 0)),
        ],
        out_specs=pl.BlockSpec((bt, H, 2, W, 2 * C), lambda n: (n, 0, 0, 0, 0)),
        scratch_shapes=[pltpu.VMEM((bt, H + 2, W + 16, C), jnp.float32)],
        compiler_params=pltpu.CompilerParams(
            dimension_semantics=("parallel",), vmem_limit_bytes=vmem_limit),
    )(x, params['dw1'], params['pw1'], params['shift1'],
      params['dw2'], params['pw2'], params['shift2'])

    # Free row-major reshape: (N, H, 2, W, 2C) -> (N, 2H, 2W, C), no data movement.
    return out.reshape(N, 2 * H, 2 * W, C)


# ----------------------------------------------------------------------------
# Parameter preparation (done ONCE at parameter-load time, not per step)
# ----------------------------------------------------------------------------
def prepare_params(dw1, pw1_t, bn1, dw2, pw2_t, bn2):
    """Fold BN scale into the pointwise weights.  bn* = (gamma, beta, mean, var)."""
    def fold(pw_t, bn):
        gamma, beta, mean, var = bn
        scale = gamma / jnp.sqrt(var + EPS)
        shift = beta - mean * scale
        return (pw_t * scale[None, :]).astype(jnp.bfloat16), shift.reshape(1, C)

    pw1_f, shift1 = fold(pw1_t, bn1)
    pw2_f, shift2 = fold(pw2_t, bn2)
    return {'dw1': dw1, 'pw1': pw1_f, 'shift1': shift1,
            'dw2': dw2, 'pw2': pw2_f, 'shift2': shift2}


# ----------------------------------------------------------------------------
# Pure-JAX f32 reference (for validation)
# ----------------------------------------------------------------------------
def bilinear_matrix(in_size, scale_factor=2):
    """Interpolation matrix matching nn.Upsample(scale_factor=2, mode='bilinear'),
    align_corners=False (PyTorch default).  Used only by the reference."""
    out_size = in_size * scale_factor
    ratio = in_size / out_size
    i = np.arange(out_size, dtype=np.float64)
    src = np.maximum(ratio * (i + 0.5) - 0.5, 0.0)
    i0 = np.minimum(np.floor(src).astype(np.int64), in_size - 1)
    i1 = np.minimum(i0 + 1, in_size - 1)
    frac = (src - i0).astype(np.float32)
    U = np.zeros((out_size, in_size), dtype=np.float32)
    U[np.arange(out_size), i0] += 1.0 - frac
    U[np.arange(out_size), i1] += frac
    return U


def reference_forward(x, dw1, pw1_t, bn1, dw2, pw2_t, bn2):
    def sepconv(xx, dw, pw_t):
        h, w = xx.shape[1], xx.shape[2]
        xp = jnp.pad(xx, ((0, 0), (1, 1), (1, 1), (0, 0)))
        acc = jnp.zeros_like(xx)
        for kh in range(3):
            for kw in range(3):
                acc = acc + xp[:, kh:kh + h, kw:kw + w, :] * dw[kh, kw]
        return jnp.einsum('nhwc,cd->nhwd', acc, pw_t)

    def abn(y, bn):
        gamma, beta, mean, var = bn
        y = (y - mean) * (gamma / jnp.sqrt(var + EPS)) + beta
        return jnp.where(y > 0, y, NEG_SLOPE * y)

    y = abn(sepconv(x, dw1, pw1_t), bn1)
    y = abn(sepconv(y, dw2, pw2_t), bn2)
    uh = jnp.asarray(bilinear_matrix(y.shape[1]))
    uw = jnp.asarray(bilinear_matrix(y.shape[2]))
    y = jnp.einsum('ph,nhwc->npwc', uh, y)
    y = jnp.einsum('qw,npwc->npqc', uw, y)
    return y


if __name__ == "__main__":
    key = jax.random.PRNGKey(0)
    ks = jax.random.split(key, 13)

    N, H, W = 8, 8, 8
    # NHWC input; the equivalent PyTorch NCHW input shape is (8, 128, 8, 8)
    x = jax.random.normal(ks[0], (N, H, W, C), jnp.float32)

    def rand_bn(kg, kb, km, kv):
        gamma = 1.0 + 0.05 * jax.random.normal(kg, (C,), jnp.float32)
        beta = 0.05 * jax.random.normal(kb, (C,), jnp.float32)
        mean = 0.05 * jax.random.normal(km, (C,), jnp.float32)
        var = 1.0 + 0.1 * jnp.abs(jax.random.normal(kv, (C,), jnp.float32))
        return gamma, beta, mean, var

    # depthwise weights: PyTorch (C,1,3,3) stored here as (3,3,C)
    dw1 = 0.1 * jax.random.normal(ks[1], (3, 3, C), jnp.float32)
    # pointwise weights: PyTorch (C_out,C_in,1,1) stored transposed as (C_in,C_out)
    pw1_t = 0.05 * jax.random.normal(ks[2], (C, C), jnp.float32)
    bn1 = rand_bn(ks[3], ks[4], ks[5], ks[6])
    dw2 = 0.1 * jax.random.normal(ks[7], (3, 3, C), jnp.float32)
    pw2_t = 0.05 * jax.random.normal(ks[8], (C, C), jnp.float32)
    bn2 = rand_bn(ks[9], ks[10], ks[11], ks[12])

    params = prepare_params(dw1, pw1_t, bn1, dw2, pw2_t, bn2)

    out = correction_module(x, params)
    out = jax.block_until_ready(out)

    assert out.shape == (N, 2 * H, 2 * W, C), out.shape
    assert bool(jnp.all(jnp.isfinite(out)))

    # validate against a pure-JAX f32 reference (loose tolerance: bf16 MXU operands)
    ref = reference_forward(x, dw1, pw1_t, bn1, dw2, pw2_t, bn2)
    np.testing.assert_allclose(np.asarray(out), np.asarray(ref), rtol=3e-2, atol=3e-2)

    print("KERNEL_OK")
</pallas_src>

<mosaic_0001>
module attributes {stable_mosaic.version = 11 : i64} {
  func.func @_correction_kernel(%arg0: i32, %arg1: memref<4x8x8x128xf32, #tpu.memory_space<vmem>>, %arg2: memref<3x3x128xf32, #tpu.memory_space<vmem>>, %arg3: memref<128x128xbf16, #tpu.memory_space<vmem>>, %arg4: memref<1x128xf32, #tpu.memory_space<vmem>>, %arg5: memref<3x3x128xf32, #tpu.memory_space<vmem>>, %arg6: memref<128x128xbf16, #tpu.memory_space<vmem>>, %arg7: memref<1x128xf32, #tpu.memory_space<vmem>>, %arg8: memref<4x8x2x8x256xf32, #tpu.memory_space<vmem>>, %arg9: memref<4x10x24x128xf32, #tpu.memory_space<vmem>>) attributes {dimension_semantics = [#tpu.dimension_semantics<parallel>], iteration_bounds = array<i64: 2>, scalar_prefetch = 0 : i64, scratch_operands = 1 : i64, tpu.core_type = #tpu.core_type<tc>, window_params = [{transform_indices = @transform_0, window_bounds = array<i64: 4, 8, 8, 128>}, {pipeline_mode = #tpu.pipeline_mode<synchronous>, transform_indices = @transform_1, window_bounds = array<i64: 3, 3, 128>}, {pipeline_mode = #tpu.pipeline_mode<synchronous>, transform_indices = @transform_2, window_bounds = array<i64: 128, 128>}, {pipeline_mode = #tpu.pipeline_mode<synchronous>, transform_indices = @transform_3, window_bounds = array<i64: 1, 128>}, {pipeline_mode = #tpu.pipeline_mode<synchronous>, transform_indices = @transform_4, window_bounds = array<i64: 3, 3, 128>}, {pipeline_mode = #tpu.pipeline_mode<synchronous>, transform_indices = @transform_5, window_bounds = array<i64: 128, 128>}, {pipeline_mode = #tpu.pipeline_mode<synchronous>, transform_indices = @transform_6, window_bounds = array<i64: 1, 128>}, {transform_indices = @transform_7, window_bounds = array<i64: 4, 8, 2, 8, 256>}]} {
    %cst = arith.constant 0.000000e+00 : f32
    %0 = vector.broadcast %cst : f32 to vector<4x1x10x128xf32>
    %cst_0 = arith.constant 0.000000e+00 : f32
    %1 = vector.broadcast %cst_0 : f32 to vector<4x8x1x128xf32>
    %c0 = arith.constant 0 : index
    %c0_1 = arith.constant 0 : index
    %c7 = arith.constant 7 : index
    %c0_2 = arith.constant 0 : index
    %2 = vector.load %arg9[%c0, %c0_1, %c7, %c0_2] : memref<4x10x24x128xf32, #tpu.memory_space<vmem>>, vector<4x1x10x128xf32>
    tpu.vector_store %arg9[%c0, %c0_1, %c7, %c0_2], %0 {strides = array<i32>} : memref<4x10x24x128xf32, #tpu.memory_space<vmem>>, vector<4x1x10x128xf32>,
    %c0_3 = arith.constant 0 : index
    %c9 = arith.constant 9 : index
    %c7_4 = arith.constant 7 : index
    %c0_5 = arith.constant 0 : index
    %3 = vector.load %arg9[%c0_3, %c9, %c7_4, %c0_5] : memref<4x10x24x128xf32, #tpu.memory_space<vmem>>, vector<4x1x10x128xf32>
    tpu.vector_store %arg9[%c0_3, %c9, %c7_4, %c0_5], %0 {strides = array<i32>} : memref<4x10x24x128xf32, #tpu.memory_space<vmem>>, vector<4x1x10x128xf32>,
    %c0_6 = arith.constant 0 : index
    %c1 = arith.constant 1 : index
    %c7_7 = arith.constant 7 : index
    %c0_8 = arith.constant 0 : index
    %4 = vector.load %arg9[%c0_6, %c1, %c7_7, %c0_8] : memref<4x10x24x128xf32, #tpu.memory_space<vmem>>, vector<4x8x1x128xf32>
    tpu.vector_store %arg9[%c0_6, %c1, %c7_7, %c0_8], %1 {strides = array<i32>} : memref<4x10x24x128xf32, #tpu.memory_space<vmem>>, vector<4x8x1x128xf32>,
    %c0_9 = arith.constant 0 : index
    %c1_10 = arith.constant 1 : index
    %c16 = arith.constant 16 : index
    %c0_11 = arith.constant 0 : index
    %5 = vector.load %arg9[%c0_9, %c1_10, %c16, %c0_11] : memref<4x10x24x128xf32, #tpu.memory_space<vmem>>, vector<4x8x1x128xf32>
    tpu.vector_store %arg9[%c0_9, %c1_10, %c16, %c0_11], %1 {strides = array<i32>} : memref<4x10x24x128xf32, #tpu.memory_space<vmem>>, vector<4x8x1x128xf32>,
    %c0_12 = arith.constant 0 : index
    %c0_13 = arith.constant 0 : index
    %c0_14 = arith.constant 0 : index
    %c0_15 = arith.constant 0 : index
    %6 = vector.load %arg1[%c0_12, %c0_13, %c0_14, %c0_15] : memref<4x8x8x128xf32, #tpu.memory_space<vmem>>, vector<4x8x8x128xf32>
    %c0_16 = arith.constant 0 : index
    %c1_17 = arith.constant 1 : index
    %c8 = arith.constant 8 : index
    %c0_18 = arith.constant 0 : index
    %7 = vector.load %arg9[%c0_16, %c1_17, %c8, %c0_18] : memref<4x10x24x128xf32, #tpu.memory_space<vmem>>, vector<4x8x8x128xf32>
    tpu.vector_store %arg9[%c0_16, %c1_17, %c8, %c0_18], %6 {strides = array<i32>} : memref<4x10x24x128xf32, #tpu.memory_space<vmem>>, vector<4x8x8x128xf32>,
    %c0_19 = arith.constant 0 : index
    %c0_20 = arith.constant 0 : index
    %c7_21 = arith.constant 7 : index
    %c0_22 = arith.constant 0 : index
    %8 = vector.load %arg9[%c0_19, %c0_20, %c7_21, %c0_22] : memref<4x10x24x128xf32, #tpu.memory_space<vmem>>, vector<4x10x8x128xf32>
    %c0_23 = arith.constant 0 : index
    %c0_24 = arith.constant 0 : index
    %c8_25 = arith.constant 8 : index
    %c0_26 = arith.constant 0 : index
    %9 = vector.load %arg9[%c0_23, %c0_24, %c8_25, %c0_26] : memref<4x10x24x128xf32, #tpu.memory_space<vmem>>, vector<4x10x8x128xf32>
    %c0_27 = arith.constant 0 : index
    %c0_28 = arith.constant 0 : index
    %c9_29 = arith.constant 9 : index
    %c0_30 = arith.constant 0 : index
    %10 = vector.load %arg9[%c0_27, %c0_28, %c9_29, %c0_30] : memref<4x10x24x128xf32, #tpu.memory_space<vmem>>, vector<4x10x8x128xf32>
    %11 = vector.extract_strided_slice %8 {offsets = [0, 0, 0, 0], sizes = [4, 8, 8, 128], strides = [1, 1, 1, 1]} : vector<4x10x8x128xf32> to vector<4x8x8x128xf32>
    %c0_31 = arith.constant 0 : index
    %c0_32 = arith.constant 0 : index
    %c0_33 = arith.constant 0 : index
    %12 = vector.load %arg2[%c0_31, %c0_32, %c0_33] : memref<3x3x128xf32, #tpu.memory_space<vmem>>, vector<1x1x128xf32>
    %13 = vector.shape_cast %12 : vector<1x1x128xf32> to vector<128xf32>
    %14 = vector.shape_cast %13 : vector<128xf32> to vector<1x1x1x128xf32>
    %15 = vector.broadcast %14 : vector<1x1x1x128xf32> to vector<4x8x8x128xf32>
    %16 = arith.mulf %11, %15 : vector<4x8x8x128xf32>
    %17 = vector.extract_strided_slice %9 {offsets = [0, 0, 0, 0], sizes = [4, 8, 8, 128], strides = [1, 1, 1, 1]} : vector<4x10x8x128xf32> to vector<4x8x8x128xf32>
    %c0_34 = arith.constant 0 : index
    %c1_35 = arith.constant 1 : index
    %c0_36 = arith.constant 0 : index
    %18 = vector.load %arg2[%c0_34, %c1_35, %c0_36] : memref<3x3x128xf32, #tpu.memory_space<vmem>>, vector<1x1x128xf32>
    %19 = vector.shape_cast %18 : vector<1x1x128xf32> to vector<128xf32>
    %20 = vector.shape_cast %19 : vector<128xf32> to vector<1x1x1x128xf32>
    %21 = vector.broadcast %20 : vector<1x1x1x128xf32> to vector<4x8x8x128xf32>
    %22 = arith.mulf %17, %21 : vector<4x8x8x128xf32>
    %23 = arith.addf %16, %22 : vector<4x8x8x128xf32>
    %24 = vector.extract_strided_slice %10 {offsets = [0, 0, 0, 0], sizes = [4, 8, 8, 128], strides = [1, 1, 1, 1]} : vector<4x10x8x128xf32> to vector<4x8x8x128xf32>
    %c0_37 = arith.constant 0 : index
    %c2 = arith.constant 2 : index
    %c0_38 = arith.constant 0 : index
    %25 = vector.load %arg2[%c0_37, %c2, %c0_38] : memref<3x3x128xf32, #tpu.memory_space<vmem>>, vector<1x1x128xf32>
    %26 = vector.shape_cast %25 : vector<1x1x128xf32> to vector<128xf32>
    %27 = vector.shape_cast %26 : vector<128xf32> to vector<1x1x1x128xf32>
    %28 = vector.broadcast %27 : vector<1x1x1x128xf32> to vector<4x8x8x128xf32>
    %29 = arith.mulf %24, %28 : vector<4x8x8x128xf32>
    %30 = arith.addf %23, %29 : vector<4x8x8x128xf32>
    %31 = vector.extract_strided_slice %8 {offsets = [0, 1, 0, 0], sizes = [4, 8, 8, 128], strides = [1, 1, 1, 1]} : vector<4x10x8x128xf32> to vector<4x8x8x128xf32>
    %c1_39 = arith.constant 1 : index
    %c0_40 = arith.constant 0 : index
    %c0_41 = arith.constant 0 : index
    %32 = vector.load %arg2[%c1_39, %c0_40, %c0_41] : memref<3x3x128xf32, #tpu.memory_space<vmem>>, vector<1x1x128xf32>
    %33 = vector.shape_cast %32 : vector<1x1x128xf32> to vector<128xf32>
    %34 = vector.shape_cast %33 : vector<128xf32> to vector<1x1x1x128xf32>
    %35 = vector.broadcast %34 : vector<1x1x1x128xf32> to vector<4x8x8x128xf32>
    %36 = arith.mulf %31, %35 : vector<4x8x8x128xf32>
    %37 = arith.addf %30, %36 : vector<4x8x8x128xf32>
    %38 = vector.extract_strided_slice %9 {offsets = [0, 1, 0, 0], sizes = [4, 8, 8, 128], strides = [1, 1, 1, 1]} : vector<4x10x8x128xf32> to vector<4x8x8x128xf32>
    %c1_42 = arith.constant 1 : index
    %c1_43 = arith.constant 1 : index
    %c0_44 = arith.constant 0 : index
    %39 = vector.load %arg2[%c1_42, %c1_43, %c0_44] : memref<3x3x128xf32, #tpu.memory_space<vmem>>, vector<1x1x128xf32>
    %40 = vector.shape_cast %39 : vector<1x1x128xf32> to vector<128xf32>
    %41 = vector.shape_cast %40 : vector<128xf32> to vector<1x1x1x128xf32>
    %42 = vector.broadcast %41 : vector<1x1x1x128xf32> to vector<4x8x8x128xf32>
    %43 = arith.mulf %38, %42 : vector<4x8x8x128xf32>
    %44 = arith.addf %37, %43 : vector<4x8x8x128xf32>
    %45 = vector.extract_strided_slice %10 {offsets = [0, 1, 0, 0], sizes = [4, 8, 8, 128], strides = [1, 1, 1, 1]} : vector<4x10x8x128xf32> to vector<4x8x8x128xf32>
    %c1_45 = arith.constant 1 : index
    %c2_46 = arith.constant 2 : index
    %c0_47 = arith.constant 0 : index
    %46 = vector.load %arg2[%c1_45, %c2_46, %c0_47] : memref<3x3x128xf32, #tpu.memory_space<vmem>>, vector<1x1x128xf32>
    %47 = vector.shape_cast %46 : vector<1x1x128xf32> to vector<128xf32>
    %48 = vector.shape_cast %47 : vector<128xf32> to vector<1x1x1x128xf32>
    %49 = vector.broadcast %48 : vector<1x1x1x128xf32> to vector<4x8x8x128xf32>
    %50 = arith.mulf %45, %49 : vector<4x8x8x128xf32>
    %51 = arith.addf %44, %50 : vector<4x8x8x128xf32>
    %52 = vector.extract_strided_slice %8 {offsets = [0, 2, 0, 0], sizes = [4, 8, 8, 128], strides = [1, 1, 1, 1]} : vector<4x10x8x128xf32> to vector<4x8x8x128xf32>
    %c2_48 = arith.constant 2 : index
    %c0_49 = arith.constant 0 : index
    %c0_50 = arith.constant 0 : index
    %53 = vector.load %arg2[%c2_48, %c0_49, %c0_50] : memref<3x3x128xf32, #tpu.memory_space<vmem>>, vector<1x1x128xf32>
    %54 = vector.shape_cast %53 : vector<1x1x128xf32> to vector<128xf32>
    %55 = vector.shape_cast %54 : vector<128xf32> to vector<1x1x1x128xf32>
    %56 = vector.broadcast %55 : vector<1x1x1x128xf32> to vector<4x8x8x128xf32>
    %57 = arith.mulf %52, %56 : vector<4x8x8x128xf32>
    %58 = arith.addf %51, %57 : vector<4x8x8x128xf32>
    %59 = vector.extract_strided_slice %9 {offsets = [0, 2, 0, 0], sizes = [4, 8, 8, 128], strides = [1, 1, 1, 1]} : vector<4x10x8x128xf32> to vector<4x8x8x128xf32>
    %c2_51 = arith.constant 2 : index
    %c1_52 = arith.constant 1 : index
    %c0_53 = arith.constant 0 : index
    %60 = vector.load %arg2[%c2_51, %c1_52, %c0_53] : memref<3x3x128xf32, #tpu.memory_space<vmem>>, vector<1x1x128xf32>
    %61 = vector.shape_cast %60 : vector<1x1x128xf32> to vector<128xf32>
    %62 = vector.shape_cast %61 : vector<128xf32> to vector<1x1x1x128xf32>
    %63 = vector.broadcast %62 : vector<1x1x1x128xf32> to vector<4x8x8x128xf32>
    %64 = arith.mulf %59, %63 : vector<4x8x8x128xf32>
    %65 = arith.addf %58, %64 : vector<4x8x8x128xf32>
    %66 = vector.extract_strided_slice %10 {offsets = [0, 2, 0, 0], sizes = [4, 8, 8, 128], strides = [1, 1, 1, 1]} : vector<4x10x8x128xf32> to vector<4x8x8x128xf32>
    %c2_54 = arith.constant 2 : index
    %c2_55 = arith.constant 2 : index
    %c0_56 = arith.constant 0 : index
    %67 = vector.load %arg2[%c2_54, %c2_55, %c0_56] : memref<3x3x128xf32, #tpu.memory_space<vmem>>, vector<1x1x128xf32>
    %68 = vector.shape_cast %67 : vector<1x1x128xf32> to vector<128xf32>
    %69 = vector.shape_cast %68 : vector<128xf32> to vector<1x1x1x128xf32>
    %70 = vector.broadcast %69 : vector<1x1x1x128xf32> to vector<4x8x8x128xf32>
    %71 = arith.mulf %66, %70 : vector<4x8x8x128xf32>
    %72 = arith.addf %65, %71 : vector<4x8x8x128xf32>
    %73 = vector.shape_cast %72 : vector<4x8x8x128xf32> to vector<256x128xf32>
    %74 = arith.truncf %73 : vector<256x128xf32> to vector<256x128xbf16>
    %c0_57 = arith.constant 0 : index
    %c0_58 = arith.constant 0 : index
    %75 = vector.load %arg3[%c0_57, %c0_58] : memref<128x128xbf16, #tpu.memory_space<vmem>>, vector<128x128xbf16>
    %cst_59 = arith.constant dense<0.000000e+00> : vector<256x128xf32>
    %76 = tpu.matmul %74, %75, %cst_59 {dimension_numbers = #tpu.dot_dimension_numbers<[1], [0], [0], [1], [0, 0, 1, 1], [], []>} : vector<256x128xbf16>, vector<128x128xbf16>, vector<256x128xf32> -> vector<256x128xf32>
    %c0_60 = arith.constant 0 : index
    %c0_61 = arith.constant 0 : index
    %77 = vector.load %arg4[%c0_60, %c0_61] : memref<1x128xf32, #tpu.memory_space<vmem>>, vector<1x128xf32>
    %78 = vector.shape_cast %77 : vector<1x128xf32> to vector<128xf32>
    %79 = vector.shape_cast %78 : vector<128xf32> to vector<1x128xf32>
    %80 = vector.broadcast %79 : vector<1x128xf32> to vector<256x128xf32>
    %81 = arith.addf %76, %80 : vector<256x128xf32>
    %cst_62 = arith.constant 0.000000e+00 : f32
    %82 = vector.broadcast %cst_62 : f32 to vector<256x128xf32>
    %83 = arith.cmpf ogt, %81, %82 : vector<256x128xf32>
    %cst_63 = arith.constant 0.00999999977 : f32
    %84 = vector.broadcast %cst_63 : f32 to vector<256x128xf32>
    %85 = arith.mulf %84, %81 : vector<256x128xf32>
    %86 = arith.select %83, %81, %85 : vector<256x128xi1>, vector<256x128xf32>
    %87 = vector.shape_cast %86 : vector<256x128xf32> to vector<4x8x8x128xf32>
    %c0_64 = arith.constant 0 : index
    %c1_65 = arith.constant 1 : index
    %c8_66 = arith.constant 8 : index
    %c0_67 = arith.constant 0 : index
    %88 = vector.load %arg9[%c0_64, %c1_65, %c8_66, %c0_67] : memref<4x10x24x128xf32, #tpu.memory_space<vmem>>, vector<4x8x8x128xf32>
    tpu.vector_store %arg9[%c0_64, %c1_65, %c8_66, %c0_67], %87 {strides = array<i32>} : memref<4x10x24x128xf32, #tpu.memory_space<vmem>>, vector<4x8x8x128xf32>,
    %c0_68 = arith.constant 0 : index
    %c0_69 = arith.constant 0 : index
    %c7_70 = arith.constant 7 : index
    %c0_71 = arith.constant 0 : index
    %89 = vector.load %arg9[%c0_68, %c0_69, %c7_70, %c0_71] : memref<4x10x24x128xf32, #tpu.memory_space<vmem>>, vector<4x10x8x128xf32>
    %c0_72 = arith.constant 0 : index
    %c0_73 = arith.constant 0 : index
    %c8_74 = arith.constant 8 : index
    %c0_75 = arith.constant 0 : index
    %90 = vector.load %arg9[%c0_72, %c0_73, %c8_74, %c0_75] : memref<4x10x24x128xf32, #tpu.memory_space<vmem>>, vector<4x10x8x128xf32>
    %c0_76 = arith.constant 0 : index
    %c0_77 = arith.constant 0 : index
    %c9_78 = arith.constant 9 : index
    %c0_79 = arith.constant 0 : index
    %91 = vector.load %arg9[%c0_76, %c0_77, %c9_78, %c0_79] : memref<4x10x24x128xf32, #tpu.memory_space<vmem>>, vector<4x10x8x128xf32>
    %92 = vector.extract_strided_slice %89 {offsets = [0, 0, 0, 0], sizes = [4, 8, 8, 128], strides = [1, 1, 1, 1]} : vector<4x10x8x128xf32> to vector<4x8x8x128xf32>
    %c0_80 = arith.constant 0 : index
    %c0_81 = arith.constant 0 : index
    %c0_82 = arith.constant 0 : index
    %93 = vector.load %arg5[%c0_80, %c0_81, %c0_82] : memref<3x3x128xf32, #tpu.memory_space<vmem>>, vector<1x1x128xf32>
    %94 = vector.shape_cast %93 : vector<1x1x128xf32> to vector<128xf32>
    %95 = vector.shape_cast %94 : vector<128xf32> to vector<1x1x1x128xf32>
    %96 = vector.broadcast %95 : vector<1x1x1x128xf32> to vector<4x8x8x128xf32>
    %97 = arith.mulf %92, %96 : vector<4x8x8x128xf32>
    %98 = vector.extract_strided_slice %90 {offsets = [0, 0, 0, 0], sizes = [4, 8, 8, 128], strides = [1, 1, 1, 1]} : vector<4x10x8x128xf32> to vector<4x8x8x128xf32>
    %c0_83 = arith.constant 0 : index
    %c1_84 = arith.constant 1 : index
    %c0_85 = arith.constant 0 : index
    %99 = vector.load %arg5[%c0_83, %c1_84, %c0_85] : memref<3x3x128xf32, #tpu.memory_space<vmem>>, vector<1x1x128xf32>
    %100 = vector.shape_cast %99 : vector<1x1x128xf32> to vector<128xf32>
    %101 = vector.shape_cast %100 : vector<128xf32> to vector<1x1x1x128xf32>
    %102 = vector.broadcast %101 : vector<1x1x1x128xf32> to vector<4x8x8x128xf32>
    %103 = arith.mulf %98, %102 : vector<4x8x8x128xf32>
    %104 = arith.addf %97, %103 : vector<4x8x8x128xf32>
    %105 = vector.extract_strided_slice %91 {offsets = [0, 0, 0, 0], sizes = [4, 8, 8, 128], strides = [1, 1, 1, 1]} : vector<4x10x8x128xf32> to vector<4x8x8x128xf32>
    %c0_86 = arith.constant 0 : index
    %c2_87 = arith.constant 2 : index
    %c0_88 = arith.constant 0 : index
    %106 = vector.load %arg5[%c0_86, %c2_87, %c0_88] : memref<3x3x128xf32, #tpu.memory_space<vmem>>, vector<1x1x128xf32>
    %107 = vector.shape_cast %106 : vector<1x1x128xf32> to vector<128xf32>
    %108 = vector.shape_cast %107 : vector<128xf32> to vector<1x1x1x128xf32>
    %109 = vector.broadcast %108 : vector<1x1x1x128xf32> to vector<4x8x8x128xf32>
    %110 = arith.mulf %105, %109 : vector<4x8x8x128xf32>
    %111 = arith.addf %104, %110 : vector<4x8x8x128xf32>
    %112 = vector.extract_strided_slice %89 {offsets = [0, 1, 0, 0], sizes = [4, 8, 8, 128], strides = [1, 1, 1, 1]} : vector<4x10x8x128xf32> to vector<4x8x8x128xf32>
    %c1_89 = arith.constant 1 : index
    %c0_90 = arith.constant 0 : index
    %c0_91 = arith.constant 0 : index
    %113 = vector.load %arg5[%c1_89, %c0_90, %c0_91] : memref<3x3x128xf32, #tpu.memory_space<vmem>>, vector<1x1x128xf32>
    %114 = vector.shape_cast %113 : vector<1x1x128xf32> to vector<128xf32>
    %115 = vector.shape_cast %114 : vector<128xf32> to vector<1x1x1x128xf32>
    %116 = vector.broadcast %115 : vector<1x1x1x128xf32> to vector<4x8x8x128xf32>
    %117 = arith.mulf %112, %116 : vector<4x8x8x128xf32>
    %118 = arith.addf %111, %117 : vector<4x8x8x128xf32>
    %119 = vector.extract_strided_slice %90 {offsets = [0, 1, 0, 0], sizes = [4, 8, 8, 128], strides = [1, 1, 1, 1]} : vector<4x10x8x128xf32> to vector<4x8x8x128xf32>
    %c1_92 = arith.constant 1 : index
    %c1_93 = arith.constant 1 : index
    %c0_94 = arith.constant 0 : index
    %120 = vector.load %arg5[%c1_92, %c1_93, %c0_94] : memref<3x3x128xf32, #tpu.memory_space<vmem>>, vector<1x1x128xf32>
    %121 = vector.shape_cast %120 : vector<1x1x128xf32> to vector<128xf32>
    %122 = vector.shape_cast %121 : vector<128xf32> to vector<1x1x1x128xf32>
    %123 = vector.broadcast %122 : vector<1x1x1x128xf32> to vector<4x8x8x128xf32>
    %124 = arith.mulf %119, %123 : vector<4x8x8x128xf32>
    %125 = arith.addf %118, %124 : vector<4x8x8x128xf32>
    %126 = vector.extract_strided_slice %91 {offsets = [0, 1, 0, 0], sizes = [4, 8, 8, 128], strides = [1, 1, 1, 1]} : vector<4x10x8x128xf32> to vector<4x8x8x128xf32>
    %c1_95 = arith.constant 1 : index
    %c2_96 = arith.constant 2 : index
    %c0_97 = arith.constant 0 : index
    %127 = vector.load %arg5[%c1_95, %c2_96, %c0_97] : memref<3x3x128xf32, #tpu.memory_space<vmem>>, vector<1x1x128xf32>
    %128 = vector.shape_cast %127 : vector<1x1x128xf32> to vector<128xf32>
    %129 = vector.shape_cast %128 : vector<128xf32> to vector<1x1x1x128xf32>
    %130 = vector.broadcast %129 : vector<1x1x1x128xf32> to vector<4x8x8x128xf32>
    %131 = arith.mulf %126, %130 : vector<4x8x8x128xf32>
    %132 = arith.addf %125, %131 : vector<4x8x8x128xf32>
    %133 = vector.extract_strided_slice %89 {offsets = [0, 2, 0, 0], sizes = [4, 8, 8, 128], strides = [1, 1, 1, 1]} : vector<4x10x8x128xf32> to vector<4x8x8x128xf32>
    %c2_98 = arith.constant 2 : index
    %c0_99 = arith.constant 0 : index
    %c0_100 = arith.constant 0 : index
    %134 = vector.load %arg5[%c2_98, %c0_99, %c0_100] : memref<3x3x128xf32, #tpu.memory_space<vmem>>, vector<1x1x128xf32>
    %135 = vector.shape_cast %134 : vector<1x1x128xf32> to vector<128xf32>
    %136 = vector.shape_cast %135 : vector<128xf32> to vector<1x1x1x128xf32>
    %137 = vector.broadcast %136 : vector<1x1x1x128xf32> to vector<4x8x8x128xf32>
    %138 = arith.mulf %133, %137 : vector<4x8x8x128xf32>
    %139 = arith.addf %132, %138 : vector<4x8x8x128xf32>
    %140 = vector.extract_strided_slice %90 {offsets = [0, 2, 0, 0], sizes = [4, 8, 8, 128], strides = [1, 1, 1, 1]} : vector<4x10x8x128xf32> to vector<4x8x8x128xf32>
    %c2_101 = arith.constant 2 : index
    %c1_102 = arith.constant 1 : index
    %c0_103 = arith.constant 0 : index
    %141 = vector.load %arg5[%c2_101, %c1_102, %c0_103] : memref<3x3x128xf32, #tpu.memory_space<vmem>>, vector<1x1x128xf32>
    %142 = vector.shape_cast %141 : vector<1x1x128xf32> to vector<128xf32>
    %143 = vector.shape_cast %142 : vector<128xf32> to vector<1x1x1x128xf32>
    %144 = vector.broadcast %143 : vector<1x1x1x128xf32> to vector<4x8x8x128xf32>
    %145 = arith.mulf %140, %144 : vector<4x8x8x128xf32>
    %146 = arith.addf %139, %145 : vector<4x8x8x128xf32>
    %147 = vector.extract_strided_slice %91 {offsets = [0, 2, 0, 0], sizes = [4, 8, 8, 128], strides = [1, 1, 1, 1]} : vector<4x10x8x128xf32> to vector<4x8x8x128xf32>
    %c2_104 = arith.constant 2 : index
    %c2_105 = arith.constant 2 : index
    %c0_106 = arith.constant 0 : index
    %148 = vector.load %arg5[%c2_104, %c2_105, %c0_106] : memref<3x3x128xf32, #tpu.memory_space<vmem>>, vector<1x1x128xf32>
    %149 = vector.shape_cast %148 : vector<1x1x128xf32> to vector<128xf32>
    %150 = vector.shape_cast %149 : vector<128xf32> to vector<1x1x1x128xf32>
    %151 = vector.broadcast %150 : vector<1x1x1x128xf32> to vector<4x8x8x128xf32>
    %152 = arith.mulf %147, %151 : vector<4x8x8x128xf32>
    %153 = arith.addf %146, %152 : vector<4x8x8x128xf32>
    %154 = vector.shape_cast %153 : vector<4x8x8x128xf32> to vector<256x128xf32>
    %155 = arith.truncf %154 : vector<256x128xf32> to vector<256x128xbf16>
    %c0_107 = arith.constant 0 : index
    %c0_108 = arith.constant 0 : index
    %156 = vector.load %arg6[%c0_107, %c0_108] : memref<128x128xbf16, #tpu.memory_space<vmem>>, vector<128x128xbf16>
    %cst_109 = arith.constant dense<0.000000e+00> : vector<256x128xf32>
    %157 = tpu.matmul %155, %156, %cst_109 {dimension_numbers = #tpu.dot_dimension_numbers<[1], [0], [0], [1], [0, 0, 1, 1], [], []>} : vector<256x128xbf16>, vector<128x128xbf16>, vector<256x128xf32> -> vector<256x128xf32>
    %c0_110 = arith.constant 0 : index
    %c0_111 = arith.constant 0 : index
    %158 = vector.load %arg7[%c0_110, %c0_111] : memref<1x128xf32, #tpu.memory_space<vmem>>, vector<1x128xf32>
    %159 = vector.shape_cast %158 : vector<1x128xf32> to vector<128xf32>
    %160 = vector.shape_cast %159 : vector<128xf32> to vector<1x128xf32>
    %161 = vector.broadcast %160 : vector<1x128xf32> to vector<256x128xf32>
    %162 = arith.addf %157, %161 : vector<256x128xf32>
    %cst_112 = arith.constant 0.000000e+00 : f32
    %163 = vector.broadcast %cst_112 : f32 to vector<256x128xf32>
    %164 = arith.cmpf ogt, %162, %163 : vector<256x128xf32>
    %cst_113 = arith.constant 0.00999999977 : f32
    %165 = vector.broadcast %cst_113 : f32 to vector<256x128xf32>
    %166 = arith.mulf %165, %162 : vector<256x128xf32>
    %167 = arith.select %164, %162, %166 : vector<256x128xi1>, vector<256x128xf32>
    %168 = vector.shape_cast %167 : vector<256x128xf32> to vector<4x8x8x128xf32>
    %c0_114 = arith.constant 0 : index
    %c1_115 = arith.constant 1 : index
    %c8_116 = arith.constant 8 : index
    %c0_117 = arith.constant 0 : index
    %169 = vector.load %arg9[%c0_114, %c1_115, %c8_116, %c0_117] : memref<4x10x24x128xf32, #tpu.memory_space<vmem>>, vector<4x8x8x128xf32>
    tpu.vector_store %arg9[%c0_114, %c1_115, %c8_116, %c0_117], %168 {strides = array<i32>} : memref<4x10x24x128xf32, #tpu.memory_space<vmem>>, vector<4x8x8x128xf32>,
    %170 = vector.extract_strided_slice %168 {offsets = [0, 0, 0, 0], sizes = [4, 1, 8, 128], strides = [1, 1, 1, 1]} : vector<4x8x8x128xf32> to vector<4x1x8x128xf32>
    %c0_118 = arith.constant 0 : index
    %c0_119 = arith.constant 0 : index
    %c8_120 = arith.constant 8 : index
    %c0_121 = arith.constant 0 : index
    %171 = vector.load %arg9[%c0_118, %c0_119, %c8_120, %c0_121] : memref<4x10x24x128xf32, #tpu.memory_space<vmem>>, vector<4x1x8x128xf32>
    tpu.vector_store %arg9[%c0_118, %c0_119, %c8_120, %c0_121], %170 {strides = array<i32>} : memref<4x10x24x128xf32, #tpu.memory_space<vmem>>, vector<4x1x8x128xf32>,
    %172 = vector.extract_strided_slice %168 {offsets = [0, 7, 0, 0], sizes = [4, 1, 8, 128], strides = [1, 1, 1, 1]} : vector<4x8x8x128xf32> to vector<4x1x8x128xf32>
    %c0_122 = arith.constant 0 : index
    %c9_123 = arith.constant 9 : index
    %c8_124 = arith.constant 8 : index
    %c0_125 = arith.constant 0 : index
    %173 = vector.load %arg9[%c0_122, %c9_123, %c8_124, %c0_125] : memref<4x10x24x128xf32, #tpu.memory_space<vmem>>, vector<4x1x8x128xf32>
    tpu.vector_store %arg9[%c0_122, %c9_123, %c8_124, %c0_125], %172 {strides = array<i32>} : memref<4x10x24x128xf32, #tpu.memory_space<vmem>>, vector<4x1x8x128xf32>,
    %c0_126 = arith.constant 0 : index
    %c0_127 = arith.constant 0 : index
    %c8_128 = arith.constant 8 : index
    %c0_129 = arith.constant 0 : index
    %174 = vector.load %arg9[%c0_126, %c0_127, %c8_128, %c0_129] : memref<4x10x24x128xf32, #tpu.memory_space<vmem>>, vector<4x10x1x128xf32>
    %c0_130 = arith.constant 0 : index
    %c0_131 = arith.constant 0 : index
    %c7_132 = arith.constant 7 : index
    %c0_133 = arith.constant 0 : index
    %175 = vector.load %arg9[%c0_130, %c0_131, %c7_132, %c0_133] : memref<4x10x24x128xf32, #tpu.memory_space<vmem>>, vector<4x10x1x128xf32>
    tpu.vector_store %arg9[%c0_130, %c0_131, %c7_132, %c0_133], %174 {strides = array<i32>} : memref<4x10x24x128xf32, #tpu.memory_space<vmem>>, vector<4x10x1x128xf32>,
    %c0_134 = arith.constant 0 : index
    %c0_135 = arith.constant 0 : index
    %c15 = arith.constant 15 : index
    %c0_136 = arith.constant 0 : index
    %176 = vector.load %arg9[%c0_134, %c0_135, %c15, %c0_136] : memref<4x10x24x128xf32, #tpu.memory_space<vmem>>, vector<4x10x1x128xf32>
    %c0_137 = arith.constant 0 : index
    %c0_138 = arith.constant 0 : index
    %c16_139 = arith.constant 16 : index
    %c0_140 = arith.constant 0 : index
    %177 = vector.load %arg9[%c0_137, %c0_138, %c16_139, %c0_140] : memref<4x10x24x128xf32, #tpu.memory_space<vmem>>, vector<4x10x1x128xf32>
    tpu.vector_store %arg9[%c0_137, %c0_138, %c16_139, %c0_140], %176 {strides = array<i32>} : memref<4x10x24x128xf32, #tpu.memory_space<vmem>>, vector<4x10x1x128xf32>,
    %c0_141 = arith.constant 0 : index
    %c0_142 = arith.constant 0 : index
    %c7_143 = arith.constant 7 : index
    %c0_144 = arith.constant 0 : index
    %178 = vector.load %arg9[%c0_141, %c0_142, %c7_143, %c0_144] : memref<4x10x24x128xf32, #tpu.memory_space<vmem>>, vector<4x10x8x128xf32>
    %c0_145 = arith.constant 0 : index
    %c0_146 = arith.constant 0 : index
    %c8_147 = arith.constant 8 : index
    %c0_148 = arith.constant 0 : index
    %179 = vector.load %arg9[%c0_145, %c0_146, %c8_147, %c0_148] : memref<4x10x24x128xf32, #tpu.memory_space<vmem>>, vector<4x10x8x128xf32>
    %c0_149 = arith.constant 0 : index
    %c0_150 = arith.constant 0 : index
    %c9_151 = arith.constant 9 : index
    %c0_152 = arith.constant 0 : index
    %180 = vector.load %arg9[%c0_149, %c0_150, %c9_151, %c0_152] : memref<4x10x24x128xf32, #tpu.memory_space<vmem>>, vector<4x10x8x128xf32>
    %cst_153 = arith.constant 7.500000e-01 : f32
    %181 = vector.broadcast %cst_153 : f32 to vector<4x10x8x128xf32>
    %182 = arith.mulf %181, %179 : vector<4x10x8x128xf32>
    %cst_154 = arith.constant 2.500000e-01 : f32
    %183 = vector.broadcast %cst_154 : f32 to vector<4x10x8x128xf32>
    %184 = arith.mulf %183, %178 : vector<4x10x8x128xf32>
    %185 = arith.addf %182, %184 : vector<4x10x8x128xf32>
    %cst_155 = arith.constant 7.500000e-01 : f32
    %186 = vector.broadcast %cst_155 : f32 to vector<4x10x8x128xf32>
    %187 = arith.mulf %186, %179 : vector<4x10x8x128xf32>
    %cst_156 = arith.constant 2.500000e-01 : f32
    %188 = vector.broadcast %cst_156 : f32 to vector<4x10x8x128xf32>
    %189 = arith.mulf %188, %180 : vector<4x10x8x128xf32>
    %190 = arith.addf %187, %189 : vector<4x10x8x128xf32>
    %191 = vector.extract_strided_slice %185 {offsets = [0, 1, 0, 0], sizes = [4, 8, 8, 128], strides = [1, 1, 1, 1]} : vector<4x10x8x128xf32> to vector<4x8x8x128xf32>
    %cst_157 = arith.constant 7.500000e-01 : f32
    %192 = vector.broadcast %cst_157 : f32 to vector<4x8x8x128xf32>
    %193 = arith.mulf %192, %191 : vector<4x8x8x128xf32>
    %194 = vector.extract_strided_slice %185 {offsets = [0, 0, 0, 0], sizes = [4, 8, 8, 128], strides = [1, 1, 1, 1]} : vector<4x10x8x128xf32> to vector<4x8x8x128xf32>
    %cst_158 = arith.constant 2.500000e-01 : f32
    %195 = vector.broadcast %cst_158 : f32 to vector<4x8x8x128xf32>
    %196 = arith.mulf %195, %194 : vector<4x8x8x128xf32>
    %197 = arith.addf %193, %196 : vector<4x8x8x128xf32>
    %198 = vector.extract_strided_slice %190 {offsets = [0, 1, 0, 0], sizes = [4, 8, 8, 128], strides = [1, 1, 1, 1]} : vector<4x10x8x128xf32> to vector<4x8x8x128xf32>
    %cst_159 = arith.constant 7.500000e-01 : f32
    %199 = vector.broadcast %cst_159 : f32 to vector<4x8x8x128xf32>
    %200 = arith.mulf %199, %198 : vector<4x8x8x128xf32>
    %201 = vector.extract_strided_slice %190 {offsets = [0, 0, 0, 0], sizes = [4, 8, 8, 128], strides = [1, 1, 1, 1]} : vector<4x10x8x128xf32> to vector<4x8x8x128xf32>
    %cst_160 = arith.constant 2.500000e-01 : f32
    %202 = vector.broadcast %cst_160 : f32 to vector<4x8x8x128xf32>
    %203 = arith.mulf %202, %201 : vector<4x8x8x128xf32>
    %204 = arith.addf %200, %203 : vector<4x8x8x128xf32>
    %205 = vector.extract_strided_slice %185 {offsets = [0, 1, 0, 0], sizes = [4, 8, 8, 128], strides = [1, 1, 1, 1]} : vector<4x10x8x128xf32> to vector<4x8x8x128xf32>
    %cst_161 = arith.constant 7.500000e-01 : f32
    %206 = vector.broadcast %cst_161 : f32 to vector<4x8x8x128xf32>
    %207 = arith.mulf %206, %205 : vector<4x8x8x128xf32>
    %208 = vector.extract_strided_slice %185 {offsets = [0, 2, 0, 0], sizes = [4, 8, 8, 128], strides = [1, 1, 1, 1]} : vector<4x10x8x128xf32> to vector<4x8x8x128xf32>
    %cst_162 = arith.constant 2.500000e-01 : f32
    %209 = vector.broadcast %cst_162 : f32 to vector<4x8x8x128xf32>
    %210 = arith.mulf %209, %208 : vector<4x8x8x128xf32>
    %211 = arith.addf %207, %210 : vector<4x8x8x128xf32>
    %212 = vector.extract_strided_slice %190 {offsets = [0, 1, 0, 0], sizes = [4, 8, 8, 128], strides = [1, 1, 1, 1]} : vector<4x10x8x128xf32> to vector<4x8x8x128xf32>
    %cst_163 = arith.constant 7.500000e-01 : f32
    %213 = vector.broadcast %cst_163 : f32 to vector<4x8x8x128xf32>
    %214 = arith.mulf %213, %212 : vector<4x8x8x128xf32>
    %215 = vector.extract_strided_slice %190 {offsets = [0, 2, 0, 0], sizes = [4, 8, 8, 128], strides = [1, 1, 1, 1]} : vector<4x10x8x128xf32> to vector<4x8x8x128xf32>
    %cst_164 = arith.constant 2.500000e-01 : f32
    %216 = vector.broadcast %cst_164 : f32 to vector<4x8x8x128xf32>
    %217 = arith.mulf %216, %215 : vector<4x8x8x128xf32>
    %218 = arith.addf %214, %217 : vector<4x8x8x128xf32>
    %c0_165 = arith.constant 0 : index
    %c0_166 = arith.constant 0 : index
    %c0_167 = arith.constant 0 : index
    %c0_168 = arith.constant 0 : index
    %c0_169 = arith.constant 0 : index
    %219 = vector.load %arg8[%c0_165, %c0_166, %c0_167, %c0_168, %c0_169] : memref<4x8x2x8x256xf32, #tpu.memory_space<vmem>>, vector<4x8x1x8x128xf32>
    %220 = vector.shape_cast %219 : vector<4x8x1x8x128xf32> to vector<4x8x8x128xf32>
    %221 = vector.shape_cast %197 : vector<4x8x8x128xf32> to vector<4x8x1x8x128xf32>
    tpu.vector_store %arg8[%c0_165, %c0_166, %c0_167, %c0_168, %c0_169], %221 {strides = array<i32>} : memref<4x8x2x8x256xf32, #tpu.memory_space<vmem>>, vector<4x8x1x8x128xf32>,
    %c0_170 = arith.constant 0 : index
    %c0_171 = arith.constant 0 : index
    %c0_172 = arith.constant 0 : index
    %c0_173 = arith.constant 0 : index
    %c128 = arith.constant 128 : index
    %222 = vector.load %arg8[%c0_170, %c0_171, %c0_172, %c0_173, %c128] : memref<4x8x2x8x256xf32, #tpu.memory_space<vmem>>, vector<4x8x1x8x128xf32>
    %223 = vector.shape_cast %222 : vector<4x8x1x8x128xf32> to vector<4x8x8x128xf32>
    %224 = vector.shape_cast %204 : vector<4x8x8x128xf32> to vector<4x8x1x8x128xf32>
    tpu.vector_store %arg8[%c0_170, %c0_171, %c0_172, %c0_173, %c128], %224 {strides = array<i32>} : memref<4x8x2x8x256xf32, #tpu.memory_space<vmem>>, vector<4x8x1x8x128xf32>,
    %c0_174 = arith.constant 0 : index
    %c0_175 = arith.constant 0 : index
    %c1_176 = arith.constant 1 : index
    %c0_177 = arith.constant 0 : index
    %c0_178 = arith.constant 0 : index
    %225 = vector.load %arg8[%c0_174, %c0_175, %c1_176, %c0_177, %c0_178] : memref<4x8x2x8x256xf32, #tpu.memory_space<vmem>>, vector<4x8x1x8x128xf32>
    %226 = vector.shape_cast %225 : vector<4x8x1x8x128xf32> to vector<4x8x8x128xf32>
    %227 = vector.shape_cast %211 : vector<4x8x8x128xf32> to vector<4x8x1x8x128xf32>
    tpu.vector_store %arg8[%c0_174, %c0_175, %c1_176, %c0_177, %c0_178], %227 {strides = array<i32>} : memref<4x8x2x8x256xf32, #tpu.memory_space<vmem>>, vector<4x8x1x8x128xf32>,
    %c0_179 = arith.constant 0 : index
    %c0_180 = arith.constant 0 : index
    %c1_181 = arith.constant 1 : index
    %c0_182 = arith.constant 0 : index
    %c128_183 = arith.constant 128 : index
    %228 = vector.load %arg8[%c0_179, %c0_180, %c1_181, %c0_182, %c128_183] : memref<4x8x2x8x256xf32, #tpu.memory_space<vmem>>, vector<4x8x1x8x128xf32>
    %229 = vector.shape_cast %228 : vector<4x8x1x8x128xf32> to vector<4x8x8x128xf32>
    %230 = vector.shape_cast %218 : vector<4x8x8x128xf32> to vector<4x8x1x8x128xf32>
    tpu.vector_store %arg8[%c0_179, %c0_180, %c1_181, %c0_182, %c128_183], %230 {strides = array<i32>} : memref<4x8x2x8x256xf32, #tpu.memory_space<vmem>>, vector<4x8x1x8x128xf32>,
    return
  }
  func.func @transform_0(%arg0: i32) -> (i32, i32, i32, i32) {
    %c0_i32 = arith.constant 0 : i32
    %c0_i32_0 = arith.constant 0 : i32
    %c0_i32_1 = arith.constant 0 : i32
    %c0_i32_2 = arith.constant 0 : i32
    return %arg0, %c0_i32, %c0_i32_0, %c0_i32_1 : i32, i32, i32, i32
  }
  func.func @transform_1(%arg0: i32) -> (i32, i32, i32) {
    %c0_i32 = arith.constant 0 : i32
    %c0_i32_0 = arith.constant 0 : i32
    %c0_i32_1 = arith.constant 0 : i32
    %c0_i32_2 = arith.constant 0 : i32
    return %c0_i32, %c0_i32_0, %c0_i32_1 : i32, i32, i32
  }
  func.func @transform_2(%arg0: i32) -> (i32, i32) {
    %c0_i32 = arith.constant 0 : i32
    %c0_i32_0 = arith.constant 0 : i32
    %c0_i32_1 = arith.constant 0 : i32
    return %c0_i32, %c0_i32_0 : i32, i32
  }
  func.func @transform_3(%arg0: i32) -> (i32, i32) {
    %c0_i32 = arith.constant 0 : i32
    %c0_i32_0 = arith.constant 0 : i32
    %c0_i32_1 = arith.constant 0 : i32
    return %c0_i32, %c0_i32_0 : i32, i32
  }
  func.func @transform_4(%arg0: i32) -> (i32, i32, i32) {
    %c0_i32 = arith.constant 0 : i32
    %c0_i32_0 = arith.constant 0 : i32
    %c0_i32_1 = arith.constant 0 : i32
    %c0_i32_2 = arith.constant 0 : i32
    return %c0_i32, %c0_i32_0, %c0_i32_1 : i32, i32, i32
  }
  func.func @transform_5(%arg0: i32) -> (i32, i32) {
    %c0_i32 = arith.constant 0 : i32
    %c0_i32_0 = arith.constant 0 : i32
    %c0_i32_1 = arith.constant 0 : i32
    return %c0_i32, %c0_i32_0 : i32, i32
  }
  func.func @transform_6(%arg0: i32) -> (i32, i32) {
    %c0_i32 = arith.constant 0 : i32
    %c0_i32_0 = arith.constant 0 : i32
    %c0_i32_1 = arith.constant 0 : i32
    return %c0_i32, %c0_i32_0 : i32, i32
  }
  func.func @transform_7(%arg0: i32) -> (i32, i32, i32, i32, i32) {
    %c0_i32 = arith.constant 0 : i32
    %c0_i32_0 = arith.constant 0 : i32
    %c0_i32_1 = arith.constant 0 : i32
    %c0_i32_2 = arith.constant 0 : i32
    %c0_i32_3 = arith.constant 0 : i32
    return %arg0, %c0_i32, %c0_i32_0, %c0_i32_1, %c0_i32_2 : i32, i32, i32, i32, i32
  }
}

</mosaic_0001>

<bundles_post_ra>
// kernel: tpu_custom_call.1
= control target key start
LH: loop header
LB: loop body
LE: loop exit
PB: predicated region body
PF: predicated region fallthrough
CT: control target
= control target key end

     0   :  { %s6306_s0 = inlined_call_operand.hbm [shape: f32[8,8,8,128], index: 0, kind: input, shape index: {}]   ;;  %s6307_s1 = inlined_call_operand.hbm [shape: f32[3,3,128], index: 1, kind: input, shape index: {}]   ;;  %s6308_s2 = inlined_call_operand.hbm [shape: bf16[128,128], index: 2, kind: input, shape index: {}]   ;;  %s6309_s3 = inlined_call_operand.vmem [shape: f32[1,128], index: 3, kind: input, shape index: {}]   ;;  %s6310_s4 = inlined_call_operand.hbm [shape: f32[3,3,128], index: 4, kind: input, shape index: {}]   ;;  %s6311_s5 = inlined_call_operand.hbm [shape: bf16[128,128], index: 5, kind: input, shape index: {}]   ;;  %s6312_s6 = inlined_call_operand.vmem [shape: f32[1,128], index: 6, kind: input, shape index: {}]   ;;  %s6313_s7 = inlined_call_operand.hbm [shape: f32[8,8,2,8,256], index: 7, kind: output, shape index: {}]  }
   0x1   :  { %6326 = sst [smem:[#allocation21_spill]] %s6307_s1 }
   0x2   :  { %12 = vsyncpa [#allocation4], 0 }
   0x3   :  { %14 = vsyncpa [#allocation4 + $0x1], 0 }
   0x4   :  { %15 = vsyncpa [#allocation7], 0 }
   0x5   :  { %16 = vsyncpa [#allocation10], 0 }
   0x6   :  { %17 = vsyncpa [#allocation5], 0 }
   0x7   :  { %19 = vsyncpa [#allocation5 + $0x1], 0  ;;  %s4359_s24 = smov 0   ;;  %s4361_s25 = smov 0  }
   0x8   :  { %s4363_s26 = smov 0   ;;  %s4365_s27 = smov 0  }
   0x9 LB: > { %s4380_s28 = sadd.s32 4294967295, %s4304_s27   ;;  %s3694_s29 = sadd.s32 4294967294, %s4304_s27   ;;  %s4304_s27 = sphi %s4365_s27, %s6354_s27   ;;  %s4300_s26 = sphi %s4363_s26, %s6353_s26   ;;  %s4296_s25 = sphi %s4361_s25, %s6352_s25   ;;  %s4292_s24 = sphi %s4359_s24, %s6351_s24  }
   0xa   : > { %p45_p0 = scmp.ne.s32.totalorder %s4296_s25, %s4292_s24  ;;  %p6314_p1 = scmp.eq.s32.totalorder %s4380_s28, 0 }
   0xb   : > { %p195_p2 = scmp.eq.s32.totalorder %s4380_s28, 1  ;;  %p201_p3 = scmp.eq.s32.totalorder %s3694_s29, 1 }
   0xc   : > { %p4389_p4 = por %p6314_p1, %p45_p0  ;;  %p3695_p5 = scmp.ge.s32.totalorder %s4304_s27, 1 }
   0xd   : > { %p4394_p6 = por %p201_p3, %p45_p0  ;;  %p208_p7 = scmp.lt.s32.totalorder %s4304_s27, 3 }
   0xe   : > { %s6327_s30 = scalar_select %p4389_p4, 1, 0 }
   0xf   : > { %s6328_s8 = scalar_select %p4394_p6, 1, 0 }
  0x10   : > { %p4399_p8 = pnand %p3695_p5, %p208_p7  ;;  %s4306_s10 = smov [#allocation6]  }
  0x11   : > { %s220_s11 = sshll.u32 %s4306_s10, 4  ;;  %s4307_s13 = smov [#allocation9]   ;;  %s221_s11 = int_to_ptr.vmem [resolvable:$true] %s220_s11 }
  0x12   : > { %s6329_s9 = scalar_select %p4399_p8, 1, 0 }
  0x13   : > { %p3986_p9 = pneg %p4399_p8  ;;  %s249_s14 = sshll.u32 %s4307_s13, 4  ;;  %s250_s14 = int_to_ptr.vmem [resolvable:$true] %s249_s14 }
  0x14   : > { %s4308_s15 = smov [#allocation8]   ;;  %s4111_s17 = scalar_lea.vmem %s221_s11, 192 }
  0x15   : > { %p4408_p11 = pnand %p3986_p9, %p6314_p1  ;;  %s233_s16 = sshll.u32 %s4308_s15, 4  ;;  %s234_s16 = int_to_ptr.vmem [resolvable:$true] %s233_s16 }
  0x16   : > { %p4112_p13 = scmp.ne.s32.totalorder %s221_s11, %s4111_s17  ;;  %p4119_p5 = scmp.lt.s32.totalorder %s221_s11, %s221_s11 }
  0x17   : > { %p4102_p12 = pneg %p4408_p11  ;;  %p4120_p7 = scmp.lt.s32.totalorder %s4111_s17, %s4111_s17 }
  0x19   : > { %p4114_p0 = pnand %p4112_p13, %p4102_p12  ;;  %p4121_p9 = por %p4120_p7, %p4119_p5 }
  0x1b   : > { %p4115_p3 = pneg %p4114_p0 }
  0x1d   : > { %p4122_p10 = pnand %p4121_p9, %p4115_p3 }
  0x1f   : > { %4125 = shalt.err (!%p4122_p10)
}
  0x20   : > { %s4309_s18 = smov 64   ;;  %s4310_s19 = smov 4  }
  0x21   : > { %s6331_s1 = sld [smem:[#allocation21_spill]]  ;;  %s4137_s22 = scalar_lea.vmem %s250_s14, 192 }
  0x22   : > { %p4138_p13 = scmp.ne.s32.totalorder %s250_s14, %s4137_s22  ;;  %p4145_p3 = scmp.lt.s32.totalorder %s250_s14, %s250_s14 }
  0x23   : > { %p4146_p10 = scmp.lt.s32.totalorder %s4137_s22, %s4137_s22 }
  0x24   : > { %p4140_p0 = pnand %p4138_p13, %p4102_p12 }
  0x25   : > { %p4147_p7 = por %p4146_p10, %p4145_p3 }
  0x26   : > { %p4141_p5 = pneg %p4140_p0 }
  0x27   : > { %3989 = dma.hbm_to_vmem [thread:$0]  (!%p4408_p11), %s6331_s1, 192, %s221_s11, [#allocation7], %s4309_s18, %s4309_s18, %s4310_s19  }
  0x28   : > { %p4148_p9 = pnand %p4147_p7, %p4141_p5 }
  0x2a   : > { %4151 = shalt.err (!%p4148_p9)
}
  0x2b   : > { %3995 = dma.hbm_to_vmem [thread:$0]  (!%p4408_p11), %s6310_s4, 192, %s250_s14, [#allocation10], %s4309_s18, %s4309_s18, %s4310_s19  }
  0x2c   : > { %s4163_s10 = scalar_lea.vmem %s234_s16, 1024  ;;  %p4171_p3 = scmp.lt.s32.totalorder %s234_s16, %s234_s16 }
  0x2d   : > { %p4164_p1 = scmp.ne.s32.totalorder %s234_s16, %s4163_s10  ;;  %p4172_p5 = scmp.lt.s32.totalorder %s4163_s10, %s4163_s10 }
  0x2f   : > { %p4166_p13 = pnand %p4164_p1, %p4102_p12  ;;  %p4173_p10 = por %p4172_p5, %p4171_p3 }
  0x31   : > { %p4167_p0 = pneg %p4166_p13 }
  0x33   : > { %p4174_p7 = pnand %p4173_p10, %p4167_p0 }
  0x35   : > { %4177 = shalt.err (!%p4174_p7)
}
  0x36   : > { %3992 = dma.hbm_to_vmem [thread:$0]  (!%p4408_p11), %s6308_s2, 1024, %s234_s16, [#allocation7], %s4309_s18, %s4309_s18, %s4310_s19  }
  0x37   : > { %s4311_s14 = smov [#allocation11]  }
  0x38   : > { %s262_s15 = sshll.u32 %s4311_s14, 4  ;;  %s263_s15 = int_to_ptr.vmem [resolvable:$true] %s262_s15 }
  0x39   : > { %s4189_s17 = scalar_lea.vmem %s263_s15, 1024  ;;  %p4197_p0 = scmp.lt.s32.totalorder %s263_s15, %s263_s15 }
  0x3a   : > { %p4190_p1 = scmp.ne.s32.totalorder %s263_s15, %s4189_s17  ;;  %p4198_p3 = scmp.lt.s32.totalorder %s4189_s17, %s4189_s17 }
  0x3c   : > { %p4192_p9 = pnand %p4190_p1, %p4102_p12  ;;  %p4199_p5 = por %p4198_p3, %p4197_p0 }
  0x3e   : > { %p4193_p13 = pneg %p4192_p9 }
  0x40   : > { %p4200_p10 = pnand %p4199_p5, %p4193_p13 }
  0x42   : > { %4203 = shalt.err (!%p4200_p10)
}
  0x43   : > { %3998 = dma.hbm_to_vmem [thread:$0]  (!%p4408_p11), %s6311_s5, 1024, %s263_s15, [#allocation10], %s4309_s18, %s4309_s18, %s4310_s19  }
  0x44   : > { %s4459_s21 = sadd.s32 1, %s4304_s27   ;;  %s32_s12 = sadd.s32 1, %s4300_s26 }
  0x45   : > { %s29_s22 = ssub.s32 %s4304_s27, %s4459_s21  ;;  %p39_p12 = scmp.ne.s32.totalorder %s4300_s26, %s4296_s25 }
  0x46   : > { %p30_p7 = scmp.eq.s32.totalorder %s29_s22, 0  ;;  %p40_p1 = scmp.eq.s32.totalorder %s4304_s27, 0 }
  0x47   : > { %p4469_p9 = por %p195_p2, %p39_p12  ;;  %p4011_p13 = scmp.lt.s32.totalorder %s4304_s27, 2 }
  0x48   : > { %s4475_s29 = scalar_select %p30_p7, %s4300_s26, %s32_s12  }
  0x49   : > { %s6332_s23 = scalar_select %p4469_p9, 1, 0 }
  0x4a   : > { %p41_p0 = por %p40_p1, %p39_p12  ;;  %s279_s10 = sand.u32 1, %s4300_s26  }
  0x4b   : > { %s3701_s11 = sshll.u32 %s279_s10, 8  ;;  %s3819_s18 = sshll.u32 %s4304_s27, 12 }
  0x4c   : > { %s4482_s14 = scalar_lea.hbm %s6306_s0, %s3819_s18  ;;  %s283_s15 = scalar_lea.vmem [#allocation3], %s3701_s11 }
  0x4d   : > { %s291_s17 = sshll.u32 %s283_s15, 4  ;;  %p4486_p2 = pnand %p4011_p13, %p41_p0  ;;  %s4484_s17 = int_to_ptr.vmem [resolvable:$true] %s291_s17 }
  0x4e   : > { %s4490_s20 = scalar_lea.sflag [#allocation4], %s279_s10  ;;  %s4204_s12 = scalar_lea.hbm %s4482_s14, 4096 }
  0x4f   : > { %p4205_p11 = scmp.ne.s32.totalorder %s4482_s14, %s4204_s12  ;;  %p4206_p3 = pneg %p4486_p2 }
  0x50   : > { %s4209_s11 = scalar_lea.hbm %s6306_s0, 8192  ;;  %p4210_p12 = scmp.lt.s32.totalorder %s4482_s14, %s6306_s0 }
  0x51   : > { %p4207_p5 = pnand %p4206_p3, %p4205_p11  ;;  %p4211_p7 = scmp.lt.s32.totalorder %s4209_s11, %s4204_s12 }
  0x53   : > { %p4208_p10 = pneg %p4207_p5  ;;  %p4212_p1 = por %p4211_p7, %p4210_p12 }
  0x55   : > { %p4213_p13 = pnand %p4212_p1, %p4208_p10 }
  0x57   : > { %4216 = shalt.err (!%p4213_p13)
}
  0x58   : > { %s4217_s10 = scalar_lea.vmem %s4484_s17, 4096  ;;  %s4312_s15 = smov [#allocation3]  }
  0x59   : > { %p4218_p0 = scmp.ne.s32.totalorder %s4484_s17, %s4217_s10  ;;  %s4222_s1 = sshll.u32 %s4312_s15, 4  ;;  %s4223_s1 = int_to_ptr.vmem [resolvable:$false] %s4222_s1 }
  0x5a   : > { %s4224_s22 = scalar_lea.vmem %s4223_s1, 8192  ;;  %p4225_p5 = scmp.lt.s32.totalorder %s4484_s17, %s4223_s1 }
  0x5b   : > { %p4220_p6 = pnand %p4218_p0, %p4206_p3  ;;  %p4226_p9 = scmp.lt.s32.totalorder %s4224_s22, %s4217_s10 }
  0x5d   : > { %p4221_p11 = pneg %p4220_p6  ;;  %p4227_p4 = por %p4226_p9, %p4225_p5 }
  0x5f   : > { %p4228_p8 = pnand %p4227_p4, %p4221_p11 }
  0x61   : > { %4231 = shalt.err (!%p4228_p8)
}
  0x62   : > { %s4313_s12 = smov 128   ;;  %s4314_s18 = smov 8  }
  0x63   : > { %4002 = dma.hbm_to_vmem [thread:$0]  (!%p4486_p2), %s4482_s14, 4096, %s4484_s17, %s4490_s20, %s4313_s12, %s4313_s12, %s4314_s18  }
  0x64   : > { %p6334_p3 = scmp.ne.s32.totalorder %s6329_s9, 0 }
  0x66   : > { %303 = sbr.rel (%p6334_p3) target bundleno = 863 (0x35f), region = 48 }
  0x6b   : > { %s4514_s11 = sand.u32 1, %s4296_s25   ;;  %p6335_p4 = scmp.ne.s32.totalorder %s6327_s30, 0 }
  0x6c   : > { %s3706_s1 = sshll.u32 %s4514_s11, 8  ;;  %s306_s19 = scalar_lea.sflag [#allocation4], %s4514_s11 }
  0x6d   : > { %s4518_s13 = scalar_lea.vmem [#allocation3], %s3706_s1 }
  0x6e   : > { %4275 = dma.done.wait (%p6335_p4), %s306_s19, 4096  }
  0x6f   : > { %4277 = vsyncadd (%p6335_p4), %s306_s19, 4294963200  ;;  %p6336_p6 = scmp.eq.s32.totalorder %s4380_s28, 0 }
  0x71   : > { %4279 = dma.done.wait (%p6336_p6), [#allocation7], 1216   ;;  %p6337_p8 = pmov %p6336_p6 }
  0x72   : > { %p6338_p9 = pmov %p6336_p6 }
  0x73   : > { %4281 = vsyncadd (%p6337_p8), [#allocation7], 4294966080 }
  0x74   : > { %4283 = dma.done.wait (%p6338_p9), [#allocation10], 1216   ;;  %p6339_p2 = pmov %p6336_p6 }
  0x75   : > { %v4315_v0 = vmov 0.0   ;;  %v4060_v1 = vld [vmem:[#allocation8 + $0x38] sm:$0xff]   ;;  %v4061_v2 = vld [vmem:[#allocation8 + $0x30] sm:$0xff]   ;;  %v4062_v3 = vld [vmem:[#allocation8 + $0x28] sm:$0xff]   ;;  %s3711_s10 = sshll.u32 %s4514_s11, 10  ;;  %s3821_s18 = sshll.u32 %s4380_s28, 14 }
  0x76   : > { %4285 = vsyncadd (%p6339_p2), [#allocation10], 4294966080  ;;  %359 = vst [vmem:[#allocation2 + $0x7] sm:$0xff] %v4315_v0  ;;  %3870 = vmatprep.subr.bf16.mxu0 %v4060_v1  ;;  %v4063_v4 = vld [vmem:[#allocation8 + $0x20] sm:$0xff]   ;;  %v441_v5 = vld [vmem:[%s4518_s13] sm:$0xff]  ;;  %s5827_s15 = scalar_lea.vmem [#allocation12], %s3711_s10  ;;  %s6251_s30 = scalar_lea.hbm %s6313_s7, %s3821_s18 }
  0x77   : > { %360 = vst [vmem:[#allocation2 + $0xf] sm:$0x3] %v4315_v0  ;;  %377 = vst [vmem:[#allocation2 + $0x1f] sm:$0x1] %v4315_v0  ;;  %3871 = vmatpush3.bf16.msra.mxu0 %v4060_v1  ;;  %v442_v6 = vld [vmem:[%s4518_s13 + $0x8] sm:$0xff]  ;;  %v443_v7 = vld [vmem:[%s4518_s13 + $0x10] sm:$0xff] }
  0x78   : > { %378 = vst [vmem:[#allocation2 + $0x37] sm:$0x1] %v4315_v0  ;;  %379 = vst [vmem:[#allocation2 + $0x4f] sm:$0x1] %v4315_v0  ;;  %3872 = vmatprep.subr.bf16.mxu0 %v4061_v2  ;;  %v4615_v10 = vld [vmem:[#allocation6] ss:$0 sm:$0xff] }
  0x79   : > { %409 = vst [vmem:[#allocation2 + $0x28] sm:$0x1] %v4315_v0  ;;  %410 = vst [vmem:[#allocation2 + $0x40] sm:$0x1] %v4315_v0  ;;  %v4618_v11 = vmul.f32 0.0, %v4615_v10  ;;  %v4064_v18 = vld [vmem:[#allocation8 + $0x18] sm:$0xff]  }
  0x7a   : > { %411 = vst [vmem:[#allocation2 + $0x58] sm:$0x1] %v4315_v0  ;;  %361 = vst [vmem:[#allocation2 + $0xf7] sm:$0xff] %v4315_v0  ;;  %v4620_v12 = vld [vmem:[#allocation6 + $0x1] ss:$0 sm:$0xff]  ;;  %v444_v24 = vld [vmem:[%s4518_s13 + $0x18] sm:$0xff] }
  0x7b   : > { %362 = vst [vmem:[#allocation2 + $0xff] sm:$0x3] %v4315_v0  ;;  %363 = vst [vmem:[#allocation2 + $0x1e7] sm:$0xff] %v4315_v0  ;;  %3873 = vmatpush3.bf16.msra.mxu0 %v4061_v2  ;;  %v4622_v13 = vld [vmem:[#allocation6 + $0x2] ss:$0 sm:$0xff]  ;;  %v4626_v15 = vmul.f32 %v4620_v12, %v441_v5  ;;  %v4629_v16 = vmul.f32 %v4620_v12, %v442_v6  ;;  %v670_v19 = vmul.f32 %v4620_v12, %v443_v7  ;;  %v446_v30 = vld [vmem:[%s4518_s13 + $0x28] sm:$0xff] }
  0x7c   : > { %364 = vst [vmem:[#allocation2 + $0x1ef] sm:$0x3] %v4315_v0  ;;  %365 = vst [vmem:[#allocation2 + $0x2d7] sm:$0xff] %v4315_v0  ;;  %3874 = vmatprep.subr.bf16.mxu0 %v4062_v3  ;;  %v4631_v17 = vld [vmem:[#allocation6 + $0x5] ss:$0 sm:$0xff]  ;;  %v447_v31 = vld [vmem:[%s4518_s13 + $0x30] sm:$0xff]  ;;  %v4664_v35 = vmul.f32 %v4620_v12, %v444_v24  ;;  %v4682_v42 = vmul.f32 %v4620_v12, %v446_v30 }
  0x7d   : > { %366 = vst [vmem:[#allocation2 + $0x2df] sm:$0x3] %v4315_v0  ;;  %368 = vst [vmem:[#allocation2 + $0xdf] sm:$0xff] %v4315_v0  ;;  %v4636_v21 = vmul.f32 %v4631_v17, %v441_v5  ;;  %v4639_v22 = vmul.f32 %v4631_v17, %v442_v6  ;;  %v4641_v23 = vld [vmem:[#allocation6 + $0x9] ss:$0 sm:$0xff]  ;;  %v4646_v26 = vmul.f32 %v4631_v17, %v443_v7  ;;  %v445_v29 = vld [vmem:[%s4518_s13 + $0x20] sm:$0xff] }
  0x7e   : > { %369 = vst [vmem:[#allocation2 + $0xe7] sm:$0x3] %v4315_v0  ;;  %370 = vst [vmem:[#allocation2 + $0x1cf] sm:$0xff] %v4315_v0  ;;  %v545_v8 = vld [vmem:[#allocation2 + $0x8] sm:$0xff]  ;;  %v4649_v27 = vmul.f32 %v4641_v23, %v442_v6  ;;  %v4652_v28 = vmul.f32 %v4641_v23, %v443_v7  ;;  %v4657_v32 = vld [vmem:[#allocation8 + $0x10] sm:$0xff]   ;;  %v4667_v36 = vmul.f32 %v4620_v12, %v445_v29  ;;  %s3583_s1 = sshll.u32 %s5827_s15, 4  ;;  %s6254_s1 = int_to_ptr.vmem [resolvable:$true] %s3583_s1 }
  0x7f   : > { %371 = vst [vmem:[#allocation2 + $0x1d7] sm:$0x3] %v4315_v0  ;;  %372 = vst [vmem:[#allocation2 + $0x2bf] sm:$0xff] %v4315_v0  ;;  %v585_v9 = vld [vmem:[#allocation2 + $0x9] sm:$0xff]  ;;  %3875 = vmatpush3.bf16.msra.mxu0 %v4062_v3  ;;  %v667_v14 = vmul.f32 %v4620_v12, %v545_v8  ;;  %v4659_v33 = vld [vmem:[#allocation6 + $0x4] ss:$0 sm:$0xff]  ;;  %v4670_v37 = vmul.f32 %v4631_v17, %v444_v24  ;;  %v4673_v38 = vmul.f32 %v4641_v23, %v444_v24 }
  0x80   : > { %373 = vst [vmem:[#allocation2 + $0x2c7] sm:$0x3] %v4315_v0  ;;  %374 = vst [vmem:[#allocation2 + $0x3af] sm:$0xff] %v4315_v0  ;;  %3876 = vmatprep.subr.bf16.mxu0 %v4063_v4  ;;  %v736_v20 = vmul.f32 %v4622_v13, %v585_v9  ;;  %v4661_v34 = vld [vmem:[#allocation6 + $0x6] ss:$0 sm:$0xff]  ;;  %v4676_v39 = vld [vmem:[%s4518_s13 + $0x38] sm:$0xff]  ;;  %v4679_v41 = vmul.f32 %v4641_v23, %v445_v29  ;;  %v4685_v43 = vmul.f32 %v4620_v12, %v447_v31 }
  0x81   : > { %375 = vst [vmem:[#allocation2 + $0x3b7] sm:$0x3] %v4315_v0  ;;  %380 = vst [vmem:[#allocation2 + $0x67] sm:$0x1] %v4315_v0  ;;  %v699_v25 = vadd.f32 %v667_v14, %v4618_v11  ;;  %v4689_v44 = vld [vmem:[%s4518_s13 + $0x40] sm:$0xff]  ;;  %v4692_v45 = vld [vmem:[%s4518_s13 + $0x48] sm:$0xff]  ;;  %v4698_v50 = vmul.f32 %v4631_v17, %v445_v29  ;;  %v4701_v51 = vmul.f32 %v4631_v17, %v446_v30 }
  0x82   : > { %381 = vst [vmem:[#allocation2 + $0x7f] sm:$0x1] %v4315_v0  ;;  %382 = vst [vmem:[#allocation2 + $0x97] sm:$0x1] %v4315_v0  ;;  %v4695_v46 = vld [vmem:[%s4518_s13 + $0x50] sm:$0xff]  ;;  %v4704_v52 = vmul.f32 %v4641_v23, %v446_v30  ;;  %v4707_v53 = vmul.f32 %v4641_v23, %v447_v31  ;;  %v4724_v2 = vmul.f32 %v4631_v17, %v447_v31  ;;  %v4727_v3 = vld [vmem:[%s4518_s13 + $0x58] sm:$0xff] }
  0x83   : > { %383 = vst [vmem:[#allocation2 + $0xaf] sm:$0x1] %v4315_v0  ;;  %384 = vst [vmem:[#allocation2 + $0xc7] sm:$0x1] %v4315_v0  ;;  %3877 = vmatpush3.bf16.msra.mxu0 %v4063_v4  ;;  %v768_v40 = vadd.f32 %v736_v20, %v699_v25  ;;  %v4716_v59 = vld [vmem:[#allocation6 + $0x8] ss:$0 sm:$0xff] }
  0x84   : > { %385 = vst [vmem:[#allocation2 + $0x10f] sm:$0x1] %v4315_v0  ;;  %386 = vst [vmem:[#allocation2 + $0x127] sm:$0x1] %v4315_v0  ;;  %3878 = vmatprep.subr.bf16.mxu0 %v4064_v18  ;;  %v4718_v60 = vld [vmem:[#allocation6 + $0xa] ss:$0 sm:$0xff] }
  0x85   : > { %387 = vst [vmem:[#allocation2 + $0x13f] sm:$0x1] %v4315_v0  ;;  %388 = vst [vmem:[#allocation2 + $0x157] sm:$0x1] %v4315_v0  ;;  %v4732_v8 = vld [vmem:[%s4518_s13 + $0x60] sm:$0xff]  ;;  %v4736_v9 = vld [vmem:[%s4518_s13 + $0x68] sm:$0xff] }
  0x86   : > { %389 = vst [vmem:[#allocation2 + $0x16f] sm:$0x1] %v4315_v0  ;;  %390 = vst [vmem:[#allocation2 + $0x187] sm:$0x1] %v4315_v0  ;;  %v4739_v14 = vld [vmem:[%s4518_s13 + $0x70] sm:$0xff]  ;;  %v4750_v25 = vld [vmem:[%s4518_s13 + $0x78] sm:$0xff] }
  0x87   : > { %391 = vst [vmem:[#allocation2 + $0x19f] sm:$0x1] %v4315_v0  ;;  %392 = vst [vmem:[#allocation2 + $0x1b7] sm:$0x1] %v4315_v0  ;;  %3879 = vmatpush3.bf16.msra.mxu0 %v4064_v18  ;;  %v4066_v20 = vld [vmem:[#allocation8 + $0x8] sm:$0xff]   ;;  %s3569_s28 = scalar_lea.sflag [#allocation5], %s4514_s11 }
  0x88   : > { %393 = vst [vmem:[#allocation2 + $0x1ff] sm:$0x1] %v4315_v0  ;;  %394 = vst [vmem:[#allocation2 + $0x217] sm:$0x1] %v4315_v0  ;;  %3880 = vmatprep.subr.bf16.mxu0 %v4657_v32  ;;  %s4232_s9 = scalar_lea.vmem %s6254_s1, 16384  ;;  %p6348_p12 = scmp.ne.s32.totalorder %s6332_s23, 0 }
  0x89   : > { %395 = vst [vmem:[#allocation2 + $0x22f] sm:$0x1] %v4315_v0  ;;  %396 = vst [vmem:[#allocation2 + $0x247] sm:$0x1] %v4315_v0  ;;  %p4233_p10 = scmp.ne.s32.totalorder %s6254_s1, %s4232_s9  ;;  %s4316_s14 = smov [#allocation12]  }
  0x8a   : > { %397 = vst [vmem:[#allocation2 + $0x25f] sm:$0x1] %v4315_v0  ;;  %398 = vst [vmem:[#allocation2 + $0x277] sm:$0x1] %v4315_v0  ;;  %s4236_s17 = sshll.u32 %s4316_s14, 4  ;;  %s4237_s17 = int_to_ptr.vmem [resolvable:$false] %s4236_s17 }
  0x8b   : > { %399 = vst [vmem:[#allocation2 + $0x28f] sm:$0x1] %v4315_v0  ;;  %400 = vst [vmem:[#allocation2 + $0x2a7] sm:$0x1] %v4315_v0  ;;  %3881 = vmatpush3.bf16.msra.mxu0 %v4657_v32  ;;  %p4234_p7 = pnand %p4233_p10, %p6348_p12  ;;  %s4238_s16 = scalar_lea.vmem %s4237_s17, 32768 }
  0x8c   : > { %401 = vst [vmem:[#allocation2 + $0x2ef] sm:$0x1] %v4315_v0  ;;  %402 = vst [vmem:[#allocation2 + $0x307] sm:$0x1] %v4315_v0  ;;  %3882 = vmatprep.subr.bf16.mxu0 %v4066_v20  ;;  %p4239_p13 = scmp.lt.s32.totalorder %s6254_s1, %s4237_s17  ;;  %p4240_p0 = scmp.lt.s32.totalorder %s4238_s16, %s4232_s9 }
  0x8d   : > { %403 = vst [vmem:[#allocation2 + $0x31f] sm:$0x1] %v4315_v0  ;;  %404 = vst [vmem:[#allocation2 + $0x337] sm:$0x1] %v4315_v0  ;;  %p4235_p1 = pneg %p4234_p7 }
  0x8e   : > { %405 = vst [vmem:[#allocation2 + $0x34f] sm:$0x1] %v4315_v0  ;;  %406 = vst [vmem:[#allocation2 + $0x367] sm:$0x1] %v4315_v0  ;;  %p4241_p11 = por %p4240_p0, %p4239_p13 }
  0x8f   : > { %407 = vst [vmem:[#allocation2 + $0x37f] sm:$0x1] %v4315_v0  ;;  %408 = vst [vmem:[#allocation2 + $0x397] sm:$0x1] %v4315_v0  ;;  %3883 = vmatpush3.bf16.msra.mxu0 %v4066_v20 }
  0x90   : > { %412 = vst [vmem:[#allocation2 + $0x70] sm:$0x1] %v4315_v0  ;;  %413 = vst [vmem:[#allocation2 + $0x88] sm:$0x1] %v4315_v0  ;;  %p4242_p5 = pnand %p4241_p11, %p4235_p1 }
  0x91   : > { %414 = vst [vmem:[#allocation2 + $0xa0] sm:$0x1] %v4315_v0  ;;  %415 = vst [vmem:[#allocation2 + $0xb8] sm:$0x1] %v4315_v0 }
  0x92   : > { %416 = vst [vmem:[#allocation2 + $0xd0] sm:$0x1] %v4315_v0  ;;  %417 = vst [vmem:[#allocation2 + $0x118] sm:$0x1] %v4315_v0 }
  0x93   : > { %418 = vst [vmem:[#allocation2 + $0x130] sm:$0x1] %v4315_v0  ;;  %419 = vst [vmem:[#allocation2 + $0x148] sm:$0x1] %v4315_v0 }
  0x94   : > { %420 = vst [vmem:[#allocation2 + $0x160] sm:$0x1] %v4315_v0  ;;  %421 = vst [vmem:[#allocation2 + $0x178] sm:$0x1] %v4315_v0 }
  0x95   : > { %422 = vst [vmem:[#allocation2 + $0x190] sm:$0x1] %v4315_v0  ;;  %423 = vst [vmem:[#allocation2 + $0x1a8] sm:$0x1] %v4315_v0 }
  0x96   : > { %424 = vst [vmem:[#allocation2 + $0x1c0] sm:$0x1] %v4315_v0  ;;  %425 = vst [vmem:[#allocation2 + $0x208] sm:$0x1] %v4315_v0 }
  0x97   : > { %426 = vst [vmem:[#allocation2 + $0x220] sm:$0x1] %v4315_v0  ;;  %427 = vst [vmem:[#allocation2 + $0x238] sm:$0x1] %v4315_v0 }
  0x98   : > { %428 = vst [vmem:[#allocation2 + $0x250] sm:$0x1] %v4315_v0  ;;  %429 = vst [vmem:[#allocation2 + $0x268] sm:$0x1] %v4315_v0 }
  0x99   : > { %430 = vst [vmem:[#allocation2 + $0x280] sm:$0x1] %v4315_v0  ;;  %431 = vst [vmem:[#allocation2 + $0x298] sm:$0x1] %v4315_v0 }
  0x9a   : > { %432 = vst [vmem:[#allocation2 + $0x2b0] sm:$0x1] %v4315_v0  ;;  %433 = vst [vmem:[#allocation2 + $0x2f8] sm:$0x1] %v4315_v0 }
  0x9b   : > { %434 = vst [vmem:[#allocation2 + $0x310] sm:$0x1] %v4315_v0  ;;  %435 = vst [vmem:[#allocation2 + $0x328] sm:$0x1] %v4315_v0 }
  0x9c   : > { %436 = vst [vmem:[#allocation2 + $0x340] sm:$0x1] %v4315_v0  ;;  %437 = vst [vmem:[#allocation2 + $0x358] sm:$0x1] %v4315_v0 }
  0x9d   : > { %438 = vst [vmem:[#allocation2 + $0x370] sm:$0x1] %v4315_v0  ;;  %439 = vst [vmem:[#allocation2 + $0x388] sm:$0x1] %v4315_v0 }
  0x9e   : > { %440 = vst [vmem:[#allocation2 + $0x3a0] sm:$0x1] %v4315_v0  ;;  %473 = vst [vmem:[#allocation2 + $0x20] sm:$0xff] %v441_v5 }
  0x9f   : > { %474 = vst [vmem:[#allocation2 + $0x38] sm:$0xff] %v442_v6  ;;  %475 = vst [vmem:[#allocation2 + $0x50] sm:$0xff] %v443_v7 }
  0xa0   : > { %476 = vst [vmem:[#allocation2 + $0x68] sm:$0xff] %v444_v24  ;;  %477 = vst [vmem:[#allocation2 + $0x80] sm:$0xff] %v445_v29 }
  0xa1   : > { %478 = vst [vmem:[#allocation2 + $0x98] sm:$0xff] %v446_v30  ;;  %479 = vst [vmem:[#allocation2 + $0xb0] sm:$0xff] %v447_v31 }
  0xa2   : > { %480 = vst [vmem:[#allocation2 + $0xc8] sm:$0xff] %v4676_v39  ;;  %481 = vst [vmem:[#allocation2 + $0x110] sm:$0xff] %v4689_v44 }
  0xa3   : > { %482 = vst [vmem:[#allocation2 + $0x128] sm:$0xff] %v4692_v45  ;;  %483 = vst [vmem:[#allocation2 + $0x140] sm:$0xff] %v4695_v46 }
  0xa4   : > { %6340 = vst [vmem:[#allocation17_spill] sm:$0xff] %v4732_v8  ;;  %484 = vst [vmem:[#allocation2 + $0x158] sm:$0xff] %v4727_v3 }
  0xa5   : > { %v506_v47 = vld [vmem:[#allocation2 + $0x1f] sm:$0xff]  ;;  %6341 = vst [vmem:[#allocation18_spill] sm:$0xff] %v4736_v9  ;;  %6342 = vst [vmem:[#allocation19_spill] sm:$0xff] %v4739_v14 }
  0xa6   : > { %v507_v48 = vld [vmem:[#allocation2 + $0x37] sm:$0xff]  ;;  %v508_v49 = vld [vmem:[#allocation2 + $0x4f] sm:$0xff]  ;;  %v586_v54 = vld [vmem:[#allocation2 + $0x21] sm:$0xff]  ;;  %v631_v55 = vmul.f32 %v4615_v10, %v506_v47  ;;  %v806_v58 = vmul.f32 %v4659_v33, %v506_v47  ;;  %485 = vst [vmem:[#allocation2 + $0x170] sm:$0xff] %v4732_v8 }
  0xa7   : > { %v632_v56 = vmul.f32 %v4615_v10, %v507_v48  ;;  %v633_v57 = vmul.f32 %v4615_v10, %v508_v49  ;;  %v587_v61 = vld [vmem:[#allocation2 + $0x39] sm:$0xff]  ;;  %v588_v62 = vld [vmem:[#allocation2 + $0x51] sm:$0xff]  ;;  %v737_v63 = vmul.f32 %v4622_v13, %v586_v54  ;;  %v807_v0 = vmul.f32 %v4659_v33, %v507_v48  ;;  %v509_v24 = vld [vmem:[#allocation2 + $0x67] sm:$0xff]  ;;  %486 = vst [vmem:[#allocation2 + $0x188] sm:$0xff] %v4736_v9 }
  0xa8   : > { %v944_v1 = vmul.f32 %v4661_v34, %v586_v54  ;;  %v700_v4 = vadd.f32 %v4626_v15, %v631_v55  ;;  %v838_v7 = vadd.f32 %v806_v58, %v768_v40  ;;  %v945_v18 = vmul.f32 %v4661_v34, %v587_v61  ;;  %487 = vst [vmem:[#allocation2 + $0x1a0] sm:$0xff] %v4739_v14  ;;  %v589_v31 = vld [vmem:[#allocation2 + $0x69] sm:$0xff]  ;;  %v510_v58 = vld [vmem:[#allocation2 + $0x7f] sm:$0xff] }
  0xa9   : > { %v701_v5 = vadd.f32 %v4629_v16, %v632_v56  ;;  %v702_v6 = vadd.f32 %v670_v19, %v633_v57  ;;  %v1014_v15 = vmul.f32 %v4716_v59, %v507_v48  ;;  %v1015_v16 = vmul.f32 %v4716_v59, %v508_v49  ;;  %6343 = vst [vmem:[#allocation20_spill] sm:$0xff] %v4750_v25 }
  0xaa   : > { %v1152_v19 = vmul.f32 %v4718_v60, %v587_v61  ;;  %v769_v29 = vadd.f32 %v737_v63, %v700_v4  ;;  %v907_v30 = vadd.f32 %v4636_v21, %v838_v7  ;;  %v738_v40 = vmul.f32 %v4622_v13, %v587_v61  ;;  %488 = vst [vmem:[#allocation2 + $0x1b8] sm:$0xff] %v4750_v25  ;;  %v590_v63 = vld [vmem:[#allocation2 + $0x81] sm:$0xff]  ;;  %v4067_v7 = vld [vmem:[#allocation8] sm:$0xff]  }
  0xab   : > { %v739_v47 = vmul.f32 %v4622_v13, %v588_v62  ;;  %v4757_v48 = vmul.f32 %v4718_v60, %v588_v62  ;;  %v808_v54 = vmul.f32 %v4659_v33, %v508_v49  ;;  %v809_v55 = vmul.f32 %v4659_v33, %v509_v24  ;;  %3884 = vmatprep.subr.bf16.mxu0 %v4067_v7 }
  0xac   : > { %v946_v56 = vmul.f32 %v4661_v34, %v588_v62  ;;  %v839_v57 = vadd.f32 %v807_v0, %v769_v29  ;;  %v976_v21 = vadd.f32 %v944_v1, %v907_v30  ;;  %v770_v61 = vadd.f32 %v738_v40, %v701_v5  ;;  %3885 = vmatpush3.bf16.msra.mxu0 %v4067_v7 }
  0xad   : > { %v771_v4 = vadd.f32 %v739_v47, %v702_v6  ;;  %v947_v25 = vmul.f32 %v4661_v34, %v589_v31  ;;  %v1016_v14 = vmul.f32 %v4716_v59, %v509_v24  ;;  %v1017_v49 = vmul.f32 %v4716_v59, %v510_v58 }
  0xae   : > { %v4767_v9 = vmul.f32 %v4718_v60, %v589_v31  ;;  %v908_v62 = vadd.f32 %v4639_v22, %v839_v57  ;;  %v1046_v32 = vadd.f32 %v1014_v15, %v976_v21  ;;  %v840_v0 = vadd.f32 %v808_v54, %v770_v61  ;;  %v511_v15 = vld [vmem:[#allocation2 + $0x97] sm:$0xff] }
  0xaf   : > { %v841_v1 = vadd.f32 %v809_v55, %v771_v4  ;;  %v634_v29 = vmul.f32 %v4615_v10, %v509_v24  ;;  %v635_v5 = vmul.f32 %v4615_v10, %v510_v58  ;;  %v740_v6 = vmul.f32 %v4622_v13, %v589_v31  ;;  %v591_v21 = vld [vmem:[#allocation2 + $0x99] sm:$0xff] }
  0xb0   : > { %v741_v30 = vmul.f32 %v4622_v13, %v590_v63  ;;  %v977_v40 = vadd.f32 %v945_v18, %v908_v62  ;;  %v1115_v47 = vadd.f32 %v4649_v27, %v1046_v32  ;;  %v909_v8 = vadd.f32 %v4646_v26, %v840_v0  ;;  %v4783_v26 = vld [vmem:[%s4518_s13 + $0x80] sm:$0xff]  ;;  %v4811_v0 = vld [vmem:[%s4518_s13 + $0xb0] sm:$0xff] }
  0xb1   : > { %v910_v22 = vadd.f32 %v4670_v37, %v841_v1  ;;  %v703_v24 = vadd.f32 %v4664_v35, %v634_v29  ;;  %v704_v54 = vadd.f32 %v4667_v36, %v635_v5  ;;  %v810_v31 = vmul.f32 %v4659_v33, %v510_v58  ;;  %v4787_v36 = vld [vmem:[%s4518_s13 + $0x88] sm:$0xff]  ;;  %v4790_v58 = vld [vmem:[%s4518_s13 + $0x90] sm:$0xff]  ;;  %489 = vst [vmem:[#allocation2 + $0x200] sm:$0xff] %v4783_v26  ;;  %v4801_v62 = vld [vmem:[%s4518_s13 + $0xa0] sm:$0xff] }
  0xb2   : > { %v811_v55 = vmul.f32 %v4659_v33, %v511_v15  ;;  %v1047_v20 = vadd.f32 %v1015_v16, %v977_v40  ;;  %v978_v18 = vadd.f32 %v946_v56, %v909_v8  ;;  %v1155_v27 = vmul.f32 %v4718_v60, %v590_v63  ;;  %490 = vst [vmem:[#allocation2 + $0x218] sm:$0xff] %v4787_v36  ;;  %v4814_v1 = vld [vmem:[%s4518_s13 + $0xb8] sm:$0xff] }
  0xb3   : > { %v979_v57 = vadd.f32 %v947_v25, %v910_v22  ;;  %v1184_v37 = vadd.f32 %v1152_v19, %v1115_v47  ;;  %v772_v61 = vadd.f32 %v740_v6, %v703_v24  ;;  %v773_v4 = vadd.f32 %v741_v30, %v704_v54  ;;  %v512_v25 = vld [vmem:[#allocation2 + $0xaf] sm:$0xff]  ;;  %491 = vst [vmem:[#allocation2 + $0x230] sm:$0xff] %v4790_v58  ;;  %v4824_v47 = vld [vmem:[%s4518_s13 + $0xc0] sm:$0xff] }
  0xb4   : > { %v948_v35 = vmul.f32 %v4661_v34, %v590_v63  ;;  %v1116_v8 = vadd.f32 %v4652_v28, %v1047_v20  ;;  %v1048_v16 = vadd.f32 %v1016_v14, %v978_v18  ;;  %v949_v56 = vmul.f32 %v4661_v34, %v591_v21  ;;  %v4798_v63 = vld [vmem:[%s4518_s13 + $0x98] sm:$0xff]  ;;  %493 = vst [vmem:[#allocation2 + $0x260] sm:$0xff] %v4801_v62  ;;  %v4831_v54 = vld [vmem:[%s4518_s13 + $0xc8] sm:$0xff]  ;;  %v4845_v18 = vld [vmem:[%s4518_s13 + $0xe0] sm:$0xff] }
  0xb5   : > { %v1049_v19 = vadd.f32 %v1017_v49, %v979_v57  ;;  %v842_v32 = vadd.f32 %v810_v31, %v772_v61  ;;  %v843_v7 = vadd.f32 %v811_v55, %v773_v4  ;;  %v1018_v28 = vmul.f32 %v4716_v59, %v511_v15  ;;  %492 = vst [vmem:[#allocation2 + $0x248] sm:$0xff] %v4798_v63  ;;  %v4808_v49 = vld [vmem:[%s4518_s13 + $0xa8] sm:$0xff]  ;;  %v592_v30 = vld [vmem:[#allocation2 + $0xb1] sm:$0xff] }
  0xb6   : > { %v1019_v14 = vmul.f32 %v4716_v59, %v512_v25  ;;  %v1185_v29 = vadd.f32 %v4757_v48, %v1116_v8  ;;  %v1117_v5 = vadd.f32 %v4673_v38, %v1048_v16  ;;  %v1156_v40 = vmul.f32 %v4718_v60, %v591_v21  ;;  %494 = vst [vmem:[#allocation2 + $0x278] sm:$0xff] %v4808_v49  ;;  %v513_v38 = vld [vmem:[#allocation2 + $0xc7] sm:$0xff]  ;;  %v4834_v31 = vld [vmem:[%s4518_s13 + $0xd0] sm:$0xff] }
  0xb7   : > { %v1118_v6 = vadd.f32 %v4679_v41, %v1049_v19  ;;  %495 = vst [vmem:[#allocation2 + $0x290] sm:$0xff] %v4811_v0  ;;  %496 = vst [vmem:[#allocation2 + $0x2a8] sm:$0xff] %v4814_v1  ;;  %v911_v22 = vadd.f32 %v4698_v50, %v842_v32  ;;  %v912_v48 = vadd.f32 %v4701_v51, %v843_v7  ;;  %v593_v16 = vld [vmem:[#allocation2 + $0xc9] sm:$0xff] }
  0xb8   : > { %v636_v41 = vmul.f32 %v4615_v10, %v511_v15  ;;  %v637_v24 = vmul.f32 %v4615_v10, %v512_v25  ;;  %497 = vst [vmem:[#allocation2 + $0x2f0] sm:$0xff] %v4824_v47  ;;  %v1216_v55 = vpack.c.bf16 %v1185_v29, %v1184_v37  ;;  %v1186_v20 = vadd.f32 %v4767_v9, %v1117_v5  ;;  %v4842_v15 = vld [vmem:[%s4518_s13 + $0xd8] sm:$0xff]  ;;  %v4852_v9 = vld [vmem:[%s4518_s13 + $0xe8] sm:$0xff]  ;;  %v554_v29 = vld [vmem:[#allocation2 + $0xe0] sm:$0xff] }
  0xb9   : > { %v1187_v50 = vadd.f32 %v1155_v27, %v1118_v6  ;;  %v742_v51 = vmul.f32 %v4622_v13, %v591_v21  ;;  %498 = vst [vmem:[#allocation2 + $0x308] sm:$0xff] %v4831_v54  ;;  %499 = vst [vmem:[#allocation2 + $0x320] sm:$0xff] %v4834_v31  ;;  %v980_v57 = vadd.f32 %v948_v35, %v911_v22  ;;  %v4855_v27 = vld [vmem:[%s4518_s13 + $0xf0] sm:$0xff]  ;;  %v472_v21 = vld [vmem:[%s4518_s13 + $0xf8] sm:$0xff] }
  0xba   : > { %v981_v61 = vadd.f32 %v949_v56, %v912_v48  ;;  %v705_v4 = vadd.f32 %v4682_v42, %v636_v41  ;;  %v706_v37 = vadd.f32 %v4685_v43, %v637_v24  ;;  %500 = vst [vmem:[#allocation2 + $0x338] sm:$0xff] %v4842_v15  ;;  %501 = vst [vmem:[#allocation2 + $0x350] sm:$0xff] %v4845_v18  ;;  %3886 = vmatprep.mubr.bf16.mxu0 %v1216_v55  ;;  %v594_v55 = vld [vmem:[#allocation2 + $0xe1] sm:$0xff] }
  0xbb   : > { %v1217_v8 = vpack.c.bf16 %v1187_v50, %v1186_v20  ;;  %v743_v19 = vmul.f32 %v4622_v13, %v592_v30  ;;  %v812_v35 = vmul.f32 %v4659_v33, %v512_v25  ;;  %v813_v42 = vmul.f32 %v4659_v33, %v513_v38  ;;  %502 = vst [vmem:[#allocation2 + $0x368] sm:$0xff] %v4852_v9 }
  0xbc   : > { %503 = vst [vmem:[#allocation2 + $0x380] sm:$0xff] %v4855_v27  ;;  %504 = vst [vmem:[#allocation2 + $0x398] sm:$0xff] %v472_v21  ;;  %v1050_v43 = vadd.f32 %v1018_v28, %v980_v57  ;;  %v1051_v56 = vadd.f32 %v1019_v14, %v981_v61  ;;  %v1157_v32 = vmul.f32 %v4718_v60, %v592_v30  ;;  %v516_v28 = vld [vmem:[#allocation2 + $0x10f] sm:$0xff]  ;;  %v555_v14 = vld [vmem:[#allocation2 + $0xf8] sm:$0xff] }
  0xbd   : > { %v774_v7 = vadd.f32 %v742_v51, %v705_v4  ;;  %3887 = vmatmul.mubr.bf16.vlgmr.msra.gmra.mxu0 %v1217_v8  ;;  %v775_v5 = vadd.f32 %v743_v19, %v706_v37  ;;  %v882_v6 = vmul.f32 %v4631_v17, %v4676_v39  ;;  %v950_v25 = vmul.f32 %v4661_v34, %v592_v30  ;;  %v595_v4 = vld [vmem:[#allocation2 + $0xf9] sm:$0xff]  ;;  %v596_v21 = vld [vmem:[#allocation2 + $0x111] sm:$0xff] }
  0xbe   : > { %v1119_v22 = vadd.f32 %v4704_v52, %v1050_v43  ;;  %v1120_v48 = vadd.f32 %v4707_v53, %v1051_v56  ;;  %v951_v24 = vmul.f32 %v4661_v34, %v593_v16  ;;  %v1020_v50 = vmul.f32 %v4716_v59, %v513_v38 }
  0xbf   : > { %v844_v41 = vadd.f32 %v812_v35, %v774_v7  ;;  %v845_v20 = vadd.f32 %v813_v42, %v775_v5  ;;  %v4872_v51 = vmul.f32 0.0, %v4716_v59  ;;  %v1089_v57 = vmul.f32 %v4641_v23, %v4676_v39 }
  0xc0   : > { %v1188_v30 = vadd.f32 %v1156_v40, %v1119_v22  ;;  %v1189_v61 = vadd.f32 %v1157_v32, %v1120_v48  ;;  %v1090_v53 = vmul.f32 %v4641_v23, %v554_v29  ;;  %v639_v8 = vmul.f32 %v4615_v10, %v516_v28 }
  0xc1   : > { %v913_v52 = vadd.f32 %v4724_v2, %v844_v41  ;;  %v914_v37 = vadd.f32 %v882_v6, %v845_v20  ;;  %v675_v19 = vmul.f32 %v4620_v12, %v555_v14  ;;  %v676_v38 = vmul.f32 %v4620_v12, %v4689_v44  ;;  %v517_v2 = vld [vmem:[#allocation2 + $0x127] sm:$0xff] }
  0xc2   : > { %v1218_v35 = vpack.c.bf16 %v1189_v61, %v1188_v30  ;;  %v1158_v39 = vmul.f32 %v4718_v60, %v593_v16  ;;  %v1159_v40 = vmul.f32 %v4718_v60, %v594_v55  ;;  %v744_v7 = vmul.f32 %v4622_v13, %v595_v4  ;;  %v518_v16 = vld [vmem:[#allocation2 + $0x13f] sm:$0xff]  ;;  %v597_v55 = vld [vmem:[#allocation2 + $0x129] sm:$0xff] }
  0xc3   : > { %v982_v42 = vadd.f32 %v950_v25, %v913_v52  ;;  %v983_v43 = vadd.f32 %v951_v24, %v914_v37  ;;  %v707_v56 = vadd.f32 %v675_v19, %v4618_v11  ;;  %v708_v32 = vadd.f32 %v676_v38, %v639_v8  ;;  %v598_v61 = vld [vmem:[#allocation2 + $0x141] sm:$0xff]  ;;  %v519_v38 = vld [vmem:[#allocation2 + $0x157] sm:$0xff] }
  0xc4   : > { %3890 = vmatprep.mubr.bf16.mxu0 %v1218_v35  ;;  %v745_v5 = vmul.f32 %v4622_v13, %v596_v21  ;;  %v814_v6 = vmul.f32 %v4659_v33, %v516_v28  ;;  %v815_v22 = vmul.f32 %v4659_v33, %v517_v2  ;;  %v677_v48 = vmul.f32 %v4620_v12, %v4692_v45 }
  0xc5   : > { %v1052_v29 = vadd.f32 %v1020_v50, %v982_v42  ;;  %v1053_v25 = vadd.f32 %v4872_v51, %v983_v43  ;;  %v776_v41 = vadd.f32 %v744_v7, %v707_v56  ;;  %v883_v24 = vmul.f32 %v4631_v17, %v4689_v44 }
  0xc6   : > { %v678_v20 = vmul.f32 %v4620_v12, %v4695_v46  ;;  %v777_v50 = vadd.f32 %v745_v5, %v708_v32  ;;  %v884_v28 = vmul.f32 %v4631_v17, %v4692_v45  ;;  %v952_v4 = vmul.f32 %v4661_v34, %v596_v21 }
  0xc7   : > { %v1121_v14 = vadd.f32 %v1089_v57, %v1052_v29  ;;  %v1122_v30 = vadd.f32 %v1090_v53, %v1053_v25  ;;  %v846_v52 = vadd.f32 %v814_v6, %v776_v41  ;;  %v953_v37 = vmul.f32 %v4661_v34, %v597_v55 }
  0xc8   : > { %v847_v19 = vadd.f32 %v815_v22, %v777_v50  ;;  %v1022_v44 = vmul.f32 %v4716_v59, %v517_v2  ;;  %v1023_v57 = vmul.f32 %v4716_v59, %v518_v16  ;;  %v1091_v43 = vmul.f32 %v4641_v23, %v4692_v45 }
  0xc9   : > { %v1190_v8 = vadd.f32 %v1158_v39, %v1121_v14  ;;  %v1191_v35 = vadd.f32 %v1159_v40, %v1122_v30  ;;  %v915_v42 = vadd.f32 %v883_v24, %v846_v52  ;;  %v1092_v53 = vmul.f32 %v4641_v23, %v4695_v46  ;;  %v599_v24 = vld [vmem:[#allocation2 + $0x159] sm:$0xff] }
  0xca   : > { %v916_v56 = vadd.f32 %v884_v28, %v847_v19  ;;  %v1160_v21 = vmul.f32 %v4718_v60, %v597_v55  ;;  %v640_v32 = vmul.f32 %v4615_v10, %v517_v2  ;;  %v641_v39 = vmul.f32 %v4615_v10, %v518_v16  ;;  %v520_v19 = vld [vmem:[#allocation2 + $0x16f] sm:$0xff] }
  0xcb   : > { %v1219_v7 = vpack.c.bf16 %v1191_v35, %v1190_v8  ;;  %v984_v29 = vadd.f32 %v952_v4, %v915_v42  ;;  %v1161_v5 = vmul.f32 %v4718_v60, %v598_v61  ;;  %v746_v40 = vmul.f32 %v4622_v13, %v597_v55  ;;  %v6344_v4 = vld [vmem:[#allocation17_spill] sm:$0xff] }
  0xcc   : > { %v985_v6 = vadd.f32 %v953_v37, %v916_v56  ;;  %v709_v22 = vadd.f32 %v677_v48, %v640_v32  ;;  %v710_v25 = vadd.f32 %v678_v20, %v641_v39  ;;  %v747_v45 = vmul.f32 %v4622_v13, %v598_v61  ;;  %v600_v39 = vld [vmem:[#allocation2 + $0x171] sm:$0xff] }
  0xcd   : > { %3891 = vmatmul.mubr.bf16.gmra.mxu0 %v1219_v7  ;;  %v1054_v41 = vadd.f32 %v1022_v44, %v984_v29  ;;  %v816_v14 = vmul.f32 %v4659_v33, %v518_v16  ;;  %v817_v2 = vmul.f32 %v4659_v33, %v519_v38  ;;  %v885_v50 = vmul.f32 %v4631_v17, %v4695_v46 }
  0xce   : > { %v1055_v28 = vadd.f32 %v1023_v57, %v985_v6  ;;  %v778_v30 = vadd.f32 %v746_v40, %v709_v22  ;;  %v779_v52 = vadd.f32 %v747_v45, %v710_v25  ;;  %v886_v55 = vmul.f32 %v4631_v17, %v4727_v3 }
  0xcf   : > { %v1123_v48 = vadd.f32 %v1091_v43, %v1054_v41  ;;  %v679_v20 = vmul.f32 %v4620_v12, %v4727_v3  ;;  %v680_v37 = vmul.f32 %v4620_v12, %v6344_v4  ;;  %v954_v16 = vmul.f32 %v4661_v34, %v598_v61 }
  0xd0   : > { %v1124_v8 = vadd.f32 %v1092_v53, %v1055_v28  ;;  %v848_v44 = vadd.f32 %v816_v14, %v778_v30  ;;  %v849_v35 = vadd.f32 %v817_v2, %v779_v52  ;;  %v955_v46 = vmul.f32 %v4661_v34, %v599_v24  ;;  %v6345_v52 = vld [vmem:[#allocation18_spill] sm:$0xff] }
  0xd1   : > { %v1192_v57 = vadd.f32 %v1160_v21, %v1123_v48  ;;  %v1024_v42 = vmul.f32 %v4716_v59, %v519_v38  ;;  %v1025_v56 = vmul.f32 %v4716_v59, %v520_v19  ;;  %v1093_v43 = vmul.f32 %v4641_v23, %v4727_v3 }
  0xd2   : > { %v1193_v32 = vadd.f32 %v1161_v5, %v1124_v8  ;;  %v917_v7 = vadd.f32 %v885_v50, %v848_v44  ;;  %v918_v29 = vadd.f32 %v886_v55, %v849_v35  ;;  %v1094_v61 = vmul.f32 %v4641_v23, %v6344_v4  ;;  %v521_v5 = vld [vmem:[#allocation2 + $0x187] sm:$0xff] }
  0xd3   : > { %v1162_v53 = vmul.f32 %v4718_v60, %v599_v24  ;;  %v1163_v40 = vmul.f32 %v4718_v60, %v600_v39  ;;  %v642_v21 = vmul.f32 %v4615_v10, %v519_v38  ;;  %v643_v6 = vmul.f32 %v4615_v10, %v520_v19  ;;  %v601_v44 = vld [vmem:[#allocation2 + $0x189] sm:$0xff] }
  0xd4   : > { %v1220_v22 = vpack.c.bf16 %v1193_v32, %v1192_v57  ;;  %v986_v25 = vadd.f32 %v954_v16, %v917_v7  ;;  %v987_v45 = vadd.f32 %v955_v46, %v918_v29  ;;  %v748_v3 = vmul.f32 %v4622_v13, %v599_v24  ;;  %v522_v57 = vld [vmem:[#allocation2 + $0x19f] sm:$0xff] }
  0xd5   : > { %v711_v41 = vadd.f32 %v679_v20, %v642_v21  ;;  %v712_v14 = vadd.f32 %v680_v37, %v643_v6  ;;  %v749_v2 = vmul.f32 %v4622_v13, %v600_v39  ;;  %v818_v50 = vmul.f32 %v4659_v33, %v520_v19  ;;  %v6346_v19 = vld [vmem:[#allocation19_spill] sm:$0xff] }
  0xd6   : > { %3894 = vmatprep.mubr.bf16.mxu0 %v1220_v22  ;;  %v1056_v28 = vadd.f32 %v1024_v42, %v986_v25  ;;  %v1057_v30 = vadd.f32 %v1025_v56, %v987_v45  ;;  %v681_v38 = vmul.f32 %v4620_v12, %v6345_v52  ;;  %v819_v55 = vmul.f32 %v4659_v33, %v521_v5  ;;  %v602_v42 = vld [vmem:[#allocation2 + $0x1a1] sm:$0xff]  ;;  %v523_v25 = vld [vmem:[#allocation2 + $0x1b7] sm:$0xff] }
  0xd7   : > { %v780_v48 = vadd.f32 %v748_v3, %v711_v41  ;;  %v781_v16 = vadd.f32 %v749_v2, %v712_v14  ;;  %v887_v24 = vmul.f32 %v4631_v17, %v6344_v4  ;;  %v888_v20 = vmul.f32 %v4631_v17, %v6345_v52 }
  0xd8   : > { %v1125_v37 = vadd.f32 %v1093_v43, %v1056_v28  ;;  %v1126_v8 = vadd.f32 %v1094_v61, %v1057_v30  ;;  %v682_v35 = vmul.f32 %v4620_v12, %v6346_v19  ;;  %v956_v46 = vmul.f32 %v4661_v34, %v600_v39 }
  0xd9   : > { %v850_v56 = vadd.f32 %v818_v50, %v780_v48  ;;  %v851_v32 = vadd.f32 %v819_v55, %v781_v16  ;;  %v957_v7 = vmul.f32 %v4661_v34, %v601_v44  ;;  %v1026_v29 = vmul.f32 %v4716_v59, %v521_v5  ;;  %v603_v50 = vld [vmem:[#allocation2 + $0x1b9] sm:$0xff] }
  0xda   : > { %v1194_v4 = vadd.f32 %v1162_v53, %v1125_v37  ;;  %v1195_v21 = vadd.f32 %v1163_v40, %v1126_v8  ;;  %v1027_v6 = vmul.f32 %v4716_v59, %v522_v57  ;;  %v1095_v43 = vmul.f32 %v4641_v23, %v6345_v52 }
  0xdb   : > { %v919_v61 = vadd.f32 %v887_v24, %v850_v56  ;;  %v920_v22 = vadd.f32 %v888_v20, %v851_v32  ;;  %v1096_v39 = vmul.f32 %v4641_v23, %v6346_v19  ;;  %v644_v45 = vmul.f32 %v4615_v10, %v521_v5  ;;  %v564_v20 = vld [vmem:[#allocation2 + $0x1d0] sm:$0xff] }
  0xdc   : > { %v1221_v3 = vpack.c.bf16 %v1195_v21, %v1194_v4  ;;  %v645_v41 = vmul.f32 %v4615_v10, %v522_v57  ;;  %v750_v14 = vmul.f32 %v4622_v13, %v601_v44  ;;  %v751_v53 = vmul.f32 %v4622_v13, %v602_v42  ;;  %v604_v21 = vld [vmem:[#allocation2 + $0x1d1] sm:$0xff] }
  0xdd   : > { %v988_v40 = vadd.f32 %v956_v46, %v919_v61  ;;  %v989_v2 = vadd.f32 %v957_v7, %v920_v22  ;;  %v713_v28 = vadd.f32 %v681_v38, %v644_v45  ;;  %v820_v30 = vmul.f32 %v4659_v33, %v522_v57  ;;  %v526_v46 = vld [vmem:[#allocation2 + $0x1ff] sm:$0xff]  ;;  %v6347_v38 = vld [vmem:[#allocation20_spill] sm:$0xff]  ;;  %v565_v7 = vld [vmem:[#allocation2 + $0x1e8] sm:$0xff] }
  0xde   : > { %3895 = vmatmul.mubr.bf16.gmra.mxu0 %v1221_v3  ;;  %v1164_v52 = vmul.f32 %v4718_v60, %v601_v44  ;;  %v1165_v55 = vmul.f32 %v4718_v60, %v602_v42  ;;  %v714_v48 = vadd.f32 %v682_v35, %v645_v41  ;;  %v821_v5 = vmul.f32 %v4659_v33, %v523_v25  ;;  %v605_v45 = vld [vmem:[#allocation2 + $0x1e9] sm:$0xff] }
  0xdf   : > { %v1058_v16 = vadd.f32 %v1026_v29, %v988_v40  ;;  %v1059_v24 = vadd.f32 %v1027_v6, %v989_v2  ;;  %v782_v37 = vadd.f32 %v750_v14, %v713_v28  ;;  %v889_v8 = vmul.f32 %v4631_v17, %v6346_v19 }
  0xe0   : > { %v783_v56 = vadd.f32 %v751_v53, %v714_v48  ;;  %v890_v57 = vmul.f32 %v4631_v17, %v6347_v38  ;;  %v958_v32 = vmul.f32 %v4661_v34, %v602_v42  ;;  %v959_v44 = vmul.f32 %v4661_v34, %v603_v50  ;;  %v606_v53 = vld [vmem:[#allocation2 + $0x201] sm:$0xff] }
  0xe1   : > { %v1127_v35 = vadd.f32 %v1095_v43, %v1058_v16  ;;  %v1128_v4 = vadd.f32 %v1096_v39, %v1059_v24  ;;  %v852_v29 = vadd.f32 %v820_v30, %v782_v37  ;;  %v1028_v6 = vmul.f32 %v4716_v59, %v523_v25 }
  0xe2   : > { %v853_v61 = vadd.f32 %v821_v5, %v783_v56  ;;  %v1097_v19 = vmul.f32 %v4641_v23, %v6347_v38  ;;  %v1098_v22 = vmul.f32 %v4641_v23, %v564_v20  ;;  %v647_v3 = vmul.f32 %v4615_v10, %v526_v46 }
  0xe3   : > { %v1196_v41 = vadd.f32 %v1164_v52, %v1127_v35  ;;  %v1197_v42 = vadd.f32 %v1165_v55, %v1128_v4  ;;  %v921_v14 = vadd.f32 %v889_v8, %v852_v29  ;;  %v683_v43 = vmul.f32 %v4620_v12, %v565_v7  ;;  %v527_v55 = vld [vmem:[#allocation2 + $0x217] sm:$0xff] }
  0xe4   : > { %v922_v39 = vadd.f32 %v890_v57, %v853_v61  ;;  %v1166_v40 = vmul.f32 %v4718_v60, %v603_v50  ;;  %v1167_v25 = vmul.f32 %v4718_v60, %v604_v21  ;;  %v684_v2 = vmul.f32 %v4620_v12, %v4783_v26  ;;  %v607_v35 = vld [vmem:[#allocation2 + $0x219] sm:$0xff] }
  0xe5   : > { %v1222_v28 = vpack.c.bf16 %v1197_v42, %v1196_v41  ;;  %v990_v30 = vadd.f32 %v958_v32, %v921_v14  ;;  %v715_v48 = vadd.f32 %v683_v43, %v4618_v11  ;;  %v752_v5 = vmul.f32 %v4622_v13, %v605_v45  ;;  %v608_v43 = vld [vmem:[#allocation2 + $0x231] sm:$0xff] }
  0xe6   : > { %v991_v52 = vadd.f32 %v959_v44, %v922_v39  ;;  %v716_v16 = vadd.f32 %v684_v2, %v647_v3  ;;  %v753_v24 = vmul.f32 %v4622_v13, %v606_v53  ;;  %v822_v20 = vmul.f32 %v4659_v33, %v526_v46 }
  0xe7   : > { %3898 = vmatprep.mubr.bf16.mxu0 %v1222_v28  ;;  %v1060_v50 = vadd.f32 %v1028_v6, %v990_v30  ;;  %v784_v37 = vadd.f32 %v752_v5, %v715_v48  ;;  %v823_v8 = vmul.f32 %v4659_v33, %v527_v55  ;;  %v891_v56 = vmul.f32 %v4631_v17, %v4783_v26  ;;  %v528_v6 = vld [vmem:[#allocation2 + $0x22f] sm:$0xff] }
  0xe8   : > { %v1061_v38 = vadd.f32 %v4872_v51, %v991_v52  ;;  %v685_v57 = vmul.f32 %v4620_v12, %v4787_v36  ;;  %v785_v32 = vadd.f32 %v753_v24, %v716_v16  ;;  %v892_v44 = vmul.f32 %v4631_v17, %v4787_v36 }
  0xe9   : > { %v1129_v7 = vadd.f32 %v1097_v19, %v1060_v50  ;;  %v686_v46 = vmul.f32 %v4620_v12, %v4790_v58  ;;  %v854_v4 = vadd.f32 %v822_v20, %v784_v37  ;;  %v960_v21 = vmul.f32 %v4661_v34, %v606_v53  ;;  %v609_v37 = vld [vmem:[#allocation2 + $0x249] sm:$0xff] }
  0xea   : > { %v1130_v29 = vadd.f32 %v1098_v22, %v1061_v38  ;;  %v855_v26 = vadd.f32 %v823_v8, %v785_v32  ;;  %v961_v61 = vmul.f32 %v4661_v34, %v607_v35  ;;  %v1030_v45 = vmul.f32 %v4716_v59, %v527_v55 }
  0xeb   : > { %v1198_v3 = vadd.f32 %v1166_v40, %v1129_v7  ;;  %v923_v41 = vadd.f32 %v891_v56, %v854_v4  ;;  %v1031_v42 = vmul.f32 %v4716_v59, %v528_v6  ;;  %v1099_v19 = vmul.f32 %v4641_v23, %v4787_v36  ;;  %v529_v40 = vld [vmem:[#allocation2 + $0x247] sm:$0xff] }
  0xec   : > { %v1199_v14 = vadd.f32 %v1167_v25, %v1130_v29  ;;  %v924_v39 = vadd.f32 %v892_v44, %v855_v26  ;;  %v1100_v53 = vmul.f32 %v4641_v23, %v4790_v58  ;;  %v648_v22 = vmul.f32 %v4615_v10, %v527_v55 }
  0xed   : > { %v992_v2 = vadd.f32 %v960_v21, %v923_v41  ;;  %v1168_v28 = vmul.f32 %v4718_v60, %v607_v35  ;;  %v1169_v30 = vmul.f32 %v4718_v60, %v608_v43  ;;  %v649_v48 = vmul.f32 %v4615_v10, %v528_v6 }
  0xee   : > { %v1223_v5 = vpack.c.bf16 %v1199_v14, %v1198_v3  ;;  %v993_v52 = vadd.f32 %v961_v61, %v924_v39  ;;  %v717_v16 = vadd.f32 %v685_v57, %v648_v22  ;;  %v754_v36 = vmul.f32 %v4622_v13, %v607_v35 }
  0xef   : > { %v1062_v25 = vadd.f32 %v1030_v45, %v992_v2  ;;  %v718_v24 = vadd.f32 %v686_v46, %v649_v48  ;;  %v755_v20 = vmul.f32 %v4622_v13, %v608_v43  ;;  %v824_v50 = vmul.f32 %v4659_v33, %v528_v6  ;;  %v530_v46 = vld [vmem:[#allocation2 + $0x25f] sm:$0xff] }
  0xf0   : > { %3899 = vmatmul.mubr.bf16.gmra.mxu0 %v1223_v5  ;;  %v1063_v55 = vadd.f32 %v1031_v42, %v993_v52  ;;  %v786_v8 = vadd.f32 %v754_v36, %v717_v16  ;;  %v825_v56 = vmul.f32 %v4659_v33, %v529_v40  ;;  %v893_v38 = vmul.f32 %v4631_v17, %v4790_v58  ;;  %v531_v5 = vld [vmem:[#allocation2 + $0x277] sm:$0xff] }
  0xf1   : > { %v1131_v32 = vadd.f32 %v1099_v19, %v1062_v25  ;;  %v687_v57 = vmul.f32 %v4620_v12, %v4798_v63  ;;  %v787_v44 = vadd.f32 %v755_v20, %v718_v24  ;;  %v894_v7 = vmul.f32 %v4631_v17, %v4798_v63  ;;  %v610_v19 = vld [vmem:[#allocation2 + $0x261] sm:$0xff] }
  0xf2   : > { %v1132_v35 = vadd.f32 %v1100_v53, %v1063_v55  ;;  %v688_v4 = vmul.f32 %v4620_v12, %v4801_v62  ;;  %v856_v21 = vadd.f32 %v824_v50, %v786_v8  ;;  %v962_v29 = vmul.f32 %v4661_v34, %v608_v43  ;;  %v611_v8 = vld [vmem:[#allocation2 + $0x279] sm:$0xff] }
  0xf3   : > { %v1200_v6 = vadd.f32 %v1168_v28, %v1131_v32  ;;  %v857_v26 = vadd.f32 %v825_v56, %v787_v44  ;;  %v963_v58 = vmul.f32 %v4661_v34, %v609_v37  ;;  %v1032_v61 = vmul.f32 %v4716_v59, %v529_v40  ;;  %v5036_v56 = vld [vmem:[#allocation6 + $0x1] ss:$0 sm:$0xff]  ;;  %v532_v32 = vld [vmem:[#allocation2 + $0x28f] sm:$0xff] }
  0xf4   : > { %v1201_v45 = vadd.f32 %v1169_v30, %v1132_v35  ;;  %v925_v3 = vadd.f32 %v893_v38, %v856_v21  ;;  %v1033_v41 = vmul.f32 %v4716_v59, %v530_v46  ;;  %v1101_v42 = vmul.f32 %v4641_v23, %v4798_v63 }
  0xf5   : > { %v926_v14 = vadd.f32 %v894_v7, %v857_v26  ;;  %v1102_v39 = vmul.f32 %v4641_v23, %v4801_v62  ;;  %v650_v43 = vmul.f32 %v4615_v10, %v529_v40  ;;  %v651_v53 = vmul.f32 %v4615_v10, %v530_v46 }
  0xf6   : > { %v1224_v22 = vpack.c.bf16 %v1201_v45, %v1200_v6  ;;  %v994_v2 = vadd.f32 %v962_v29, %v925_v3  ;;  %v1170_v28 = vmul.f32 %v4718_v60, %v609_v37  ;;  %v1171_v30 = vmul.f32 %v4718_v60, %v610_v19  ;;  %v5046_v6 = vld [vmem:[#allocation6 + $0x9] ss:$0 sm:$0xff] }
  0xf7   : > { %v995_v48 = vadd.f32 %v963_v58, %v926_v14  ;;  %v719_v52 = vadd.f32 %v687_v57, %v650_v43  ;;  %v720_v16 = vadd.f32 %v688_v4, %v651_v53  ;;  %v756_v63 = vmul.f32 %v4622_v13, %v609_v37  ;;  %v533_v58 = vld [vmem:[#allocation2 + $0x2a7] sm:$0xff] }
  0xf8   : > { %3902 = vmatprep.mubr.bf16.mxu0 %v1224_v22  ;;  %v1064_v36 = vadd.f32 %v1032_v61, %v994_v2  ;;  %v757_v23 = vmul.f32 %v4622_v13, %v610_v19  ;;  %v826_v40 = vmul.f32 %v4659_v33, %v530_v46  ;;  %v827_v10 = vmul.f32 %v4659_v33, %v531_v5  ;;  %v613_v22 = vld [vmem:[#allocation2 + $0x2a9] sm:$0xff] }
  0xf9   : > { %v1065_v25 = vadd.f32 %v1033_v41, %v995_v48  ;;  %v689_v24 = vmul.f32 %v4620_v12, %v4808_v49  ;;  %v788_v20 = vadd.f32 %v756_v63, %v719_v52  ;;  %v895_v50 = vmul.f32 %v4631_v17, %v4801_v62  ;;  %v612_v62 = vld [vmem:[#allocation2 + $0x291] sm:$0xff]  ;;  %v5056_v41 = vld [vmem:[#allocation6 + $0x2] ss:$0 sm:$0xff] }
  0xfa   : > { %v1133_v55 = vadd.f32 %v1101_v42, %v1064_v36  ;;  %v690_v37 = vmul.f32 %v5036_v56, %v4811_v0  ;;  %v789_v13 = vadd.f32 %v757_v23, %v720_v16  ;;  %v896_v38 = vmul.f32 %v4631_v17, %v4808_v49  ;;  %v5066_v16 = vld [vmem:[#allocation6 + $0x5] ss:$0 sm:$0xff] }
  0xfb   : > { %v1134_v33 = vadd.f32 %v1102_v39, %v1065_v25  ;;  %v858_v57 = vadd.f32 %v826_v40, %v788_v20  ;;  %v964_v12 = vmul.f32 %v4661_v34, %v610_v19  ;;  %v965_v44 = vmul.f32 %v4661_v34, %v611_v8  ;;  %v5052_v34 = vld [vmem:[#allocation6] ss:$0 sm:$0xff]  ;;  %v575_v20 = vld [vmem:[#allocation2 + $0x2d8] sm:$0xff] }
  0xfc   : > { %v1202_v7 = vadd.f32 %v1170_v28, %v1133_v55  ;;  %v859_v35 = vadd.f32 %v827_v10, %v789_v13  ;;  %v1034_v46 = vmul.f32 %v4716_v59, %v531_v5  ;;  %v1035_v4 = vmul.f32 %v4716_v59, %v532_v32  ;;  %v574_v23 = vld [vmem:[#allocation2 + $0x2c0] sm:$0xff] }
  0xfd   : > { %v1203_v21 = vadd.f32 %v1171_v30, %v1134_v33  ;;  %v927_v29 = vadd.f32 %v895_v50, %v858_v57  ;;  %v1103_v17 = vmul.f32 %v5046_v6, %v4808_v49  ;;  %v1104_v26 = vmul.f32 %v5046_v6, %v4811_v0  ;;  %v5060_v49 = vld [vmem:[#allocation6 + $0x4] ss:$0 sm:$0xff]  ;;  %v5072_v55 = vld [vmem:[#allocation6 + $0x6] ss:$0 sm:$0xff]  ;;  %v615_v57 = vld [vmem:[#allocation2 + $0x2d9] sm:$0xff] }
  0xfe   : > { %v928_v61 = vadd.f32 %v896_v38, %v859_v35  ;;  %v652_v45 = vmul.f32 %v5052_v34, %v531_v5  ;;  %v653_v3 = vmul.f32 %v5052_v34, %v532_v32  ;;  %v758_v42 = vmul.f32 %v5056_v41, %v611_v8 }
  0xff   : > { %v1225_v19 = vpack.c.bf16 %v1203_v21, %v1202_v7  ;;  %v996_v14 = vadd.f32 %v964_v12, %v927_v29  ;;  %v759_v39 = vmul.f32 %v5056_v41, %v612_v62  ;;  %v828_v43 = vmul.f32 %v5060_v49, %v532_v32  ;;  %v616_v21 = vld [vmem:[#allocation2 + $0x2f1] sm:$0xff]  ;;  %v5084_v29 = vld [vmem:[#allocation6 + $0xa] ss:$0 sm:$0xff] }
 0x100   : > { %v997_v53 = vadd.f32 %v965_v44, %v928_v61  ;;  %v721_v2 = vadd.f32 %v689_v24, %v652_v45  ;;  %v722_v28 = vadd.f32 %v690_v37, %v653_v3  ;;  %v829_v30 = vmul.f32 %v5060_v49, %v533_v58  ;;  %v536_v24 = vld [vmem:[#allocation2 + $0x2ef] sm:$0xff] }
 0x101   : > { %3903 = vmatmul.mubr.bf16.gmra.mxu0 %v1225_v19  ;;  %v1066_v48 = vadd.f32 %v1034_v46, %v996_v14  ;;  %v1172_v5 = vmul.f32 %v4718_v60, %v611_v8  ;;  %v1173_v52 = vmul.f32 %v4718_v60, %v612_v62  ;;  %v897_v63 = vmul.f32 %v5066_v16, %v4811_v0  ;;  %v614_v0 = vld [vmem:[#allocation2 + $0x2c1] sm:$0xff] }
 0x102   : > { %v1067_v36 = vadd.f32 %v1035_v4, %v997_v53  ;;  %v790_v40 = vadd.f32 %v758_v42, %v721_v2  ;;  %v791_v10 = vadd.f32 %v759_v39, %v722_v28  ;;  %v898_v25 = vmul.f32 %v5066_v16, %v4814_v1  ;;  %v537_v42 = vld [vmem:[#allocation2 + $0x307] sm:$0xff] }
 0x103   : > { %v1135_v50 = vadd.f32 %v1103_v17, %v1066_v48  ;;  %v966_v8 = vmul.f32 %v5072_v55, %v612_v62  ;;  %v967_v60 = vmul.f32 %v5072_v55, %v613_v22  ;;  %v1036_v37 = vmul.f32 %v4716_v59, %v533_v58 }
 0x104   : > { %v1136_v13 = vadd.f32 %v1104_v26, %v1067_v36  ;;  %v860_v38 = vadd.f32 %v828_v43, %v790_v40  ;;  %v861_v33 = vadd.f32 %v829_v30, %v791_v10  ;;  %v1105_v32 = vmul.f32 %v5046_v6, %v4814_v1  ;;  %v617_v30 = vld [vmem:[#allocation2 + $0x309] sm:$0xff]  ;;  %v538_v40 = vld [vmem:[#allocation2 + $0x31f] sm:$0xff] }
 0x105   : > { %v1204_v12 = vadd.f32 %v1172_v5, %v1135_v50  ;;  %v1106_v44 = vmul.f32 %v5046_v6, %v574_v23  ;;  %v655_v7 = vmul.f32 %v5052_v34, %v536_v24  ;;  %v691_v35 = vmul.f32 %v5036_v56, %v575_v20  ;;  %v5104_v20 = vld [vmem:[#allocation6 + $0x8] ss:$0 sm:$0xff] }
 0x106   : > { %v1205_v62 = vadd.f32 %v1173_v52, %v1136_v13  ;;  %v929_v46 = vadd.f32 %v897_v63, %v860_v38  ;;  %v930_v4 = vadd.f32 %v898_v25, %v861_v33  ;;  %v692_v59 = vmul.f32 %v5036_v56, %v4824_v47 }
 0x107   : > { %v1174_v17 = vmul.f32 %v5084_v29, %v613_v22  ;;  %v1175_v1 = vmul.f32 %v5084_v29, %v614_v0  ;;  %v723_v26 = vadd.f32 %v691_v35, %v4618_v11  ;;  %v760_v58 = vmul.f32 %v5056_v41, %v615_v57  ;;  %v618_v0 = vld [vmem:[#allocation2 + $0x321] sm:$0xff] }
 0x108   : > { %v1226_v61 = vpack.c.bf16 %v1205_v62, %v1204_v12  ;;  %v998_v45 = vadd.f32 %v966_v8, %v929_v46  ;;  %v999_v3 = vadd.f32 %v967_v60, %v930_v4  ;;  %v724_v19 = vadd.f32 %v692_v59, %v655_v7  ;;  %v619_v59 = vld [vmem:[#allocation2 + $0x339] sm:$0xff] }
 0x109   : > { %v761_v14 = vmul.f32 %v5056_v41, %v616_v21  ;;  %v792_v39 = vadd.f32 %v760_v58, %v723_v26  ;;  %v830_v43 = vmul.f32 %v5060_v49, %v536_v24  ;;  %v831_v53 = vmul.f32 %v5060_v49, %v537_v42 }
 0x10a   : > { %3906 = vmatprep.mubr.bf16.mxu0 %v1226_v61  ;;  %v1068_v22 = vadd.f32 %v1036_v37, %v998_v45  ;;  %v1069_v2 = vadd.f32 %v4872_v51, %v999_v3  ;;  %v693_v11 = vmul.f32 %v5036_v56, %v4831_v54  ;;  %v899_v28 = vmul.f32 %v5066_v16, %v4824_v47 }
 0x10b   : > { %v793_v48 = vadd.f32 %v761_v14, %v724_v19  ;;  %v862_v5 = vadd.f32 %v830_v43, %v792_v39  ;;  %v900_v52 = vmul.f32 %v5066_v16, %v4831_v54  ;;  %v968_v63 = vmul.f32 %v5072_v55, %v616_v21  ;;  %v4068_v19 = vld [vmem:[#allocation11 + $0x38] sm:$0xff]  }
 0x10c   : > { %v1137_v36 = vadd.f32 %v1105_v32, %v1068_v22  ;;  %v1138_v23 = vadd.f32 %v1106_v44, %v1069_v2  ;;  %v694_v51 = vmul.f32 %v5036_v56, %v4834_v31  ;;  %v969_v10 = vmul.f32 %v5072_v55, %v617_v30  ;;  %v539_v32 = vld [vmem:[#allocation2 + $0x337] sm:$0xff]  ;;  %3918 = vmatprep.subr.bf16.mxu1 %v4068_v19 }
 0x10d   : > { %v863_v25 = vadd.f32 %v831_v53, %v793_v48  ;;  %v931_v24 = vadd.f32 %v899_v28, %v862_v5  ;;  %v1038_v47 = vmul.f32 %v5104_v20, %v537_v42  ;;  %v1039_v50 = vmul.f32 %v5104_v20, %v538_v40  ;;  %3919 = vmatpush3.bf16.msra.mxu1 %v4068_v19 }
 0x10e   : > { %v1206_v8 = vadd.f32 %v1174_v17, %v1137_v36  ;;  %v1207_v60 = vadd.f32 %v1175_v1, %v1138_v23  ;;  %v1107_v37 = vmul.f32 %v5046_v6, %v4831_v54  ;;  %v1108_v13 = vmul.f32 %v5046_v6, %v4834_v31  ;;  %v620_v36 = vld [vmem:[#allocation2 + $0x351] sm:$0xff] }
 0x10f   : > { %v932_v38 = vadd.f32 %v900_v52, %v863_v25  ;;  %v1000_v33 = vadd.f32 %v968_v63, %v931_v24  ;;  %v656_v57 = vmul.f32 %v5052_v34, %v537_v42  ;;  %v657_v12 = vmul.f32 %v5052_v34, %v538_v40 }
 0x110   : > { %v1227_v44 = vpack.c.bf16 %v1207_v60, %v1206_v8  ;;  %v1176_v7 = vmul.f32 %v5084_v29, %v617_v30  ;;  %v1177_v35 = vmul.f32 %v5084_v29, %v618_v0  ;;  %v762_v62 = vmul.f32 %v5056_v41, %v617_v30 }
 0x111   : > { %v1001_v46 = vadd.f32 %v969_v10, %v932_v38  ;;  %v1070_v54 = vadd.f32 %v1038_v47, %v1000_v33  ;;  %v725_v4 = vadd.f32 %v693_v11, %v656_v57  ;;  %v726_v21 = vadd.f32 %v694_v51, %v657_v12  ;;  %v540_v11 = vld [vmem:[#allocation2 + $0x34f] sm:$0xff] }
 0x112   : > { %3907 = vmatmul.mubr.bf16.gmra.mxu0 %v1227_v44  ;;  %v695_v17 = vmul.f32 %v5036_v56, %v4842_v15  ;;  %v763_v1 = vmul.f32 %v5056_v41, %v618_v0  ;;  %v832_v26 = vmul.f32 %v5060_v49, %v538_v40  ;;  %v833_v58 = vmul.f32 %v5060_v49, %v539_v32  ;;  %v4069_v10 = vld [vmem:[#allocation11 + $0x30] sm:$0xff]  }
 0x113   : > { %v1071_v61 = vadd.f32 %v1039_v50, %v1001_v46  ;;  %v1139_v45 = vadd.f32 %v1107_v37, %v1070_v54  ;;  %v794_v3 = vadd.f32 %v762_v62, %v725_v4  ;;  %v901_v42 = vmul.f32 %v5066_v16, %v4834_v31  ;;  %3920 = vmatprep.subr.bf16.mxu1 %v4069_v10 }
 0x114   : > { %v696_v14 = vmul.f32 %v5036_v56, %v4845_v18  ;;  %v795_v39 = vadd.f32 %v763_v1, %v726_v21  ;;  %v902_v43 = vmul.f32 %v5066_v16, %v4842_v15  ;;  %v970_v53 = vmul.f32 %v5072_v55, %v618_v0  ;;  %v541_v0 = vld [vmem:[#allocation2 + $0x367] sm:$0xff]  ;;  %3921 = vmatpush3.bf16.msra.mxu1 %v4069_v10 }
 0x115   : > { %v1140_v22 = vadd.f32 %v1108_v13, %v1071_v61  ;;  %v1208_v2 = vadd.f32 %v1176_v7, %v1139_v45  ;;  %v864_v28 = vadd.f32 %v832_v26, %v794_v3  ;;  %v971_v30 = vmul.f32 %v5072_v55, %v619_v59  ;;  %v621_v21 = vld [vmem:[#allocation2 + $0x369] sm:$0xff]  ;;  %v622_v61 = vld [vmem:[#allocation2 + $0x381] sm:$0xff] }
 0x116   : > { %v865_v48 = vadd.f32 %v833_v58, %v795_v39  ;;  %v1040_v31 = vmul.f32 %v5104_v20, %v539_v32  ;;  %v1041_v5 = vmul.f32 %v5104_v20, %v540_v11  ;;  %v1109_v52 = vmul.f32 %v5046_v6, %v4842_v15  ;;  %v542_v58 = vld [vmem:[#allocation2 + $0x37f] sm:$0xff] }
 0x117   : > { %v1209_v63 = vadd.f32 %v1177_v35, %v1140_v22  ;;  %v933_v23 = vadd.f32 %v901_v42, %v864_v28  ;;  %v1110_v40 = vmul.f32 %v5046_v6, %v4845_v18  ;;  %v658_v51 = vmul.f32 %v5052_v34, %v539_v32  ;;  %v543_v22 = vld [vmem:[#allocation2 + $0x397] sm:$0xff] }
 0x118   : > { %v934_v25 = vadd.f32 %v902_v43, %v865_v48  ;;  %v1178_v24 = vmul.f32 %v5084_v29, %v619_v59  ;;  %v1179_v47 = vmul.f32 %v5084_v29, %v620_v36  ;;  %v659_v50 = vmul.f32 %v5052_v34, %v540_v11 }
 0x119   : > { %v1228_v8 = vpack.c.bf16 %v1209_v63, %v1208_v2  ;;  %v1002_v60 = vadd.f32 %v970_v53, %v933_v23  ;;  %v727_v15 = vadd.f32 %v695_v17, %v658_v51  ;;  %v764_v37 = vmul.f32 %v5056_v41, %v619_v59 }
 0x11a   : > { %v1003_v13 = vadd.f32 %v971_v30, %v934_v25  ;;  %v728_v38 = vadd.f32 %v696_v14, %v659_v50  ;;  %v765_v33 = vmul.f32 %v5056_v41, %v620_v36  ;;  %v834_v32 = vmul.f32 %v5060_v49, %v540_v11  ;;  %v4085_v25 = vld [vmem:[#allocation2 + $0x380] sm:$0xff] }
 0x11b   : > { %3910 = vmatprep.mubr.bf16.mxu0 %v1228_v8  ;;  %v1072_v57 = vadd.f32 %v1040_v31, %v1002_v60  ;;  %v796_v12 = vadd.f32 %v764_v37, %v727_v15  ;;  %v835_v44 = vmul.f32 %v5060_v49, %v541_v0  ;;  %v903_v7 = vmul.f32 %v5066_v16, %v4845_v18  ;;  %v4086_v8 = vld [vmem:[#allocation2 + $0x398] sm:$0xff] }
 0x11c   : > { %v1073_v35 = vadd.f32 %v1041_v5, %v1003_v13  ;;  %v697_v62 = vmul.f32 %v5036_v56, %v4852_v9  ;;  %v797_v46 = vadd.f32 %v765_v33, %v728_v38  ;;  %v904_v54 = vmul.f32 %v5066_v16, %v4852_v9 }
 0x11d   : > { %v1141_v4 = vadd.f32 %v1109_v52, %v1072_v57  ;;  %v698_v59 = vmul.f32 %v5036_v56, %v4855_v27  ;;  %v866_v17 = vadd.f32 %v834_v32, %v796_v12  ;;  %v972_v1 = vmul.f32 %v5072_v55, %v620_v36  ;;  %v584_v32 = vld [vmem:[#allocation2 + $0x3b0] sm:$0xff] }
 0x11e   : > { %v1142_v26 = vadd.f32 %v1110_v40, %v1073_v35  ;;  %v867_v18 = vadd.f32 %v835_v44, %v797_v46  ;;  %v973_v45 = vmul.f32 %v5072_v55, %v621_v21  ;;  %v1042_v3 = vmul.f32 %v5104_v20, %v541_v0  ;;  %v4071_v44 = vld [vmem:[#allocation11 + $0x20] sm:$0xff]   ;;  %v5173_v35 = vld [vmem:[#allocation2 + $0x7] sm:$0xff] }
 0x11f   : > { %v1210_v42 = vadd.f32 %v1178_v24, %v1141_v4  ;;  %v935_v19 = vadd.f32 %v903_v7, %v866_v17  ;;  %v1043_v14 = vmul.f32 %v5104_v20, %v542_v58  ;;  %v1111_v39 = vmul.f32 %v5046_v6, %v4852_v9  ;;  %v4070_v24 = vld [vmem:[#allocation11 + $0x28] sm:$0xff]   ;;  %v624_v46 = vld [vmem:[#allocation2 + $0x3b1] sm:$0xff] }
 0x120   : > { %v1211_v43 = vadd.f32 %v1179_v47, %v1142_v26  ;;  %v936_v56 = vadd.f32 %v904_v54, %v867_v18  ;;  %v1112_v53 = vmul.f32 %v5046_v6, %v4855_v27  ;;  %v660_v2 = vmul.f32 %v5052_v34, %v541_v0  ;;  %3922 = vmatprep.subr.bf16.mxu1 %v4070_v24 }
 0x121   : > { %v1004_v11 = vadd.f32 %v972_v1, %v935_v19  ;;  %v661_v28 = vmul.f32 %v5052_v34, %v542_v58  ;;  %v766_v30 = vmul.f32 %v5056_v41, %v621_v21  ;;  %v767_v48 = vmul.f32 %v5056_v41, %v622_v61  ;;  %v623_v34 = vld [vmem:[#allocation2 + $0x399] sm:$0xff]  ;;  %3923 = vmatpush3.bf16.msra.mxu1 %v4070_v24 }
 0x122   : > { %v1229_v31 = vpack.c.bf16 %v1211_v43, %v1210_v42  ;;  %v1005_v5 = vadd.f32 %v973_v45, %v936_v56  ;;  %v729_v52 = vadd.f32 %v697_v62, %v660_v2  ;;  %v836_v9 = vmul.f32 %v5060_v49, %v542_v58  ;;  %3924 = vmatprep.subr.bf16.mxu1 %v4071_v44  ;;  %v4073_v42 = vld [vmem:[#allocation11 + $0x10] sm:$0xff]   ;;  %v4075_v19 = vld [vmem:[#allocation11] sm:$0xff]  }
 0x123   : > { %v1074_v63 = vadd.f32 %v1042_v3, %v1004_v11  ;;  %v1180_v36 = vmul.f32 %v5084_v29, %v621_v21  ;;  %v730_v23 = vadd.f32 %v698_v59, %v661_v28  ;;  %v837_v27 = vmul.f32 %v5060_v49, %v543_v22  ;;  %v4072_v3 = vld [vmem:[#allocation11 + $0x18] sm:$0xff]   ;;  %v5188_v43 = vld [vmem:[#allocation9 + $0x1] ss:$0 sm:$0xff]  ;;  %v1642_v56 = vld [vmem:[#allocation2 + $0xf8] sm:$0xff] }
 0x124   : > { %3911 = vmatmul.mubr.bf16.gmra.mxu0 %v1229_v31  ;;  %v1075_v40 = vadd.f32 %v1043_v14, %v1005_v5  ;;  %v1181_v51 = vmul.f32 %v5084_v29, %v622_v61  ;;  %v798_v10 = vadd.f32 %v766_v30, %v729_v52  ;;  %v905_v41 = vmul.f32 %v4085_v25, %v5066_v16  ;;  %v1632_v14 = vld [vmem:[#allocation2 + $0x8] sm:$0xff] }
 0x125   : > { %v1143_v47 = vadd.f32 %v1111_v39, %v1074_v63  ;;  %v799_v50 = vadd.f32 %v767_v48, %v730_v23  ;;  %v906_v60 = vmul.f32 %v4086_v8, %v5066_v16  ;;  %v974_v13 = vmul.f32 %v5072_v55, %v622_v61  ;;  %3925 = vmatpush3.bf16.msra.mxu1 %v4071_v44  ;;  %v5186_v39 = vld [vmem:[%s6309_s3] ss:$0 sm:$0xff]  ;;  %v1672_v30 = vld [vmem:[#allocation2 + $0x9] sm:$0xff] }
 0x126   : > { %v1144_v15 = vadd.f32 %v1112_v53, %v1075_v40  ;;  %v868_v37 = vadd.f32 %v836_v9, %v798_v10  ;;  %v975_v38 = vmul.f32 %v5072_v55, %v623_v34  ;;  %v1044_v12 = vmul.f32 %v5104_v20, %v543_v22  ;;  %3926 = vmatprep.subr.bf16.mxu1 %v4072_v3  ;;  %v1652_v53 = vld [vmem:[#allocation2 + $0x1e8] sm:$0xff] }
 0x127   : > { %v1212_v49 = vadd.f32 %v1180_v36, %v1143_v47  ;;  %v869_v0 = vadd.f32 %v837_v27, %v799_v50  ;;  %v1045_v16 = vmul.f32 %v5173_v35, %v5104_v20  ;;  %v1113_v4 = vmul.f32 %v4086_v8, %v5046_v6  ;;  %v5194_v48 = vld [vmem:[#allocation9 + $0x2] ss:$0 sm:$0xff]  ;;  %v1682_v36 = vld [vmem:[#allocation2 + $0xf9] sm:$0xff] }
 0x128   : > { %v1213_v33 = vadd.f32 %v1181_v51, %v1144_v15  ;;  %v937_v57 = vadd.f32 %v905_v41, %v868_v37  ;;  %v1114_v21 = vmul.f32 %v5046_v6, %v584_v32  ;;  %v1182_v17 = vmul.f32 %v5084_v29, %v623_v34  ;;  %v4074_v6 = vld [vmem:[#allocation11 + $0x8] sm:$0xff]   ;;  %v1692_v23 = vld [vmem:[#allocation2 + $0x1e9] sm:$0xff] }
 0x129   : > { %v938_v7 = vadd.f32 %v906_v60, %v869_v0  ;;  %v1183_v26 = vmul.f32 %v5084_v29, %v624_v46  ;;  %3927 = vmatpush3.bf16.msra.mxu1 %v4072_v3  ;;  %v5181_v29 = vld [vmem:[#allocation9] ss:$0 sm:$0xff]  ;;  %v1754_v11 = vmul.f32 %v5188_v43, %v1632_v14  ;;  %v1762_v5 = vmul.f32 %v5188_v43, %v1642_v56  ;;  %v1641_v0 = vld [vmem:[#allocation2 + $0xe0] sm:$0xff] }
 0x12a   : > { %v1230_v62 = vpack.c.bf16 %v1213_v33, %v1212_v49  ;;  %v1006_v54 = vadd.f32 %v974_v13, %v937_v57  ;;  %3928 = vmatprep.subr.bf16.mxu1 %v4073_v42  ;;  %v1717_v2 = vmul.f32 %v5173_v35, %v5181_v29  ;;  %v1770_v52 = vmul.f32 %v5188_v43, %v1652_v53  ;;  %v5204_v13 = vld [vmem:[#allocation9 + $0x5] ss:$0 sm:$0xff]  ;;  %v5206_v49 = vld [vmem:[#allocation9 + $0x9] ss:$0 sm:$0xff]  ;;  %v5208_v57 = vld [vmem:[#allocation9 + $0x8] ss:$0 sm:$0xff] }
 0x12b   : > { %v1007_v55 = vadd.f32 %v975_v38, %v938_v7  ;;  %v1823_v51 = vmul.f32 %v5194_v48, %v1672_v30  ;;  %v1831_v47 = vmul.f32 %v5194_v48, %v1682_v36  ;;  %v1839_v8 = vmul.f32 %v5194_v48, %v1692_v23  ;;  %v1681_v38 = vld [vmem:[#allocation2 + $0xe1] sm:$0xff]  ;;  %v5210_v7 = vld [vmem:[#allocation9 + $0xa] ss:$0 sm:$0xff] }
 0x12c   : > { %3914 = vmatprep.mubr.bf16.mxu0 %v1230_v62  ;;  %v1076_v59 = vadd.f32 %v1044_v12, %v1006_v54  ;;  %v1786_v40 = vadd.f32 %v1754_v11, %v1717_v2  ;;  %v1794_v24 = vadd.f32 %v1762_v5, %v1717_v2  ;;  %v1802_v50 = vadd.f32 %v1770_v52, %v1717_v2  ;;  %v1651_v12 = vld [vmem:[#allocation2 + $0x1d0] sm:$0xff] }
 0x12d   : > { %v1077_v1 = vadd.f32 %v1045_v16, %v1007_v55  ;;  %3929 = vmatpush3.bf16.msra.mxu1 %v4073_v42  ;;  %v5214_v16 = vmul.f32 %v5173_v35, %v5208_v57  ;;  %v5219_v54 = vmul.f32 %v5206_v49, %v1641_v0 }
 0x12e   : > { %v1145_v58 = vadd.f32 %v1113_v4, %v1076_v59  ;;  %3930 = vmatprep.subr.bf16.mxu1 %v4074_v6  ;;  %v1855_v44 = vadd.f32 %v1823_v51, %v1786_v40  ;;  %v5216_v62 = vadd.f32 %v1831_v47, %v1794_v24  ;;  %v5222_v4 = vmul.f32 %v5210_v7, %v1681_v38 }
 0x12f   : > { %v1146_v61 = vadd.f32 %v1114_v21, %v1077_v1  ;;  %v5224_v55 = vadd.f32 %v1839_v8, %v1802_v50 }
 0x130   : > { %v1214_v20 = vadd.f32 %v1182_v17, %v1145_v58  ;;  %v5234_v17 = vmul.f32 %v5206_v49, %v1651_v12 }
 0x131   : > { %v1215_v18 = vadd.f32 %v1183_v26, %v1146_v61  ;;  %3931 = vmatpush3.bf16.msra.mxu1 %v4074_v6  ;;  %v5237_v61 = vld [vmem:[#allocation9 + $0x4] ss:$0 sm:$0xff] }
 0x132   : > { %3932 = vmatprep.subr.bf16.mxu1 %v4075_v19 }
 0x133   : > { %v1231_v45 = vpack.c.bf16 %v1215_v18, %v1214_v20 }
 0x135   : > { %3915 = vmatmul.mubr.bf16.gmra.mxu0 %v1231_v45  ;;  %3933 = vmatpush3.bf16.msra.mxu1 %v4075_v19  ;;  %v5249_v19 = vld [vmem:[#allocation9 + $0x6] ss:$0 sm:$0xff] }
 0x17d   : > { %v3888_v22 = vpop.f32.mrf.mxu0 }
 0x17e   : > { %v1346_v28 = vadd.f32 %v3888_v22, %v5186_v39 }
 0x17f   : > { %v1337_v31 = vpop.f32.mrf.mxu0 }
 0x180   : > { %vm1466_vm0 = vcmp.gt.f32.partialorder %v1346_v28, 0.0  ;;  %v1498_v9 = vmul.f32 0.01, %v1346_v28  ;;  %v1338_v63 = vadd.f32 %v5186_v39, %v1337_v31 }
 0x181   : > { %v3889_v27 = vpop.f32.mrf.mxu0 }
 0x182   : > { %v1530_v34 = vsel %vm1466_vm0, %v1346_v28, %v1498_v9  ;;  %vm1464_vm1 = vcmp.gt.f32.partialorder %v1338_v63, 0.0  ;;  %v1496_v10 = vmul.f32 0.01, %v1338_v63  ;;  %v1349_v25 = vadd.f32 %v3889_v27, %v5186_v39 }
 0x183   : > { %1562 = vst [vmem:[#allocation2 + $0x50] sm:$0xff] %v1530_v34  ;;  %v1340_v41 = vpop.f32.mrf.mxu0  ;;  %v1757_v21 = vmul.f32 %v5188_v43, %v1530_v34  ;;  %v5228_v59 = vmul.f32 %v5204_v13, %v1530_v34  ;;  %v5231_v35 = vmul.f32 %v5206_v49, %v1530_v34 }
 0x184   : > { %v1528_v60 = vsel %vm1464_vm1, %v1338_v63, %v1496_v10  ;;  %vm1467_vm2 = vcmp.gt.f32.partialorder %v1349_v25, 0.0  ;;  %v1499_v15 = vmul.f32 0.01, %v1349_v25  ;;  %v1341_v37 = vadd.f32 %v5186_v39, %v1340_v41 }
 0x185   : > { %1560 = vst [vmem:[#allocation2 + $0x20] sm:$0xff] %v1528_v60  ;;  %v1755_v58 = vmul.f32 %v5188_v43, %v1528_v60  ;;  %v1962_v20 = vmul.f32 %v5204_v13, %v1528_v60 }
 0x186   : > { %v1531_v33 = vsel %vm1467_vm2, %v1349_v25, %v1499_v15  ;;  %vm1465_vm3 = vcmp.gt.f32.partialorder %v1341_v37, 0.0  ;;  %v1497_v32 = vmul.f32 0.01, %v1341_v37 }
 0x187   : > { %1563 = vst [vmem:[#allocation2 + $0x68] sm:$0xff] %v1531_v33  ;;  %v5241_v18 = vmul.f32 %v5188_v43, %v1531_v33  ;;  %v5244_v45 = vmul.f32 %v5204_v13, %v1531_v33  ;;  %v5252_v14 = vmul.f32 %v5206_v49, %v1531_v33 }
 0x188   : > { %v1529_v46 = vsel %vm1465_vm3, %v1341_v37, %v1497_v32 }
 0x189   : > { %1561 = vst [vmem:[#allocation2 + $0x38] sm:$0xff] %v1529_v46  ;;  %v1756_v42 = vmul.f32 %v5188_v43, %v1529_v46  ;;  %v1963_v6 = vmul.f32 %v5204_v13, %v1529_v46  ;;  %v5259_v11 = vmul.f32 %v5206_v49, %v1529_v46 }
 0x18a   : > { %v1595_v1 = vld [vmem:[#allocation2 + $0x4f] sm:$0xff] }
 0x18b   : > { %v1675_v26 = vld [vmem:[#allocation2 + $0x51] sm:$0xff]  ;;  %v1720_v3 = vmul.f32 %v5181_v29, %v1595_v1  ;;  %v5256_v2 = vmul.f32 %v5208_v57, %v1595_v1  ;;  %v1895_v9 = vmul.f32 %v5237_v61, %v1595_v1 }
 0x18c   : > { %v1593_v56 = vld [vmem:[#allocation2 + $0x1f] sm:$0xff]  ;;  %v1826_v22 = vmul.f32 %v5194_v48, %v1675_v26  ;;  %v5262_v28 = vmul.f32 %v5210_v7, %v1675_v26  ;;  %v5271_v51 = vmul.f32 %v5249_v19, %v1675_v26 }
 0x18d   : > { %v1673_v53 = vld [vmem:[#allocation2 + $0x21] sm:$0xff]  ;;  %v3892_v30 = vpop.f32.mrf.mxu0  ;;  %v1718_v31 = vmul.f32 %v5181_v29, %v1593_v56  ;;  %v1789_v5 = vadd.f32 %v1757_v21, %v1720_v3  ;;  %v1893_v52 = vmul.f32 %v5237_v61, %v1593_v56 }
 0x18e   : > { %v1362_v63 = vadd.f32 %v3892_v30, %v5186_v39  ;;  %v1824_v36 = vmul.f32 %v5194_v48, %v1673_v53  ;;  %v2031_v23 = vmul.f32 %v5249_v19, %v1673_v53  ;;  %v1596_v27 = vld [vmem:[#allocation2 + $0x67] sm:$0xff] }
 0x18f   : > { %v1676_v40 = vld [vmem:[#allocation2 + $0x69] sm:$0xff]  ;;  %v1353_v34 = vpop.f32.mrf.mxu0  ;;  %v1787_v10 = vadd.f32 %v1755_v58, %v1718_v31  ;;  %v1925_v25 = vadd.f32 %v1893_v52, %v1855_v44  ;;  %v1858_v41 = vadd.f32 %v1826_v22, %v1789_v5  ;;  %v1896_v24 = vmul.f32 %v5237_v61, %v1596_v27 }
 0x190   : > { %vm1470_vm4 = vcmp.gt.f32.partialorder %v1362_v63, 0.0  ;;  %v1502_v47 = vmul.f32 0.01, %v1362_v63  ;;  %v1354_v50 = vadd.f32 %v5186_v39, %v1353_v34  ;;  %v1594_v8 = vld [vmem:[#allocation2 + $0x37] sm:$0xff]  ;;  %v2034_v15 = vmul.f32 %v5249_v19, %v1676_v40 }
 0x191   : > { %v1674_v60 = vld [vmem:[#allocation2 + $0x39] sm:$0xff]  ;;  %v3893_v37 = vpop.f32.mrf.mxu0  ;;  %v1719_v0 = vmul.f32 %v5181_v29, %v1594_v8  ;;  %v1856_v33 = vadd.f32 %v1824_v36, %v1787_v10  ;;  %v1894_v32 = vmul.f32 %v5237_v61, %v1594_v8  ;;  %v1994_v58 = vadd.f32 %v1962_v20, %v1925_v25 }
 0x192   : > { %v1825_v38 = vmul.f32 %v5194_v48, %v1674_v60  ;;  %v5279_v12 = vsel %vm1470_vm4, %v1362_v63, %v1502_v47  ;;  %vm1468_vm5 = vcmp.gt.f32.partialorder %v1354_v50, 0.0  ;;  %v1500_v44 = vmul.f32 0.01, %v1354_v50 }
 0x193   : > { %v1365_v46 = vadd.f32 %v3893_v37, %v5186_v39  ;;  %1566 = vst [vmem:[#allocation2 + $0xb0] sm:$0xff] %v5279_v12  ;;  %v1356_v21 = vpop.f32.mrf.mxu0  ;;  %v1788_v1 = vadd.f32 %v1756_v42, %v1719_v0  ;;  %v1926_v26 = vadd.f32 %v1894_v32, %v1856_v33  ;;  %v2032_v3 = vmul.f32 %v5249_v19, %v1674_v60 }
 0x194   : > { %v1532_v56 = vsel %vm1468_vm5, %v1354_v50, %v1500_v44  ;;  %v1357_v22 = vadd.f32 %v5186_v39, %v1356_v21  ;;  %v2063_v31 = vadd.f32 %v2031_v23, %v1994_v58  ;;  %v2101_v5 = vmul.f32 %v5208_v57, %v1594_v8 }
 0x195   : > { %vm1471_vm6 = vcmp.gt.f32.partialorder %v1365_v46, 0.0  ;;  %v1503_v53 = vmul.f32 0.01, %v1365_v46  ;;  %1564 = vst [vmem:[#allocation2 + $0x80] sm:$0xff] %v1532_v56  ;;  %v1995_v30 = vadd.f32 %v1963_v6, %v1926_v26  ;;  %v2239_v52 = vmul.f32 %v5210_v7, %v1674_v60 }
 0x196   : > { %vm1469_vm7 = vcmp.gt.f32.partialorder %v1357_v22, 0.0  ;;  %v1501_v42 = vmul.f32 0.01, %v1357_v22  ;;  %v1759_v20 = vmul.f32 %v5188_v43, %v1532_v56  ;;  %v2133_v34 = vadd.f32 %v2101_v5, %v2063_v31 }
 0x197   : > { %v5287_v63 = vsel %vm1471_vm6, %v1365_v46, %v1503_v53  ;;  %v2064_v36 = vadd.f32 %v2032_v3, %v1995_v30  ;;  %v1857_v10 = vadd.f32 %v1825_v38, %v1788_v1  ;;  %v1928_v25 = vadd.f32 %v1896_v24, %v1858_v41 }
 0x198   : > { %1567 = vst [vmem:[#allocation2 + $0xc8] sm:$0xff] %v5287_v63  ;;  %v1533_v47 = vsel %vm1469_vm7, %v1357_v22, %v1501_v42  ;;  %v2103_v6 = vmul.f32 %v5208_v57, %v1596_v27  ;;  %v2173_v23 = vmul.f32 %v5206_v49, %v1532_v56  ;;  %v2241_v50 = vmul.f32 %v5210_v7, %v1676_v40 }
 0x199   : > { %1565 = vst [vmem:[#allocation2 + $0x98] sm:$0xff] %v1533_v47  ;;  %v2134_v8 = vadd.f32 %v5256_v2, %v2064_v36  ;;  %v2202_v60 = vadd.f32 %v5259_v11, %v2133_v34  ;;  %v1927_v37 = vadd.f32 %v1895_v9, %v1857_v10  ;;  %v1997_v0 = vadd.f32 %v5244_v45, %v1928_v25 }
 0x19a   : > { %v5297_v33 = vld [vmem:[#allocation2 + $0xaf] sm:$0xff]  ;;  %v1721_v38 = vmul.f32 %v5181_v29, %v1596_v27  ;;  %v5301_v41 = vmul.f32 %v5188_v43, %v1533_v47  ;;  %v5305_v24 = vmul.f32 %v5188_v43, %v5279_v12  ;;  %v1827_v32 = vmul.f32 %v5194_v48, %v1676_v40 }
 0x19b   : > { %v2203_v2 = vadd.f32 %v5231_v35, %v2134_v8  ;;  %v2271_v44 = vadd.f32 %v2239_v52, %v2202_v60  ;;  %v1996_v11 = vadd.f32 %v5228_v59, %v1927_v37  ;;  %v2066_v9 = vadd.f32 %v2034_v15, %v1997_v0 }
 0x19c   : > { %v1597_v45 = vld [vmem:[#allocation2 + $0x7f] sm:$0xff]  ;;  %v1790_v21 = vadd.f32 %v5241_v18, %v1721_v38  ;;  %v1966_v27 = vmul.f32 %v5204_v13, %v1532_v56  ;;  %v1967_v1 = vmul.f32 %v5204_v13, %v1533_v47  ;;  %v5315_v26 = vmul.f32 %v5208_v57, %v5297_v33 }
 0x19d   : > { %v1677_v46 = vld [vmem:[#allocation2 + $0x81] sm:$0xff]  ;;  %v2272_v40 = vadd.f32 %v5262_v28, %v2203_v2  ;;  %v2065_v35 = vadd.f32 %v5271_v51, %v1996_v11  ;;  %v2104_v58 = vmul.f32 %v5208_v57, %v1597_v45  ;;  %v1722_v3 = vmul.f32 %v5181_v29, %v1597_v45 }
 0x19e   : > { %v2242_v59 = vmul.f32 %v5210_v7, %v1677_v46  ;;  %v3896_v15 = vpop.f32.mrf.mxu0  ;;  %v1828_v18 = vmul.f32 %v5194_v48, %v1677_v46  ;;  %v1859_v56 = vadd.f32 %v1827_v32, %v1790_v21  ;;  %v1897_v53 = vmul.f32 %v5237_v61, %v1597_v45 }
 0x19f   : > { %v1378_v22 = vadd.f32 %v3896_v15, %v5186_v39  ;;  %v2303_v30 = vpack.c.bf16 %v2272_v40, %v2271_v44  ;;  %v2135_v31 = vadd.f32 %v2103_v6, %v2065_v35  ;;  %v2136_v5 = vadd.f32 %v2104_v58, %v2066_v9 }
 0x1a0   : > { %v1369_v28 = vpop.f32.mrf.mxu0  ;;  %v1598_v52 = vld [vmem:[#allocation2 + $0x97] sm:$0xff]  ;;  %v1791_v51 = vadd.f32 %v1759_v20, %v1722_v3  ;;  %v1929_v42 = vadd.f32 %v1897_v53, %v1859_v56  ;;  %v2035_v36 = vmul.f32 %v5249_v19, %v1677_v46  ;;  %v2174_v34 = vmul.f32 %v5206_v49, %v1533_v47 }
 0x1a1   : > { %vm1474_vm8 = vcmp.gt.f32.partialorder %v1378_v22, 0.0  ;;  %v1506_v10 = vmul.f32 0.01, %v1378_v22  ;;  %v1370_v25 = vadd.f32 %v5186_v39, %v1369_v28  ;;  %3934 = vmatprep.mubr.bf16.mxu1 %v2303_v30  ;;  %v2204_v8 = vadd.f32 %v5252_v14, %v2135_v31  ;;  %v1678_v60 = vld [vmem:[#allocation2 + $0x99] sm:$0xff] }
 0x1a2   : > { %v3897_v37 = vpop.f32.mrf.mxu0  ;;  %v2205_v0 = vadd.f32 %v2173_v23, %v2136_v5  ;;  %v1860_v6 = vadd.f32 %v1828_v18, %v1791_v51  ;;  %v1898_v38 = vmul.f32 %v5237_v61, %v1598_v52  ;;  %v1998_v32 = vadd.f32 %v1966_v27, %v1929_v42  ;;  %v1679_v27 = vld [vmem:[#allocation2 + $0xb1] sm:$0xff] }
 0x1a3   : > { %v5330_v20 = vsel %vm1474_vm8, %v1378_v22, %v1506_v10  ;;  %vm1472_vm9 = vcmp.gt.f32.partialorder %v1370_v25, 0.0  ;;  %v1504_v2 = vmul.f32 0.01, %v1370_v25  ;;  %v1381_v47 = vadd.f32 %v3897_v37, %v5186_v39 }
 0x1a4   : > { %1570 = vst [vmem:[#allocation2 + $0x140] sm:$0xff] %v5330_v20  ;;  %v1372_v44 = vpop.f32.mrf.mxu0  ;;  %v2273_v11 = vadd.f32 %v2241_v50, %v2204_v8  ;;  %v2274_v9 = vadd.f32 %v2242_v59, %v2205_v0  ;;  %v1930_v45 = vadd.f32 %v1898_v38, %v1860_v6  ;;  %v2036_v14 = vmul.f32 %v5249_v19, %v1678_v60 }
 0x1a5   : > { %v5335_v46 = vsel %vm1472_vm9, %v1370_v25, %v1504_v2  ;;  %vm1475_vm10 = vcmp.gt.f32.partialorder %v1381_v47, 0.0  ;;  %v1507_v23 = vmul.f32 0.01, %v1381_v47  ;;  %v1373_v21 = vadd.f32 %v5186_v39, %v1372_v44 }
 0x1a6   : > { %1568 = vst [vmem:[#allocation2 + $0x110] sm:$0xff] %v5335_v46  ;;  %v2304_v40 = vpack.c.bf16 %v2274_v9, %v2273_v11  ;;  %v1999_v35 = vadd.f32 %v1967_v1, %v1930_v45  ;;  %v2067_v58 = vadd.f32 %v2035_v36, %v1998_v32  ;;  %v2105_v15 = vmul.f32 %v5208_v57, %v1598_v52  ;;  %v1600_v1 = vld [vmem:[#allocation2 + $0xc7] sm:$0xff] }
 0x1a7   : > { %v5340_v3 = vsel %vm1475_vm10, %v1381_v47, %v1507_v23  ;;  %vm1473_vm11 = vcmp.gt.f32.partialorder %v1373_v21, 0.0  ;;  %v1505_v50 = vmul.f32 0.01, %v1373_v21  ;;  %v2175_v59 = vmul.f32 %v5206_v49, %v5279_v12  ;;  %v1680_v36 = vld [vmem:[#allocation2 + $0xc9] sm:$0xff] }
 0x1a8   : > { %1571 = vst [vmem:[#allocation2 + $0x158] sm:$0xff] %v5340_v3  ;;  %3935 = vmatmul.mubr.bf16.vlgmr.msra.gmra.mxu1 %v2304_v40  ;;  %v2068_v18 = vadd.f32 %v2036_v14, %v1999_v35  ;;  %v2137_v56 = vadd.f32 %v2105_v15, %v2067_v58  ;;  %v2243_v53 = vmul.f32 %v5210_v7, %v1678_v60 }
 0x1a9   : > { %v2244_v22 = vmul.f32 %v5210_v7, %v1679_v27  ;;  %v5347_v30 = vsel %vm1473_vm11, %v1373_v21, %v1505_v50  ;;  %v1723_v31 = vmul.f32 %v5181_v29, %v1598_v52  ;;  %v1724_v5 = vmul.f32 %v5181_v29, %v5297_v33 }
 0x1aa   : > { %v1829_v28 = vmul.f32 %v5194_v48, %v1678_v60  ;;  %1569 = vst [vmem:[#allocation2 + $0x128] sm:$0xff] %v5347_v30  ;;  %v2138_v51 = vadd.f32 %v5315_v26, %v2068_v18  ;;  %v2206_v42 = vadd.f32 %v2174_v34, %v2137_v56  ;;  %v1830_v10 = vmul.f32 %v5194_v48, %v1679_v27 }
 0x1ab   : > { %v1899_v25 = vmul.f32 %v5237_v61, %v5297_v33  ;;  %v1792_v8 = vadd.f32 %v5301_v41, %v1723_v31  ;;  %v1793_v52 = vadd.f32 %v5305_v24, %v1724_v5  ;;  %v1900_v37 = vmul.f32 %v5237_v61, %v1600_v1 }
 0x1ac   : > { %v1968_v60 = vmul.f32 %v5204_v13, %v5279_v12  ;;  %v2207_v0 = vadd.f32 %v2175_v59, %v2138_v51  ;;  %v2275_v6 = vadd.f32 %v2243_v53, %v2206_v42  ;;  %v1969_v26 = vmul.f32 %v5204_v13, %v5287_v63 }
 0x1ad   : > { %v2037_v34 = vmul.f32 %v5249_v19, %v1679_v27  ;;  %v1861_v38 = vadd.f32 %v1829_v28, %v1792_v8  ;;  %v1862_v32 = vadd.f32 %v1830_v10, %v1793_v52  ;;  %v2038_v33 = vmul.f32 %v5249_v19, %v1680_v36  ;;  %v1603_v2 = vld [vmem:[#allocation2 + $0x10f] sm:$0xff] }
 0x1ae   : > { %v2107_v41 = vmul.f32 %v5208_v57, %v1600_v1  ;;  %v1683_v24 = vld [vmem:[#allocation2 + $0x111] sm:$0xff]  ;;  %v2276_v47 = vadd.f32 %v2244_v22, %v2207_v0  ;;  %v2176_v44 = vmul.f32 %v5206_v49, %v5287_v63  ;;  %v2245_v12 = vmul.f32 %v5210_v7, %v1680_v36 }
 0x1af   : > { %v1726_v11 = vmul.f32 %v5181_v29, %v1603_v2  ;;  %v1931_v9 = vadd.f32 %v1899_v25, %v1861_v38  ;;  %v1932_v45 = vadd.f32 %v1900_v37, %v1862_v32  ;;  %v1763_v14 = vmul.f32 %v5188_v43, %v5335_v46 }
 0x1b0   : > { %v5376_v23 = vmul.f32 %v5188_v43, %v5347_v30  ;;  %v3900_v21 = vpop.f32.mrf.mxu0  ;;  %v2305_v27 = vpack.c.bf16 %v2276_v47, %v2275_v6  ;;  %v5380_v40 = vmul.f32 %v5188_v43, %v5330_v20  ;;  %v1832_v63 = vmul.f32 %v5194_v48, %v1683_v24 }
 0x1b1   : > { %v1901_v35 = vmul.f32 %v5237_v61, %v1603_v2  ;;  %v1394_v58 = vadd.f32 %v3900_v21, %v5186_v39  ;;  %v2000_v15 = vadd.f32 %v1968_v60, %v1931_v9  ;;  %v2001_v50 = vadd.f32 %v1969_v26, %v1932_v45  ;;  %v1604_v59 = vld [vmem:[#allocation2 + $0x127] sm:$0xff]  ;;  %v1605_v2 = vld [vmem:[#allocation2 + $0x13f] sm:$0xff] }
 0x1b2   : > { %v1795_v18 = vadd.f32 %v1763_v14, %v1726_v11  ;;  %v1385_v56 = vpop.f32.mrf.mxu0  ;;  %3938 = vmatprep.mubr.bf16.mxu1 %v2305_v27  ;;  %v1902_v53 = vmul.f32 %v5237_v61, %v1604_v59  ;;  %v1970_v1 = vmul.f32 %v5204_v13, %v5335_v46  ;;  %v1971_v31 = vmul.f32 %v5204_v13, %v5347_v30  ;;  %v1684_v42 = vld [vmem:[#allocation2 + $0x129] sm:$0xff]  ;;  %v1685_v14 = vld [vmem:[#allocation2 + $0x141] sm:$0xff] }
 0x1b3   : > { %v1933_v22 = vadd.f32 %v1901_v35, %v5216_v62  ;;  %vm1478_vm12 = vcmp.gt.f32.partialorder %v1394_v58, 0.0  ;;  %v1510_v5 = vmul.f32 0.01, %v1394_v58  ;;  %v1386_v28 = vadd.f32 %v5186_v39, %v1385_v56 }
 0x1b4   : > { %v2069_v51 = vadd.f32 %v2037_v34, %v2000_v15  ;;  %v3901_v36 = vpop.f32.mrf.mxu0  ;;  %v2070_v10 = vadd.f32 %v2038_v33, %v2001_v50  ;;  %v1864_v25 = vadd.f32 %v1832_v63, %v1795_v18  ;;  %v2039_v52 = vmul.f32 %v5249_v19, %v1683_v24 }
 0x1b5   : > { %v2002_v8 = vadd.f32 %v1970_v1, %v1933_v22  ;;  %v5393_v37 = vsel %vm1478_vm12, %v1394_v58, %v1510_v5  ;;  %vm1476_vm13 = vcmp.gt.f32.partialorder %v1386_v28, 0.0  ;;  %v1508_v62 = vmul.f32 0.01, %v1386_v28  ;;  %v1606_v22 = vld [vmem:[#allocation2 + $0x157] sm:$0xff] }
 0x1b6   : > { %v1397_v46 = vadd.f32 %v3901_v36, %v5186_v39  ;;  %1574 = vst [vmem:[#allocation2 + $0x1a0] sm:$0xff] %v5393_v37  ;;  %v1388_v60 = vpop.f32.mrf.mxu0  ;;  %v2139_v0 = vadd.f32 %v2107_v41, %v2069_v51  ;;  %v2140_v6 = vadd.f32 %v5214_v16, %v2070_v10  ;;  %v1934_v26 = vadd.f32 %v1902_v53, %v1864_v25 }
 0x1b7   : > { %v2040_v34 = vmul.f32 %v5249_v19, %v1684_v42  ;;  %v5399_v38 = vsel %vm1476_vm13, %v1386_v28, %v1508_v62  ;;  %v1389_v33 = vadd.f32 %v5186_v39, %v1388_v60  ;;  %v2071_v9 = vadd.f32 %v2039_v52, %v2002_v8  ;;  %v5423_v28 = vld [vmem:[#allocation2 + $0x159] sm:$0xff] }
 0x1b8   : > { %vm1479_vm14 = vcmp.gt.f32.partialorder %v1397_v46, 0.0  ;;  %v1511_v32 = vmul.f32 0.01, %v1397_v46  ;;  %1572 = vst [vmem:[#allocation2 + $0x170] sm:$0xff] %v5399_v38  ;;  %v2208_v24 = vadd.f32 %v2176_v44, %v2139_v0  ;;  %v2209_v47 = vadd.f32 %v5219_v54, %v2140_v6 }
 0x1b9   : > { %v2003_v11 = vadd.f32 %v1971_v31, %v1934_v26  ;;  %vm1477_vm15 = vcmp.gt.f32.partialorder %v1389_v33, 0.0  ;;  %v1509_v45 = vmul.f32 0.01, %v1389_v33  ;;  %v2109_v21 = vmul.f32 %v5208_v57, %v1604_v59 }
 0x1ba   : > { %v5404_v41 = vsel %vm1479_vm14, %v1397_v46, %v1511_v32  ;;  %v2277_v27 = vadd.f32 %v2245_v12, %v2208_v24  ;;  %v2278_v63 = vadd.f32 %v5222_v4, %v2209_v47  ;;  %v2110_v58 = vmul.f32 %v5208_v57, %v1605_v2 }
 0x1bb   : > { %1575 = vst [vmem:[#allocation2 + $0x1b8] sm:$0xff] %v5404_v41  ;;  %v2072_v35 = vadd.f32 %v2040_v34, %v2003_v11  ;;  %v5410_v44 = vsel %vm1477_vm15, %v1389_v33, %v1509_v45  ;;  %v2141_v54 = vadd.f32 %v2109_v21, %v2071_v9  ;;  %v2178_v15 = vmul.f32 %v5206_v49, %v5347_v30 }
 0x1bc   : > { %v2179_v50 = vmul.f32 %v5206_v49, %v5330_v20  ;;  %1573 = vst [vmem:[#allocation2 + $0x188] sm:$0xff] %v5410_v44  ;;  %v2306_v18 = vpack.c.bf16 %v2278_v63, %v2277_v27  ;;  %v2247_v12 = vmul.f32 %v5210_v7, %v1684_v42  ;;  %v2248_v4 = vmul.f32 %v5210_v7, %v1685_v14 }
 0x1bd   : > { %v2142_v56 = vadd.f32 %v2110_v58, %v2072_v35  ;;  %v2210_v53 = vadd.f32 %v2178_v15, %v2141_v54  ;;  %v1727_v1 = vmul.f32 %v5181_v29, %v1604_v59  ;;  %v1728_v31 = vmul.f32 %v5181_v29, %v1605_v2 }
 0x1be   : > { %v1766_v30 = vmul.f32 %v5188_v43, %v5340_v3  ;;  %3939 = vmatmul.mubr.bf16.gmra.mxu1 %v2306_v18  ;;  %v1767_v51 = vmul.f32 %v5188_v43, %v5399_v38  ;;  %v1833_v36 = vmul.f32 %v5194_v48, %v1684_v42  ;;  %v1834_v10 = vmul.f32 %v5194_v48, %v1685_v14 }
 0x1bf   : > { %v2211_v5 = vadd.f32 %v2179_v50, %v2142_v56  ;;  %v2279_v25 = vadd.f32 %v2247_v12, %v2210_v53  ;;  %v5429_v8 = vld [vmem:[#allocation2 + $0x16f] sm:$0xff]  ;;  %v1796_v59 = vadd.f32 %v5376_v23, %v1727_v1  ;;  %v1797_v52 = vadd.f32 %v5380_v40, %v1728_v31 }
 0x1c0   : > { %v1903_v62 = vmul.f32 %v5237_v61, %v1605_v2  ;;  %v1904_v60 = vmul.f32 %v5237_v61, %v1606_v22  ;;  %v1972_v0 = vmul.f32 %v5204_v13, %v5330_v20  ;;  %v1973_v42 = vmul.f32 %v5204_v13, %v5340_v3  ;;  %v1687_v2 = vld [vmem:[#allocation2 + $0x171] sm:$0xff] }
 0x1c1   : > { %v2280_v46 = vadd.f32 %v2248_v4, %v2211_v5  ;;  %v3904_v6 = vpop.f32.mrf.mxu0  ;;  %v1865_v26 = vadd.f32 %v1833_v36, %v1796_v59  ;;  %v1866_v34 = vadd.f32 %v1834_v10, %v1797_v52  ;;  %v2041_v32 = vmul.f32 %v5249_v19, %v1685_v14 }
 0x1c2   : > { %v2042_v23 = vmul.f32 %v5249_v19, %v5423_v28  ;;  %v1410_v40 = vadd.f32 %v3904_v6, %v5186_v39  ;;  %v2111_v24 = vmul.f32 %v5208_v57, %v1606_v22  ;;  %v2112_v20 = vmul.f32 %v5208_v57, %v5429_v8 }
 0x1c3   : > { %v2307_v33 = vpack.c.bf16 %v2280_v46, %v2279_v25  ;;  %v1401_v47 = vpop.f32.mrf.mxu0  ;;  %v1935_v11 = vadd.f32 %v1903_v62, %v1865_v26  ;;  %v1936_v9 = vadd.f32 %v1904_v60, %v1866_v34  ;;  %v2180_v45 = vmul.f32 %v5206_v49, %v5340_v3  ;;  %v1608_v59 = vld [vmem:[#allocation2 + $0x187] sm:$0xff] }
 0x1c4   : > { %v2181_v14 = vmul.f32 %v5206_v49, %v5399_v38  ;;  %vm1482_vm0 = vcmp.gt.f32.partialorder %v1410_v40, 0.0  ;;  %v1514_v21 = vmul.f32 0.01, %v1410_v40  ;;  %v1402_v27 = vadd.f32 %v5186_v39, %v1401_v47  ;;  %v1688_v26 = vld [vmem:[#allocation2 + $0x189] sm:$0xff]  ;;  %v1689_v47 = vld [vmem:[#allocation2 + $0x1a1] sm:$0xff] }
 0x1c5   : > { %3942 = vmatprep.mubr.bf16.mxu1 %v2307_v33  ;;  %v2249_v63 = vmul.f32 %v5210_v7, %v5423_v28  ;;  %v3905_v35 = vpop.f32.mrf.mxu0  ;;  %v2004_v58 = vadd.f32 %v1972_v0, %v1935_v11  ;;  %v2005_v54 = vadd.f32 %v1973_v42, %v1936_v9  ;;  %v2250_v15 = vmul.f32 %v5210_v7, %v1687_v2 }
 0x1c6   : > { %v1729_v50 = vmul.f32 %v5181_v29, %v1606_v22  ;;  %v5455_v18 = vsel %vm1482_vm0, %v1410_v40, %v1514_v21  ;;  %vm1480_vm1 = vcmp.gt.f32.partialorder %v1402_v27, 0.0  ;;  %v1512_v3 = vmul.f32 0.01, %v1402_v27  ;;  %v1609_v40 = vld [vmem:[#allocation2 + $0x19f] sm:$0xff] }
 0x1c7   : > { %v1413_v56 = vadd.f32 %v3905_v35, %v5186_v39  ;;  %1578 = vst [vmem:[#allocation2 + $0x230] sm:$0xff] %v5455_v18  ;;  %v1404_v12 = vpop.f32.mrf.mxu0  ;;  %v2073_v4 = vadd.f32 %v2041_v32, %v2004_v58  ;;  %v2074_v53 = vadd.f32 %v2042_v23, %v2005_v54  ;;  %v1730_v1 = vmul.f32 %v5181_v29, %v5429_v8  ;;  %v5489_v58 = vld [vmem:[#allocation2 + $0x1b7] sm:$0xff] }
 0x1c8   : > { %v1768_v31 = vmul.f32 %v5188_v43, %v5410_v44  ;;  %v5463_v5 = vsel %vm1480_vm1, %v1402_v27, %v1512_v3  ;;  %v1405_v36 = vadd.f32 %v5186_v39, %v1404_v12  ;;  %v1769_v52 = vmul.f32 %v5188_v43, %v5393_v37 }
 0x1c9   : > { %vm1483_vm2 = vcmp.gt.f32.partialorder %v1413_v56, 0.0  ;;  %v1515_v22 = vmul.f32 0.01, %v1413_v56  ;;  %1576 = vst [vmem:[#allocation2 + $0x200] sm:$0xff] %v5463_v5  ;;  %v2143_v10 = vadd.f32 %v2111_v24, %v2073_v4  ;;  %v2144_v25 = vadd.f32 %v2112_v20, %v2074_v53 }
 0x1ca   : > { %v1798_v62 = vadd.f32 %v1766_v30, %v1729_v50  ;;  %vm1481_vm3 = vcmp.gt.f32.partialorder %v1405_v36, 0.0  ;;  %v1513_v60 = vmul.f32 0.01, %v1405_v36  ;;  %v1799_v0 = vadd.f32 %v1767_v51, %v1730_v1 }
 0x1cb   : > { %v5469_v46 = vsel %vm1483_vm2, %v1413_v56, %v1515_v22  ;;  %v2212_v42 = vadd.f32 %v2180_v45, %v2143_v10  ;;  %v2213_v6 = vadd.f32 %v2181_v14, %v2144_v25  ;;  %v1835_v34 = vmul.f32 %v5194_v48, %v5423_v28 }
 0x1cc   : > { %1579 = vst [vmem:[#allocation2 + $0x248] sm:$0xff] %v5469_v46  ;;  %v1836_v32 = vmul.f32 %v5194_v48, %v1687_v2  ;;  %v5475_v23 = vsel %vm1481_vm3, %v1405_v36, %v1513_v60  ;;  %v1905_v30 = vmul.f32 %v5237_v61, %v5429_v8  ;;  %v1906_v33 = vmul.f32 %v5237_v61, %v1608_v59 }
 0x1cd   : > { %v1974_v51 = vmul.f32 %v5204_v13, %v5399_v38  ;;  %1577 = vst [vmem:[#allocation2 + $0x218] sm:$0xff] %v5475_v23  ;;  %v2281_v24 = vadd.f32 %v2249_v63, %v2212_v42  ;;  %v2282_v20 = vadd.f32 %v2250_v15, %v2213_v6  ;;  %v1867_v11 = vadd.f32 %v1835_v34, %v1798_v62  ;;  %v1690_v62 = vld [vmem:[#allocation2 + $0x1b9] sm:$0xff] }
 0x1ce   : > { %v1868_v28 = vadd.f32 %v1836_v32, %v1799_v0  ;;  %v1975_v9 = vmul.f32 %v5204_v13, %v5410_v44  ;;  %v2043_v45 = vmul.f32 %v5249_v19, %v1687_v2  ;;  %v2044_v14 = vmul.f32 %v5249_v19, %v1688_v26 }
 0x1cf   : > { %v2113_v8 = vmul.f32 %v5208_v57, %v1608_v59  ;;  %v2308_v21 = vpack.c.bf16 %v2282_v20, %v2281_v24  ;;  %v1937_v27 = vadd.f32 %v1905_v30, %v1867_v11  ;;  %v2114_v38 = vmul.f32 %v5208_v57, %v1609_v40 }
 0x1d0   : > { %v1938_v35 = vadd.f32 %v1906_v33, %v1868_v28  ;;  %v2182_v63 = vmul.f32 %v5206_v49, %v5410_v44  ;;  %v2183_v54 = vmul.f32 %v5206_v49, %v5393_v37  ;;  %v2251_v15 = vmul.f32 %v5210_v7, %v1688_v26 }
 0x1d1   : > { %v2252_v2 = vmul.f32 %v5210_v7, %v1689_v47  ;;  %3943 = vmatmul.mubr.bf16.gmra.mxu1 %v2308_v21  ;;  %v2006_v50 = vadd.f32 %v1974_v51, %v1937_v27  ;;  %v1731_v56 = vmul.f32 %v5181_v29, %v1608_v59  ;;  %v1732_v12 = vmul.f32 %v5181_v29, %v1609_v40 }
 0x1d2   : > { %v2007_v3 = vadd.f32 %v1975_v9, %v1938_v35  ;;  %v3908_v4 = vpop.f32.mrf.mxu0  ;;  %v1837_v53 = vmul.f32 %v5194_v48, %v1688_v26  ;;  %v1838_v1 = vmul.f32 %v5194_v48, %v1689_v47  ;;  %v1907_v44 = vmul.f32 %v5237_v61, %v1609_v40  ;;  %v1691_v9 = vld [vmem:[#allocation2 + $0x1d1] sm:$0xff] }
 0x1d3   : > { %v1908_v22 = vmul.f32 %v5237_v61, %v5489_v58  ;;  %v1426_v36 = vadd.f32 %v3908_v4, %v5186_v39  ;;  %v2075_v10 = vadd.f32 %v2043_v45, %v2006_v50  ;;  %v1800_v60 = vadd.f32 %v1768_v31, %v1731_v56  ;;  %v1613_v56 = vld [vmem:[#allocation2 + $0x1ff] sm:$0xff] }
 0x1d4   : > { %v2076_v25 = vadd.f32 %v2044_v14, %v2007_v3  ;;  %v1417_v0 = vpop.f32.mrf.mxu0  ;;  %v1801_v59 = vadd.f32 %v1769_v52, %v1732_v12  ;;  %v1976_v42 = vmul.f32 %v5204_v13, %v5393_v37  ;;  %v1977_v6 = vmul.f32 %v5204_v13, %v5404_v41 }
 0x1d5   : > { %v2045_v26 = vmul.f32 %v5249_v19, %v1689_v47  ;;  %vm1486_vm4 = vcmp.gt.f32.partialorder %v1426_v36, 0.0  ;;  %v1518_v34 = vmul.f32 0.01, %v1426_v36  ;;  %v1418_v32 = vadd.f32 %v5186_v39, %v1417_v0 }
 0x1d6   : > { %v2145_v40 = vadd.f32 %v2113_v8, %v2075_v10  ;;  %v3909_v30 = vpop.f32.mrf.mxu0  ;;  %v2146_v33 = vadd.f32 %v2114_v38, %v2076_v25  ;;  %v1869_v51 = vadd.f32 %v1837_v53, %v1800_v60  ;;  %v1870_v24 = vadd.f32 %v1838_v1, %v1801_v59  ;;  %v1694_v59 = vld [vmem:[#allocation2 + $0x219] sm:$0xff] }
 0x1d7   : > { %v2046_v31 = vmul.f32 %v5249_v19, %v1690_v62  ;;  %v5512_v52 = vsel %vm1486_vm4, %v1426_v36, %v1518_v34  ;;  %vm1484_vm5 = vcmp.gt.f32.partialorder %v1418_v32, 0.0  ;;  %v1516_v37 = vmul.f32 0.01, %v1418_v32 }
 0x1d8   : > { %v1429_v20 = vadd.f32 %v3909_v30, %v5186_v39  ;;  %1582 = vst [vmem:[#allocation2 + $0x290] sm:$0xff] %v5512_v52  ;;  %v1420_v47 = vpop.f32.mrf.mxu0  ;;  %v2214_v11 = vadd.f32 %v2182_v63, %v2145_v40  ;;  %v2215_v28 = vadd.f32 %v2183_v54, %v2146_v33  ;;  %v1939_v45 = vadd.f32 %v1907_v44, %v1869_v51  ;;  %v1614_v44 = vld [vmem:[#allocation2 + $0x217] sm:$0xff] }
 0x1d9   : > { %v1940_v14 = vadd.f32 %v1908_v22, %v1870_v24  ;;  %v5516_v8 = vsel %vm1484_vm5, %v1418_v32, %v1516_v37  ;;  %v1421_v27 = vadd.f32 %v5186_v39, %v1420_v47  ;;  %v2254_v54 = vmul.f32 %v5210_v7, %v1691_v9  ;;  %v1615_v32 = vld [vmem:[#allocation2 + $0x22f] sm:$0xff] }
 0x1da   : > { %vm1487_vm6 = vcmp.gt.f32.partialorder %v1429_v20, 0.0  ;;  %v1519_v21 = vmul.f32 0.01, %v1429_v20  ;;  %1580 = vst [vmem:[#allocation2 + $0x260] sm:$0xff] %v5516_v8  ;;  %v2283_v35 = vadd.f32 %v2251_v15, %v2214_v11  ;;  %v2284_v38 = vadd.f32 %v2252_v2, %v2215_v28  ;;  %v1693_v15 = vld [vmem:[#allocation2 + $0x201] sm:$0xff] }
 0x1db   : > { %v2008_v50 = vadd.f32 %v1976_v42, %v1939_v45  ;;  %v2009_v3 = vadd.f32 %v1977_v6, %v1940_v14  ;;  %vm1485_vm7 = vcmp.gt.f32.partialorder %v1421_v27, 0.0  ;;  %v1517_v63 = vmul.f32 0.01, %v1421_v27  ;;  %v5560_v45 = vld [vmem:[#allocation9] ss:$0 sm:$0xff] }
 0x1dc   : > { %v5520_v12 = vsel %vm1487_vm6, %v1429_v20, %v1519_v21  ;;  %v2309_v4 = vpack.c.bf16 %v2284_v38, %v2283_v35  ;;  %v2115_v39 = vmul.f32 %v5208_v57, %v5489_v58  ;;  %v2184_v22 = vmul.f32 %v5206_v49, %v5404_v41  ;;  %v5552_v20 = vld [vmem:[#allocation2 + $0x231] sm:$0xff]  ;;  %v5566_v21 = vld [vmem:[%s6309_s3] ss:$0 sm:$0xff] }
 0x1dd   : > { %1583 = vst [vmem:[#allocation2 + $0x2a8] sm:$0xff] %v5520_v12  ;;  %v2077_v53 = vadd.f32 %v2045_v26, %v2008_v50  ;;  %v2078_v1 = vadd.f32 %v2046_v31, %v2009_v3  ;;  %v5526_v2 = vsel %vm1485_vm7, %v1421_v27, %v1517_v63  ;;  %v1734_v36 = vmul.f32 %v5181_v29, %v1613_v56  ;;  %v5572_v50 = vld [vmem:[#allocation9 + $0x1] ss:$0 sm:$0xff]  ;;  %v5578_v63 = vld [vmem:[#allocation9 + $0x2] ss:$0 sm:$0xff] }
 0x1de   : > { %v1771_v10 = vmul.f32 %v5188_v43, %v5463_v5  ;;  %1581 = vst [vmem:[#allocation2 + $0x278] sm:$0xff] %v5526_v2  ;;  %3946 = vmatprep.mubr.bf16.mxu1 %v2309_v4  ;;  %v2253_v58 = vmul.f32 %v5210_v7, %v1690_v62  ;;  %v1772_v0 = vmul.f32 %v5188_v43, %v5475_v23 }
 0x1df   : > { %v2147_v25 = vadd.f32 %v2115_v39, %v2077_v53  ;;  %v2148_v60 = vadd.f32 %v5214_v16, %v2078_v1  ;;  %v1840_v41 = vmul.f32 %v5194_v48, %v1693_v15  ;;  %v1909_v29 = vmul.f32 %v5237_v61, %v1613_v56 }
 0x1e0   : > { %v1803_v42 = vadd.f32 %v1771_v10, %v1734_v36  ;;  %v1910_v6 = vmul.f32 %v5237_v61, %v1614_v44  ;;  %v1773_v40 = vmul.f32 %v5188_v43, %v5455_v18  ;;  %v1978_v62 = vmul.f32 %v5204_v13, %v5463_v5 }
 0x1e1   : > { %v2216_v26 = vadd.f32 %v2184_v22, %v2147_v25  ;;  %v2217_v34 = vadd.f32 %v5234_v17, %v2148_v60  ;;  %v1941_v33 = vadd.f32 %v1909_v29, %v5224_v55  ;;  %v1979_v48 = vmul.f32 %v5204_v13, %v5475_v23  ;;  %v1616_v60 = vld [vmem:[#allocation2 + $0x247] sm:$0xff] }
 0x1e2   : > { %v1872_v30 = vadd.f32 %v1840_v41, %v1803_v42  ;;  %v2047_v51 = vmul.f32 %v5249_v19, %v1693_v15  ;;  %v2048_v37 = vmul.f32 %v5249_v19, %v1694_v59  ;;  %v2117_v17 = vmul.f32 %v5208_v57, %v1614_v44 }
 0x1e3   : > { %v2285_v24 = vadd.f32 %v2253_v58, %v2216_v26  ;;  %v2286_v31 = vadd.f32 %v2254_v54, %v2217_v34  ;;  %v2010_v47 = vadd.f32 %v1978_v62, %v1941_v33  ;;  %v2118_v5 = vmul.f32 %v5208_v57, %v1615_v32 }
 0x1e4   : > { %v1942_v43 = vadd.f32 %v1910_v6, %v1872_v30  ;;  %v2186_v55 = vmul.f32 %v5206_v49, %v5475_v23  ;;  %v3912_v11 = vpop.f32.mrf.mxu0  ;;  %v2187_v13 = vmul.f32 %v5206_v49, %v5455_v18  ;;  %v2255_v9 = vmul.f32 %v5210_v7, %v1694_v59 }
 0x1e5   : > { %v2310_v28 = vpack.c.bf16 %v2286_v31, %v2285_v24  ;;  %v1735_v14 = vmul.f32 %v5560_v45, %v1614_v44  ;;  %v1442_v57 = vadd.f32 %v5566_v21, %v3912_v11  ;;  %v2079_v23 = vadd.f32 %v2047_v51, %v2010_v47  ;;  %v1617_v51 = vld [vmem:[#allocation2 + $0x25f] sm:$0xff]  ;;  %v5598_v24 = vld [vmem:[#allocation9 + $0x5] ss:$0 sm:$0xff] }
 0x1e6   : > { %v2011_v27 = vadd.f32 %v1979_v48, %v1942_v43  ;;  %v1736_v35 = vmul.f32 %v5560_v45, %v1615_v32  ;;  %v1433_v38 = vpop.f32.mrf.mxu0  ;;  %v2256_v49 = vmul.f32 %v5210_v7, %v5552_v20  ;;  %v5576_v3 = vmul.f32 %v5572_v50, %v5469_v46 }
 0x1e7   : > { %3947 = vmatmul.mubr.bf16.gmra.mxu1 %v2310_v28  ;;  %v1804_v56 = vadd.f32 %v1772_v0, %v1735_v14  ;;  %v1841_v54 = vmul.f32 %v5578_v63, %v1694_v59  ;;  %vm1490_vm8 = vcmp.gt.f32.partialorder %v1442_v57, 0.0  ;;  %v1522_v4 = vmul.f32 0.01, %v1442_v57  ;;  %v5611_v14 = vld [vmem:[#allocation9 + $0x8] ss:$0 sm:$0xff] }
 0x1e8   : > { %v1434_v53 = vadd.f32 %v5566_v21, %v1433_v38  ;;  %v2080_v1 = vadd.f32 %v2048_v37, %v2011_v27  ;;  %v3913_v39 = vpop.f32.mrf.mxu0  ;;  %v2149_v44 = vadd.f32 %v2117_v17, %v2079_v23  ;;  %v1805_v15 = vadd.f32 %v1773_v40, %v1736_v35  ;;  %v1696_v40 = vld [vmem:[#allocation2 + $0x249] sm:$0xff]  ;;  %v5615_v23 = vld [vmem:[#allocation9 + $0x9] ss:$0 sm:$0xff] }
 0x1e9   : > { %v1842_v7 = vmul.f32 %v5578_v63, %v5552_v20  ;;  %v1873_v22 = vadd.f32 %v1841_v54, %v1804_v56  ;;  %v5584_v36 = vsel %vm1490_vm8, %v1442_v57, %v1522_v4  ;;  %v1445_v25 = vadd.f32 %v5566_v21, %v3913_v39  ;;  %v5625_v54 = vld [vmem:[#allocation2 + $0x277] sm:$0xff] }
 0x1ea   : > { %vm1488_vm9 = vcmp.gt.f32.partialorder %v1434_v53, 0.0  ;;  %v1520_v10 = vmul.f32 0.01, %v1434_v53  ;;  %1586 = vst [vmem:[#allocation2 + $0x320] sm:$0xff] %v5584_v36  ;;  %v1436_v58 = vpop.f32.mrf.mxu0  ;;  %v2150_v0 = vadd.f32 %v2118_v5, %v2080_v1  ;;  %v2218_v59 = vadd.f32 %v2186_v55, %v2149_v44  ;;  %v1697_v5 = vld [vmem:[#allocation2 + $0x261] sm:$0xff] }
 0x1eb   : > { %v1874_v42 = vadd.f32 %v1842_v7, %v1805_v15  ;;  %v1911_v41 = vmul.f32 %v5237_v61, %v1615_v32  ;;  %vm1491_vm10 = vcmp.gt.f32.partialorder %v1445_v25, 0.0  ;;  %v1523_v6 = vmul.f32 0.01, %v1445_v25  ;;  %v5638_v7 = vld [vmem:[#allocation2 + $0x279] sm:$0xff] }
 0x1ec   : > { %v5589_v29 = vsel %vm1488_vm9, %v1434_v53, %v1520_v10  ;;  %v1437_v26 = vadd.f32 %v5566_v21, %v1436_v58  ;;  %v2219_v34 = vadd.f32 %v2187_v13, %v2150_v0  ;;  %v1775_v62 = vmul.f32 %v5572_v50, %v5516_v8  ;;  %v5642_v0 = vld [vmem:[#allocation9 + $0x4] ss:$0 sm:$0xff] }
 0x1ed   : > { %1584 = vst [vmem:[#allocation2 + $0x2f0] sm:$0xff] %v5589_v29  ;;  %v1912_v30 = vmul.f32 %v5237_v61, %v1616_v60  ;;  %v1943_v33 = vadd.f32 %v1911_v41, %v1873_v22  ;;  %v5596_v48 = vsel %vm1491_vm10, %v1445_v25, %v1523_v6  ;;  %v1980_v31 = vmul.f32 %v5598_v24, %v5455_v18 }
 0x1ee   : > { %vm1489_vm11 = vcmp.gt.f32.partialorder %v1437_v26, 0.0  ;;  %v1521_v32 = vmul.f32 0.01, %v1437_v26  ;;  %1587 = vst [vmem:[#allocation2 + $0x338] sm:$0xff] %v5596_v48  ;;  %v2287_v37 = vadd.f32 %v2255_v9, %v2218_v59  ;;  %v2288_v17 = vadd.f32 %v2256_v49, %v2219_v34  ;;  %v1619_v34 = vld [vmem:[#allocation2 + $0x28f] sm:$0xff] }
 0x1ef   : > { %v1944_v43 = vadd.f32 %v1912_v30, %v1874_v42  ;;  %v1981_v47 = vmul.f32 %v5598_v24, %v5469_v46  ;;  %v2012_v55 = vadd.f32 %v1980_v31, %v1943_v33  ;;  %v2049_v11 = vmul.f32 %v5249_v19, %v5552_v20 }
 0x1f0   : > { %v5605_v61 = vsel %vm1489_vm11, %v1437_v26, %v1521_v32  ;;  %v2050_v28 = vmul.f32 %v5249_v19, %v1696_v40  ;;  %v2311_v18 = vpack.c.bf16 %v2288_v17, %v2287_v37  ;;  %v2119_v9 = vmul.f32 %v5611_v14, %v1616_v60  ;;  %v5621_v19 = vld [vmem:[#allocation9 + $0xa] ss:$0 sm:$0xff]  ;;  %v5652_v32 = vld [vmem:[#allocation9 + $0x6] ss:$0 sm:$0xff] }
 0x1f1   : > { %1585 = vst [vmem:[#allocation2 + $0x308] sm:$0xff] %v5605_v61  ;;  %v2013_v13 = vadd.f32 %v1981_v47, %v1944_v43  ;;  %v2120_v57 = vmul.f32 %v5611_v14, %v1617_v51  ;;  %v2081_v27 = vadd.f32 %v2049_v11, %v2012_v55  ;;  %v2188_v35 = vmul.f32 %v5615_v23, %v5469_v46 }
 0x1f2   : > { %v2189_v20 = vmul.f32 %v5615_v23, %v5516_v8  ;;  %v2257_v38 = vmul.f32 %v5621_v19, %v1696_v40  ;;  %3950 = vmatprep.mubr.bf16.mxu1 %v2311_v18  ;;  %v2258_v56 = vmul.f32 %v5621_v19, %v1697_v5  ;;  %v1737_v4 = vmul.f32 %v5560_v45, %v1616_v60 }
 0x1f3   : > { %v2082_v49 = vadd.f32 %v2050_v28, %v2013_v13  ;;  %v1738_v53 = vmul.f32 %v5560_v45, %v1617_v51  ;;  %v2151_v1 = vadd.f32 %v2119_v9, %v2081_v27  ;;  %v5631_v46 = vmul.f32 %v5572_v50, %v5526_v2 }
 0x1f4   : > { %v5635_v39 = vmul.f32 %v5572_v50, %v5512_v52  ;;  %v1843_v44 = vmul.f32 %v5578_v63, %v1696_v40  ;;  %v1806_v22 = vadd.f32 %v5576_v3, %v1737_v4  ;;  %v1844_v25 = vmul.f32 %v5578_v63, %v1697_v5  ;;  %v1699_v4 = vld [vmem:[#allocation2 + $0x291] sm:$0xff] }
 0x1f5   : > { %v2152_v15 = vadd.f32 %v2120_v57, %v2082_v49  ;;  %v1807_v10 = vadd.f32 %v1775_v62, %v1738_v53  ;;  %v3916_v60 = vpop.f32.mrf.mxu0  ;;  %v2220_v58 = vadd.f32 %v2188_v35, %v2151_v1  ;;  %v1913_v59 = vmul.f32 %v5642_v0, %v1617_v51 }
 0x1f6   : > { %v1914_v42 = vmul.f32 %v5642_v0, %v5625_v54  ;;  %v1982_v41 = vmul.f32 %v5598_v24, %v5516_v8  ;;  %v1458_v6 = vadd.f32 %v5566_v21, %v3916_v60  ;;  %v1983_v40 = vmul.f32 %v5598_v24, %v5526_v2 }
 0x1f7   : > { %v2221_v26 = vadd.f32 %v2189_v20, %v2152_v15  ;;  %v1876_v3 = vadd.f32 %v1844_v25, %v1807_v10  ;;  %v1449_v62 = vpop.f32.mrf.mxu0  ;;  %v2289_v30 = vadd.f32 %v2257_v38, %v2220_v58  ;;  %v1875_v33 = vadd.f32 %v1843_v44, %v1806_v22  ;;  %v1620_v10 = vld [vmem:[#allocation2 + $0x2a7] sm:$0xff] }
 0x1f8   : > { %v2051_v51 = vmul.f32 %v5652_v32, %v1697_v5  ;;  %v2052_v31 = vmul.f32 %v5652_v32, %v5638_v7  ;;  %vm1494_vm12 = vcmp.gt.f32.partialorder %v1458_v6, 0.0  ;;  %v1526_v8 = vmul.f32 0.01, %v1458_v6 }
 0x1f9   : > { %v1450_v37 = vadd.f32 %v5566_v21, %v1449_v62  ;;  %v2121_v17 = vmul.f32 %v5611_v14, %v5625_v54  ;;  %v3917_v43 = vpop.f32.mrf.mxu0  ;;  %v2290_v47 = vadd.f32 %v2258_v56, %v2221_v26  ;;  %v1945_v55 = vadd.f32 %v1913_v59, %v1875_v33  ;;  %v1661_v59 = vld [vmem:[#allocation2 + $0x2c0] sm:$0xff] }
 0x1fa   : > { %v1946_v11 = vadd.f32 %v1914_v42, %v1876_v3  ;;  %v2122_v28 = vmul.f32 %v5611_v14, %v1619_v34  ;;  %v5661_v18 = vsel %vm1494_vm12, %v1458_v6, %v1526_v8  ;;  %v1461_v13 = vadd.f32 %v5566_v21, %v3917_v43  ;;  %v1701_v6 = vld [vmem:[#allocation2 + $0x2c1] sm:$0xff]  ;;  %v1700_v43 = vld [vmem:[#allocation2 + $0x2a9] sm:$0xff] }
 0x1fb   : > { %vm1492_vm13 = vcmp.gt.f32.partialorder %v1450_v37, 0.0  ;;  %v1524_v5 = vmul.f32 0.01, %v1450_v37  ;;  %1590 = vst [vmem:[#allocation2 + $0x380] sm:$0xff] %v5661_v18  ;;  %v1452_v9 = vpop.f32.mrf.mxu0  ;;  %v2312_v57 = vpack.c.bf16 %v2290_v47, %v2289_v30  ;;  %v2014_v27 = vadd.f32 %v1982_v41, %v1945_v55  ;;  %v1662_v55 = vld [vmem:[#allocation2 + $0x2d8] sm:$0xff] }
 0x1fc   : > { %v2015_v35 = vadd.f32 %v1983_v40, %v1946_v11  ;;  %v2190_v20 = vmul.f32 %v5615_v23, %v5526_v2  ;;  %vm1495_vm14 = vcmp.gt.f32.partialorder %v1461_v13, 0.0  ;;  %v1527_v49 = vmul.f32 0.01, %v1461_v13 }
 0x1fd   : > { %v5667_v38 = vsel %vm1492_vm13, %v1450_v37, %v1524_v5  ;;  %v1453_v56 = vadd.f32 %v5566_v21, %v1452_v9  ;;  %3951 = vmatmul.mubr.bf16.gmra.mxu1 %v2312_v57  ;;  %v2083_v53 = vadd.f32 %v2051_v51, %v2014_v27  ;;  %v2191_v44 = vmul.f32 %v5615_v23, %v5512_v52  ;;  %v1623_v37 = vld [vmem:[#allocation2 + $0x2ef] sm:$0xff]  ;;  %v5699_v27 = vld [vmem:[#allocation2 + $0x7] sm:$0xff] }
 0x1fe   : > { %1588 = vst [vmem:[#allocation2 + $0x350] sm:$0xff] %v5667_v38  ;;  %v2084_v1 = vadd.f32 %v2052_v31, %v2015_v35  ;;  %v2259_v15 = vmul.f32 %v5621_v19, %v5638_v7  ;;  %v5675_v22 = vsel %vm1495_vm14, %v1461_v13, %v1527_v49  ;;  %v1739_v21 = vmul.f32 %v5560_v45, %v5625_v54  ;;  %v1703_v13 = vld [vmem:[#allocation2 + $0x2f1] sm:$0xff] }
 0x1ff   : > { %vm1493_vm15 = vcmp.gt.f32.partialorder %v1453_v56, 0.0  ;;  %v1525_v2 = vmul.f32 0.01, %v1453_v56  ;;  %1591 = vst [vmem:[#allocation2 + $0x398] sm:$0xff] %v5675_v22  ;;  %v2153_v25 = vadd.f32 %v2121_v17, %v2083_v53  ;;  %v2260_v58 = vmul.f32 %v5621_v19, %v1699_v4 }
 0x200   : > { %v2154_v60 = vadd.f32 %v2122_v28, %v2084_v1  ;;  %v1740_v42 = vmul.f32 %v5560_v45, %v1619_v34  ;;  %v1808_v26 = vadd.f32 %v5631_v46, %v1739_v21  ;;  %v1845_v3 = vmul.f32 %v5578_v63, %v5638_v7 }
 0x201   : > { %v5682_v41 = vsel %vm1493_vm15, %v1453_v56, %v1525_v2  ;;  %v1846_v40 = vmul.f32 %v5578_v63, %v1699_v4  ;;  %v2222_v54 = vadd.f32 %v2190_v20, %v2153_v25  ;;  %v1916_v33 = vmul.f32 %v5642_v0, %v1620_v10 }
 0x202   : > { %1589 = vst [vmem:[#allocation2 + $0x368] sm:$0xff] %v5682_v41  ;;  %v2223_v62 = vadd.f32 %v2191_v44, %v2154_v60  ;;  %v1809_v30 = vadd.f32 %v5635_v39, %v1740_v42  ;;  %v1877_v51 = vadd.f32 %v1845_v3, %v1808_v26  ;;  %v1915_v31 = vmul.f32 %v5642_v0, %v1619_v34  ;;  %v1702_v34 = vld [vmem:[#allocation2 + $0x2d9] sm:$0xff] }
 0x203   : > { %v2193_v8 = vmul.f32 %v5615_v23, %v1661_v59  ;;  %v2291_v46 = vadd.f32 %v2259_v15, %v2222_v54  ;;  %v2262_v47 = vmul.f32 %v5621_v19, %v1701_v6  ;;  %v1984_v28 = vmul.f32 %v5598_v24, %v5512_v52  ;;  %v1624_v52 = vld [vmem:[#allocation2 + $0x307] sm:$0xff] }
 0x204   : > { %v2292_v17 = vadd.f32 %v2260_v58, %v2223_v62  ;;  %v1878_v7 = vadd.f32 %v1846_v40, %v1809_v30  ;;  %v1947_v11 = vadd.f32 %v1915_v31, %v1877_v51  ;;  %v1985_v39 = vmul.f32 %v5598_v24, %v5520_v12  ;;  %v1625_v40 = vld [vmem:[#allocation2 + $0x31f] sm:$0xff] }
 0x205   : > { %v2053_v5 = vmul.f32 %v5652_v32, %v1699_v4  ;;  %v1741_v35 = vmul.f32 %v5699_v27, %v5560_v45  ;;  %v1742_v20 = vmul.f32 %v5560_v45, %v1623_v37  ;;  %v2054_v56 = vmul.f32 %v5652_v32, %v1700_v43 }
 0x206   : > { %v2313_v9 = vpack.c.bf16 %v2292_v17, %v2291_v46  ;;  %v1948_v57 = vadd.f32 %v1916_v33, %v1878_v7  ;;  %v2016_v49 = vadd.f32 %v1984_v28, %v1947_v11  ;;  %v1778_v53 = vmul.f32 %v5572_v50, %v1662_v55 }
 0x207   : > { %v1779_v4 = vmul.f32 %v5572_v50, %v5589_v29  ;;  %v2123_v44 = vmul.f32 %v5611_v14, %v1620_v10  ;;  %v1847_v15 = vmul.f32 %v5578_v63, %v1702_v34  ;;  %v1848_v2 = vmul.f32 %v5578_v63, %v1703_v13  ;;  %v1704_v10 = vld [vmem:[#allocation2 + $0x309] sm:$0xff] }
 0x208   : > { %3954 = vmatprep.mubr.bf16.mxu1 %v2313_v9  ;;  %v2017_v1 = vadd.f32 %v1985_v39, %v1948_v57  ;;  %v2085_v21 = vadd.f32 %v2053_v5, %v2016_v49  ;;  %v1810_v25 = vadd.f32 %v1778_v53, %v1741_v35  ;;  %v1917_v58 = vmul.f32 %v5642_v0, %v1623_v37  ;;  %v1705_v39 = vld [vmem:[#allocation2 + $0x321] sm:$0xff] }
 0x209   : > { %v1811_v60 = vadd.f32 %v1779_v4, %v1742_v20  ;;  %v2192_v42 = vmul.f32 %v5615_v23, %v5520_v12  ;;  %v2261_v6 = vmul.f32 %v5621_v19, %v1700_v43  ;;  %v1918_v26 = vmul.f32 %v5642_v0, %v1624_v52 }
 0x20a   : > { %v2086_v59 = vadd.f32 %v2054_v56, %v2017_v1  ;;  %v2155_v3 = vadd.f32 %v2123_v44, %v2085_v21  ;;  %v1780_v54 = vmul.f32 %v5572_v50, %v5605_v61  ;;  %v1879_v62 = vadd.f32 %v1847_v15, %v1810_v25 }
 0x20b   : > { %v1880_v30 = vadd.f32 %v1848_v2, %v1811_v60  ;;  %v1781_v51 = vmul.f32 %v5572_v50, %v5584_v36  ;;  %v1986_v12 = vmul.f32 %v5598_v24, %v5589_v29  ;;  %v1987_v31 = vmul.f32 %v5598_v24, %v5605_v61 }
 0x20c   : > { %v2156_v33 = vadd.f32 %v5214_v16, %v2086_v59  ;;  %v2224_v37 = vadd.f32 %v2192_v42, %v2155_v3  ;;  %v1949_v46 = vadd.f32 %v1917_v58, %v1879_v62  ;;  %v2055_v43 = vmul.f32 %v5652_v32, %v1703_v13  ;;  %v1627_v42 = vld [vmem:[#allocation2 + $0x34f] sm:$0xff] }
 0x20d   : > { %v1950_v17 = vadd.f32 %v1918_v26, %v1880_v30  ;;  %v2056_v55 = vmul.f32 %v5652_v32, %v1704_v10  ;;  %v2125_v11 = vmul.f32 %v5611_v14, %v1624_v52  ;;  %v2126_v16 = vmul.f32 %v5611_v14, %v1625_v40 }
 0x20e   : > { %v2225_v7 = vadd.f32 %v2193_v8, %v2156_v33  ;;  %v2293_v28 = vadd.f32 %v2261_v6, %v2224_v37  ;;  %v2018_v5 = vadd.f32 %v1986_v12, %v1949_v46  ;;  %v1743_v29 = vmul.f32 %v5560_v45, %v1624_v52  ;;  %v1626_v8 = vld [vmem:[#allocation2 + $0x337] sm:$0xff] }
 0x20f   : > { %v2019_v34 = vadd.f32 %v1987_v31, %v1950_v17  ;;  %v2194_v57 = vmul.f32 %v5615_v23, %v5605_v61  ;;  %v2195_v13 = vmul.f32 %v5615_v23, %v5584_v36  ;;  %v1744_v35 = vmul.f32 %v5560_v45, %v1625_v40  ;;  %v1706_v6 = vld [vmem:[#allocation2 + $0x339] sm:$0xff]  ;;  %v1707_v31 = vld [vmem:[#allocation2 + $0x351] sm:$0xff] }
 0x210   : > { %v2294_v9 = vadd.f32 %v2262_v47, %v2225_v7  ;;  %v2087_v20 = vadd.f32 %v2055_v43, %v2018_v5  ;;  %v1812_v56 = vadd.f32 %v1780_v54, %v1743_v29  ;;  %v1849_v53 = vmul.f32 %v5578_v63, %v1704_v10 }
 0x211   : > { %v2088_v49 = vadd.f32 %v2056_v55, %v2019_v34  ;;  %v1813_v1 = vadd.f32 %v1781_v51, %v1744_v35  ;;  %v1850_v44 = vmul.f32 %v5578_v63, %v1705_v39  ;;  %v1919_v47 = vmul.f32 %v5642_v0, %v1625_v40 }
 0x212   : > { %v2314_v4 = vpack.c.bf16 %v2294_v9, %v2293_v28  ;;  %v2157_v52 = vadd.f32 %v2125_v11, %v2087_v20  ;;  %v1881_v61 = vadd.f32 %v1849_v53, %v1812_v56  ;;  %v1920_v2 = vmul.f32 %v5642_v0, %v1626_v8  ;;  %v1628_v11 = vld [vmem:[#allocation2 + $0x367] sm:$0xff] }
 0x213   : > { %v2158_v15 = vadd.f32 %v2126_v16, %v2088_v49  ;;  %v2263_v21 = vmul.f32 %v5621_v19, %v1704_v10  ;;  %v2264_v25 = vmul.f32 %v5621_v19, %v1705_v39  ;;  %v1882_v60 = vadd.f32 %v1850_v44, %v1813_v1 }
 0x214   : > { %3955 = vmatmul.mubr.bf16.gmra.mxu1 %v2314_v4  ;;  %v2226_v58 = vadd.f32 %v2194_v57, %v2157_v52  ;;  %v1951_v26 = vadd.f32 %v1919_v47, %v1881_v61  ;;  %v1988_v3 = vmul.f32 %v5598_v24, %v5584_v36  ;;  %v1782_v40 = vmul.f32 %v5572_v50, %v5596_v48  ;;  %v1708_v4 = vld [vmem:[#allocation2 + $0x369] sm:$0xff]  ;;  %v1629_v47 = vld [vmem:[#allocation2 + $0x37f] sm:$0xff] }
 0x215   : > { %v2227_v59 = vadd.f32 %v2195_v13, %v2158_v15  ;;  %v1783_v54 = vmul.f32 %v5572_v50, %v5667_v38  ;;  %v1952_v62 = vadd.f32 %v1920_v2, %v1882_v60  ;;  %v1989_v10 = vmul.f32 %v5598_v24, %v5596_v48 }
 0x216   : > { %v2295_v30 = vadd.f32 %v2263_v21, %v2226_v58  ;;  %v2020_v51 = vadd.f32 %v1988_v3, %v1951_v26  ;;  %v2057_v12 = vmul.f32 %v5652_v32, %v1705_v39  ;;  %v2058_v46 = vmul.f32 %v5652_v32, %v1706_v6 }
 0x217   : > { %v2296_v33 = vadd.f32 %v2264_v25, %v2227_v59  ;;  %v2021_v37 = vadd.f32 %v1989_v10, %v1952_v62  ;;  %v2128_v36 = vmul.f32 %v5611_v14, %v1627_v42  ;;  %v1745_v17 = vmul.f32 %v5560_v45, %v1626_v8  ;;  %v1709_v59 = vld [vmem:[#allocation2 + $0x381] sm:$0xff] }
 0x218   : > { %v2089_v7 = vadd.f32 %v2057_v12, %v2020_v51  ;;  %v2127_v55 = vmul.f32 %v5611_v14, %v1626_v8  ;;  %v1746_v16 = vmul.f32 %v5560_v45, %v1627_v42  ;;  %v2196_v5 = vmul.f32 %v5615_v23, %v5596_v48 }
 0x219   : > { %v2315_v43 = vpack.c.bf16 %v2296_v33, %v2295_v30  ;;  %v2090_v28 = vadd.f32 %v2058_v46, %v2021_v37  ;;  %v1814_v39 = vadd.f32 %v1782_v40, %v1745_v17  ;;  %v1851_v34 = vmul.f32 %v5578_v63, %v1706_v6 }
 0x21a   : > { %v2159_v29 = vadd.f32 %v2127_v55, %v2089_v7  ;;  %v1815_v9 = vadd.f32 %v1783_v54, %v1746_v16  ;;  %v1852_v57 = vmul.f32 %v5578_v63, %v1707_v31  ;;  %v1921_v13 = vmul.f32 %v5642_v0, %v1627_v42  ;;  %v1630_v54 = vld [vmem:[#allocation2 + $0x397] sm:$0xff] }
 0x21b   : > { %3958 = vmatprep.mubr.bf16.mxu1 %v2315_v43  ;;  %v2160_v35 = vadd.f32 %v2128_v36, %v2090_v28  ;;  %v2197_v8 = vmul.f32 %v5615_v23, %v5667_v38  ;;  %v1883_v20 = vadd.f32 %v1851_v34, %v1814_v39  ;;  %v1922_v49 = vmul.f32 %v5642_v0, %v1628_v11  ;;  %v1710_v7 = vld [vmem:[#allocation2 + $0x399] sm:$0xff] }
 0x21c   : > { %v2228_v56 = vadd.f32 %v2196_v5, %v2159_v29  ;;  %v2265_v48 = vmul.f32 %v5621_v19, %v1706_v6  ;;  %v2266_v53 = vmul.f32 %v5621_v19, %v1707_v31  ;;  %v1884_v1 = vadd.f32 %v1852_v57, %v1815_v9  ;;  %v1671_v57 = vld [vmem:[#allocation2 + $0x3b0] sm:$0xff] }
 0x21d   : > { %v2229_v44 = vadd.f32 %v2197_v8, %v2160_v35  ;;  %v1784_v52 = vmul.f32 %v5572_v50, %v5682_v41  ;;  %v1953_v15 = vadd.f32 %v1921_v13, %v1883_v20  ;;  %v1990_v61 = vmul.f32 %v5598_v24, %v5667_v38 }
 0x21e   : > { %v2297_v2 = vadd.f32 %v2265_v48, %v2228_v56  ;;  %v1785_v21 = vmul.f32 %v5572_v50, %v5661_v18  ;;  %v1954_v25 = vadd.f32 %v1922_v49, %v1884_v1  ;;  %v1991_v60 = vmul.f32 %v5598_v24, %v5682_v41  ;;  %v1711_v48 = vld [vmem:[#allocation2 + $0x3b1] sm:$0xff] }
 0x21f   : > { %v2298_v58 = vadd.f32 %v2266_v53, %v2229_v44  ;;  %v2022_v42 = vadd.f32 %v1990_v61, %v1953_v15  ;;  %v2059_v6 = vmul.f32 %v5652_v32, %v1707_v31  ;;  %v2060_v26 = vmul.f32 %v5652_v32, %v1708_v4 }
 0x220   : > { %v2023_v3 = vadd.f32 %v1991_v60, %v1954_v25  ;;  %v2129_v40 = vmul.f32 %v5611_v14, %v1628_v11  ;;  %v1747_v38 = vmul.f32 %v5560_v45, %v1628_v11  ;;  %v1748_v62 = vmul.f32 %v5560_v45, %v1629_v47  ;;  %v5806_v25 = vld [vmem:[%s6312_s6] ss:$0 sm:$0xff] }
 0x221   : > { %v2316_v50 = vpack.c.bf16 %v2298_v58, %v2297_v2  ;;  %v2091_v10 = vadd.f32 %v2059_v6, %v2022_v42  ;;  %v2130_v30 = vmul.f32 %v5611_v14, %v1629_v47  ;;  %v1853_v33 = vmul.f32 %v5578_v63, %v1708_v4 }
 0x222   : > { %v2092_v51 = vadd.f32 %v2060_v26, %v2023_v3  ;;  %v1816_v12 = vadd.f32 %v1784_v52, %v1747_v38  ;;  %v1817_v37 = vadd.f32 %v1785_v21, %v1748_v62  ;;  %v1854_v31 = vmul.f32 %v5578_v63, %v1709_v59 }
 0x223   : > { %3959 = vmatmul.mubr.bf16.gmra.mxu1 %v2316_v50  ;;  %v2161_v46 = vadd.f32 %v2129_v40, %v2091_v10  ;;  %v2198_v36 = vmul.f32 %v5615_v23, %v5682_v41  ;;  %v2199_v17 = vmul.f32 %v5615_v23, %v5661_v18  ;;  %v1924_v45 = vmul.f32 %v5642_v0, %v1630_v54 }
 0x224   : > { %v2162_v43 = vadd.f32 %v2130_v30, %v2092_v51  ;;  %v1885_v55 = vadd.f32 %v1853_v33, %v1816_v12  ;;  %v1886_v11 = vadd.f32 %v1854_v31, %v1817_v37  ;;  %v1923_v16 = vmul.f32 %v5642_v0, %v1629_v47 }
 0x225   : > { %v2230_v28 = vadd.f32 %v2198_v36, %v2161_v46  ;;  %v2267_v5 = vmul.f32 %v5621_v19, %v1708_v4  ;;  %v2268_v63 = vmul.f32 %v5621_v19, %v1709_v59  ;;  %v1992_v39 = vmul.f32 %v5598_v24, %v5661_v18 }
 0x226   : > { %v2231_v41 = vadd.f32 %v2199_v17, %v2162_v43  ;;  %v1955_v34 = vadd.f32 %v1923_v16, %v1885_v55  ;;  %v1956_v29 = vadd.f32 %v1924_v45, %v1886_v11  ;;  %v1993_v9 = vmul.f32 %v5598_v24, %v5675_v22 }
 0x227   : > { %v2061_v13 = vmul.f32 %v5652_v32, %v1709_v59  ;;  %v2062_v35 = vmul.f32 %v5652_v32, %v1710_v7  ;;  %v2132_v0 = vmul.f32 %v5699_v27, %v5611_v14  ;;  %v2299_v8 = vadd.f32 %v2267_v5, %v2230_v28 }
 0x228   : > { %v2300_v20 = vadd.f32 %v2268_v63, %v2231_v41  ;;  %v2024_v49 = vadd.f32 %v1992_v39, %v1955_v34  ;;  %v2025_v56 = vadd.f32 %v1993_v9, %v1956_v29  ;;  %v2131_v18 = vmul.f32 %v5611_v14, %v1630_v54 }
 0x229   : > { %v2201_v24 = vmul.f32 %v5615_v23, %v1671_v57  ;;  %v2200_v32 = vmul.f32 %v5615_v23, %v5675_v22  ;;  %v2270_v27 = vmul.f32 %v5621_v19, %v1711_v48  ;;  %v2269_v61 = vmul.f32 %v5621_v19, %v1710_v7 }
 0x22a   : > { %v2317_v53 = vpack.c.bf16 %v2300_v20, %v2299_v8  ;;  %v2093_v4 = vadd.f32 %v2061_v13, %v2024_v49  ;;  %v2094_v1 = vadd.f32 %v2062_v35, %v2025_v56 }
 0x22c   : > { %3962 = vmatprep.mubr.bf16.mxu1 %v2317_v53  ;;  %v2163_v44 = vadd.f32 %v2131_v18, %v2093_v4  ;;  %v2164_v47 = vadd.f32 %v2132_v0, %v2094_v1 }
 0x22e   : > { %v2232_v52 = vadd.f32 %v2200_v32, %v2163_v44  ;;  %v2233_v15 = vadd.f32 %v2201_v24, %v2164_v47 }
 0x230   : > { %v2301_v2 = vadd.f32 %v2269_v61, %v2232_v52  ;;  %v2302_v21 = vadd.f32 %v2270_v27, %v2233_v15 }
 0x232   : > { %v2318_v14 = vpack.c.bf16 %v2302_v21, %v2301_v2 }
 0x234   : > { %3963 = vmatmul.mubr.bf16.gmra.mxu1 %v2318_v14 }
 0x268   : > { %v3936_v60 = vpop.f32.mrf.mxu1 }
 0x269   : > { %v2433_v58 = vadd.f32 %v3936_v60, %v5806_v25 }
 0x26a   : > { %v2424_v59 = vpop.f32.mrf.mxu1 }
 0x26b   : > { %vm2553_vm0 = vcmp.gt.f32.partialorder %v2433_v58, 0.0  ;;  %v2585_v23 = vmul.f32 0.01, %v2433_v58  ;;  %v2425_v22 = vadd.f32 %v5806_v25, %v2424_v59 }
 0x26c   : > { %v3937_v42 = vpop.f32.mrf.mxu1 }
 0x26d   : > { %v2617_v6 = vsel %vm2553_vm0, %v2433_v58, %v2585_v23  ;;  %vm2551_vm1 = vcmp.gt.f32.partialorder %v2425_v22, 0.0  ;;  %v2583_v19 = vmul.f32 0.01, %v2425_v22  ;;  %v2436_v26 = vadd.f32 %v3937_v42, %v5806_v25 }
 0x26e   : > { %2649 = vst [vmem:[#allocation2 + $0x50] sm:$0xff] %v2617_v6  ;;  %v2427_v3 = vpop.f32.mrf.mxu1  ;;  %v2970_v55 = vmul.f32 0.75, %v2617_v6 }
 0x26f   : > { %v2615_v40 = vsel %vm2551_vm1, %v2425_v22, %v2583_v19  ;;  %vm2554_vm2 = vcmp.gt.f32.partialorder %v2436_v26, 0.0  ;;  %v2586_v54 = vmul.f32 0.01, %v2436_v26  ;;  %v2428_v38 = vadd.f32 %v5806_v25, %v2427_v3 }
 0x270   : > { %2647 = vst [vmem:[#allocation2 + $0x20] sm:$0xff] %v2615_v40  ;;  %2679 = vst [vmem:[#allocation2 + $0x8] sm:$0xff] %v2615_v40  ;;  %v2967_v41 = vmul.f32 0.75, %v2615_v40 }
 0x271   : > { %v2618_v62 = vsel %vm2554_vm2, %v2436_v26, %v2586_v54  ;;  %vm2552_vm3 = vcmp.gt.f32.partialorder %v2428_v38, 0.0  ;;  %v2584_v50 = vmul.f32 0.01, %v2428_v38 }
 0x272   : > { %2650 = vst [vmem:[#allocation2 + $0x68] sm:$0xff] %v2618_v62  ;;  %v2971_v34 = vmul.f32 0.75, %v2618_v62 }
 0x273   : > { %v2616_v10 = vsel %vm2552_vm3, %v2428_v38, %v2584_v50 }
 0x274   : > { %2648 = vst [vmem:[#allocation2 + $0x38] sm:$0xff] %v2616_v10  ;;  %v2969_v18 = vmul.f32 0.75, %v2616_v10 }
 0x275   : > { %v2690_v30 = vld [vmem:[#allocation2 + $0x50] sm:$0x1]  ;;  %v2770_v33 = vld [vmem:[#allocation2 + $0x57] sm:$0x1] }
 0x276   : > { %2730 = vst [vmem:[#allocation2 + $0x4f] sm:$0x1] %v2690_v30  ;;  %2810 = vst [vmem:[#allocation2 + $0x58] sm:$0x1] %v2770_v33 }
 0x277   : > { %v2687_v51 = vld [vmem:[#allocation2 + $0x8] sm:$0x1]  ;;  %v2688_v12 = vld [vmem:[#allocation2 + $0x20] sm:$0x1]  ;;  %v2767_v37 = vld [vmem:[#allocation2 + $0xf] sm:$0x1] }
 0x278   : > { %2727 = vst [vmem:[#allocation2 + $0x7] sm:$0x1] %v2687_v51  ;;  %2728 = vst [vmem:[#allocation2 + $0x1f] sm:$0x1] %v2688_v12  ;;  %v2768_v31 = vld [vmem:[#allocation2 + $0x27] sm:$0x1] }
 0x279   : > { %2807 = vst [vmem:[#allocation2 + $0x10] sm:$0x1] %v2767_v37  ;;  %2808 = vst [vmem:[#allocation2 + $0x28] sm:$0x1] %v2768_v31  ;;  %v2691_v46 = vld [vmem:[#allocation2 + $0x68] sm:$0x1] }
 0x27a   : > { %v2771_v36 = vld [vmem:[#allocation2 + $0x6f] sm:$0x1]  ;;  %2731 = vst [vmem:[#allocation2 + $0x67] sm:$0x1] %v2691_v46 }
 0x27b   : > { %2811 = vst [vmem:[#allocation2 + $0x70] sm:$0x1] %v2771_v36  ;;  %v2689_v17 = vld [vmem:[#allocation2 + $0x38] sm:$0x1]  ;;  %v2769_v45 = vld [vmem:[#allocation2 + $0x3f] sm:$0x1] }
 0x27c   : > { %2729 = vst [vmem:[#allocation2 + $0x37] sm:$0x1] %v2689_v17  ;;  %2809 = vst [vmem:[#allocation2 + $0x40] sm:$0x1] %v2769_v45 }
 0x27d   : > { %v2850_v43 = vld [vmem:[#allocation2 + $0x4f] sm:$0xff] }
 0x27e   : > { %v2930_v7 = vld [vmem:[#allocation2 + $0x51] sm:$0xff]  ;;  %v3010_v11 = vmul.f32 0.25, %v2850_v43  ;;  %v3940_v28 = vpop.f32.mrf.mxu1 }
 0x27f   : > { %v3090_v16 = vmul.f32 0.25, %v2930_v7  ;;  %v2847_v5 = vld [vmem:[#allocation2 + $0x7] sm:$0xff]  ;;  %v2848_v63 = vld [vmem:[#allocation2 + $0x1f] sm:$0xff]  ;;  %v5813_v29 = vadd.f32 %v3940_v28, %v5806_v25 }
 0x280   : > { %v2927_v39 = vld [vmem:[#allocation2 + $0x9] sm:$0xff]  ;;  %v3050_v9 = vadd.f32 %v3010_v11, %v2970_v55  ;;  %v2928_v13 = vld [vmem:[#allocation2 + $0x21] sm:$0xff]  ;;  %v3007_v35 = vmul.f32 0.25, %v2847_v5  ;;  %v3008_v0 = vmul.f32 0.25, %v2848_v63  ;;  %v2440_v8 = vpop.f32.mrf.mxu1 }
 0x281   : > { %v3130_v57 = vadd.f32 %v3090_v16, %v2970_v55  ;;  %v3087_v20 = vmul.f32 0.25, %v2927_v39  ;;  %v3088_v49 = vmul.f32 0.25, %v2928_v13  ;;  %v2851_v56 = vld [vmem:[#allocation2 + $0x67] sm:$0xff]  ;;  %v5816_v53 = vadd.f32 %v5806_v25, %v2440_v8 }
 0x282   : > { %v2931_v48 = vld [vmem:[#allocation2 + $0x69] sm:$0xff]  ;;  %v3169_v4 = vmul.f32 0.75, %v3050_v9  ;;  %v3202_v1 = vmul.f32 0.25, %v3050_v9  ;;  %vm2557_vm4 = vcmp.gt.f32.partialorder %v5813_v29, 0.0  ;;  %v3047_v47 = vadd.f32 %v3007_v35, %v2967_v41  ;;  %v3941_v62 = vpop.f32.mrf.mxu1 }
 0x283   : > { %v3265_v24 = vmul.f32 0.75, %v3130_v57  ;;  %v3298_v44 = vmul.f32 0.25, %v3130_v57  ;;  %v3048_v32 = vadd.f32 %v3008_v0, %v2967_v41  ;;  %v3127_v27 = vadd.f32 %v3087_v20, %v2967_v41  ;;  %v2849_v15 = vld [vmem:[#allocation2 + $0x37] sm:$0xff] }
 0x284   : > { %v3128_v52 = vadd.f32 %v3088_v49, %v2967_v41  ;;  %v2929_v61 = vld [vmem:[#allocation2 + $0x39] sm:$0xff]  ;;  %v3011_v2 = vmul.f32 0.25, %v2851_v56  ;;  %v3091_v21 = vmul.f32 0.25, %v2931_v48  ;;  %v3009_v14 = vmul.f32 0.25, %v2849_v15  ;;  %v2443_v16 = vpop.f32.mrf.mxu1 }
 0x285   : > { %v3089_v60 = vmul.f32 0.25, %v2929_v61  ;;  %v3167_v58 = vmul.f32 0.75, %v3048_v32  ;;  %v3199_v59 = vmul.f32 0.25, %v3047_v47  ;;  %v3200_v23 = vmul.f32 0.25, %v3048_v32 }
 0x286   : > { %v3263_v22 = vmul.f32 0.75, %v3128_v52  ;;  %v3295_v42 = vmul.f32 0.25, %v3127_v27  ;;  %v3296_v6 = vmul.f32 0.25, %v3128_v52  ;;  %v3051_v19 = vadd.f32 %v3011_v2, %v2971_v34 }
 0x287   : > { %v3131_v26 = vadd.f32 %v3091_v21, %v2971_v34  ;;  %v3231_v3 = vadd.f32 %v3199_v59, %v3167_v58  ;;  %v3049_v40 = vadd.f32 %v3009_v14, %v2969_v18  ;;  %v3129_v54 = vadd.f32 %v3089_v60, %v2969_v18 }
 0x288   : > { %v2589_v38 = vmul.f32 0.01, %v5813_v29  ;;  %v3327_v50 = vadd.f32 %v3295_v42, %v3263_v22  ;;  %v5821_v10 = vmul.f32 0.75, %v3051_v19  ;;  %v5823_v30 = vmul.f32 0.25, %v3051_v19 }
 0x289   : > { %v5825_v33 = vmul.f32 0.75, %v3131_v26  ;;  %3439 = vst [vmem:[%s5827_s15] sm:$0xff] %v3231_v3  ;;  %v5830_v51 = vmul.f32 0.25, %v3131_v26  ;;  %v3168_v12 = vmul.f32 0.75, %v3049_v40  ;;  %v3201_v37 = vmul.f32 0.25, %v3049_v40 }
 0x28a   : > { %v3264_v31 = vmul.f32 0.75, %v3129_v54  ;;  %3471 = vst [vmem:[%s5827_s15 + $0x8] sm:$0xff] %v3327_v50  ;;  %v3234_v46 = vadd.f32 %v3202_v1, %v5821_v10  ;;  %v3369_v17 = vadd.f32 %v5823_v30, %v3169_v4  ;;  %v3297_v45 = vmul.f32 0.25, %v3129_v54 }
 0x28b   : > { %v3330_v36 = vadd.f32 %v3298_v44, %v5825_v33  ;;  %v3409_v43 = vadd.f32 %v5830_v51, %v3265_v24  ;;  %v3232_v7 = vadd.f32 %v3200_v23, %v3168_v12  ;;  %v3233_v55 = vadd.f32 %v3201_v37, %v3169_v4 }
 0x28c   : > { %v3328_v11 = vadd.f32 %v3296_v6, %v3264_v31  ;;  %3442 = vst [vmem:[%s5827_s15 + $0x60] sm:$0xff] %v3234_v46  ;;  %3750 = vst [vmem:[%s5827_s15 + $0x50] sm:$0xff] %v3369_v17  ;;  %v3329_v28 = vadd.f32 %v3297_v45, %v3265_v24  ;;  %v3367_v5 = vadd.f32 %v3201_v37, %v3167_v58  ;;  %vm2555_vm5 = vcmp.gt.f32.partialorder %v5816_v53, 0.0 }
 0x28d   : > { %3474 = vst [vmem:[%s5827_s15 + $0x68] sm:$0xff] %v3330_v36  ;;  %v3368_v63 = vadd.f32 %v3202_v1, %v3168_v12  ;;  %v3407_v39 = vadd.f32 %v3297_v45, %v3263_v22  ;;  %3782 = vst [vmem:[%s5827_s15 + $0x58] sm:$0xff] %v3409_v43  ;;  %v3408_v41 = vadd.f32 %v3298_v44, %v3264_v31  ;;  %v2587_v9 = vmul.f32 0.01, %v5816_v53 }
 0x28e   : > { %3440 = vst [vmem:[%s5827_s15 + $0x20] sm:$0xff] %v3232_v7  ;;  %3441 = vst [vmem:[%s5827_s15 + $0x40] sm:$0xff] %v3233_v55  ;;  %v5847_v34 = vsel %vm2557_vm4, %v5813_v29, %v2589_v38  ;;  %v2452_v57 = vadd.f32 %v3941_v62, %v5806_v25  ;;  %v2444_v13 = vadd.f32 %v5806_v25, %v2443_v16 }
 0x28f   : > { %3472 = vst [vmem:[%s5827_s15 + $0x28] sm:$0xff] %v3328_v11  ;;  %3473 = vst [vmem:[%s5827_s15 + $0x48] sm:$0xff] %v3329_v28  ;;  %v5860_v35 = vsel %vm2555_vm5, %v5816_v53, %v2587_v9  ;;  %v2974_v3 = vmul.f32 0.75, %v5847_v34 }
 0x290   : > { %3748 = vst [vmem:[%s5827_s15 + $0x10] sm:$0xff] %v3367_v5  ;;  %3749 = vst [vmem:[%s5827_s15 + $0x30] sm:$0xff] %v3368_v63  ;;  %vm2558_vm6 = vcmp.gt.f32.partialorder %v2452_v57, 0.0  ;;  %v2590_v29 = vmul.f32 0.01, %v2452_v57  ;;  %vm2556_vm7 = vcmp.gt.f32.partialorder %v2444_v13, 0.0 }
 0x291   : > { %3780 = vst [vmem:[%s5827_s15 + $0x18] sm:$0xff] %v3407_v39  ;;  %2653 = vst [vmem:[#allocation2 + $0xb0] sm:$0xff] %v5847_v34  ;;  %v2588_v0 = vmul.f32 0.01, %v2444_v13  ;;  %v3944_v8 = vpop.f32.mrf.mxu1  ;;  %v2972_v31 = vmul.f32 0.75, %v5860_v35 }
 0x292   : > { %3781 = vst [vmem:[%s5827_s15 + $0x38] sm:$0xff] %v3408_v41  ;;  %2651 = vst [vmem:[#allocation2 + $0x80] sm:$0xff] %v5860_v35  ;;  %v2622_v20 = vsel %vm2558_vm6, %v2452_v57, %v2590_v29  ;;  %v2465_v49 = vadd.f32 %v3944_v8, %v5806_v25 }
 0x293   : > { %2654 = vst [vmem:[#allocation2 + $0xc8] sm:$0xff] %v2622_v20  ;;  %2683 = vst [vmem:[#allocation2 + $0xe0] sm:$0xff] %v2622_v20  ;;  %v2620_v56 = vsel %vm2556_vm7, %v2444_v13, %v2588_v0  ;;  %v2456_v48 = vpop.f32.mrf.mxu1  ;;  %v2975_v46 = vmul.f32 0.75, %v2622_v20 }
 0x294   : > { %2652 = vst [vmem:[#allocation2 + $0x98] sm:$0xff] %v2620_v56  ;;  %vm2561_vm8 = vcmp.gt.f32.partialorder %v2465_v49, 0.0  ;;  %v2593_v18 = vmul.f32 0.01, %v2465_v49  ;;  %v2457_v53 = vadd.f32 %v5806_v25, %v2456_v48  ;;  %v5869_v36 = vmul.f32 0.75, %v2620_v56 }
 0x295   : > { %v3945_v24 = vpop.f32.mrf.mxu1 }
 0x296   : > { %v2625_v44 = vsel %vm2561_vm8, %v2465_v49, %v2593_v18  ;;  %vm2559_vm9 = vcmp.gt.f32.partialorder %v2457_v53, 0.0  ;;  %v2591_v47 = vmul.f32 0.01, %v2457_v53  ;;  %v2468_v32 = vadd.f32 %v3945_v24, %v5806_v25 }
 0x297   : > { %2657 = vst [vmem:[#allocation2 + $0x140] sm:$0xff] %v2625_v44  ;;  %v2459_v15 = vpop.f32.mrf.mxu1  ;;  %v5871_v17 = vmul.f32 0.75, %v2625_v44 }
 0x298   : > { %v2694_v4 = vld [vmem:[#allocation2 + $0xb0] sm:$0x1]  ;;  %v2774_v1 = vld [vmem:[#allocation2 + $0xb7] sm:$0x1]  ;;  %v2623_v61 = vsel %vm2559_vm9, %v2457_v53, %v2591_v47  ;;  %vm2562_vm10 = vcmp.gt.f32.partialorder %v2468_v32, 0.0  ;;  %v2460_v21 = vadd.f32 %v5806_v25, %v2459_v15 }
 0x299   : > { %2734 = vst [vmem:[#allocation2 + $0xaf] sm:$0x1] %v2694_v4  ;;  %2814 = vst [vmem:[#allocation2 + $0xb8] sm:$0x1] %v2774_v1  ;;  %v2692_v27 = vld [vmem:[#allocation2 + $0x80] sm:$0x1] }
 0x29a   : > { %v2772_v52 = vld [vmem:[#allocation2 + $0x87] sm:$0x1]  ;;  %2732 = vst [vmem:[#allocation2 + $0x7f] sm:$0x1] %v2692_v27  ;;  %v2594_v2 = vmul.f32 0.01, %v2468_v32 }
 0x29b   : > { %2812 = vst [vmem:[#allocation2 + $0x88] sm:$0x1] %v2772_v52  ;;  %2655 = vst [vmem:[#allocation2 + $0x110] sm:$0xff] %v2623_v61  ;;  %v2695_v14 = vld [vmem:[#allocation2 + $0xc8] sm:$0x1]  ;;  %vm2560_vm11 = vcmp.gt.f32.partialorder %v2460_v21, 0.0 }
 0x29c   : > { %2680 = vst [vmem:[#allocation2 + $0xf8] sm:$0xff] %v2623_v61  ;;  %v2696_v60 = vld [vmem:[#allocation2 + $0xe0] sm:$0x1]  ;;  %v2775_v58 = vld [vmem:[#allocation2 + $0xcf] sm:$0x1]  ;;  %v2626_v59 = vsel %vm2562_vm10, %v2468_v32, %v2594_v2  ;;  %v5873_v63 = vmul.f32 0.75, %v2623_v61 }
 0x29d   : > { %2735 = vst [vmem:[#allocation2 + $0xc7] sm:$0x1] %v2695_v14  ;;  %2736 = vst [vmem:[#allocation2 + $0xdf] sm:$0x1] %v2696_v60  ;;  %v2776_v23 = vld [vmem:[#allocation2 + $0xe7] sm:$0x1] }
 0x29e   : > { %2815 = vst [vmem:[#allocation2 + $0xd0] sm:$0x1] %v2775_v58  ;;  %v2693_v22 = vld [vmem:[#allocation2 + $0x98] sm:$0x1]  ;;  %v2773_v42 = vld [vmem:[#allocation2 + $0x9f] sm:$0x1] }
 0x29f   : > { %2658 = vst [vmem:[#allocation2 + $0x158] sm:$0xff] %v2626_v59  ;;  %2816 = vst [vmem:[#allocation2 + $0xe8] sm:$0x1] %v2776_v23  ;;  %v2592_v6 = vmul.f32 0.01, %v2460_v21  ;;  %v5875_v39 = vmul.f32 0.75, %v2626_v59 }
 0x2a0   : > { %2733 = vst [vmem:[#allocation2 + $0x97] sm:$0x1] %v2693_v22  ;;  %2813 = vst [vmem:[#allocation2 + $0xa0] sm:$0x1] %v2773_v42  ;;  %v2854_v19 = vld [vmem:[#allocation2 + $0xaf] sm:$0xff] }
 0x2a1   : > { %v2934_v26 = vld [vmem:[#allocation2 + $0xb1] sm:$0xff]  ;;  %v3014_v40 = vmul.f32 0.25, %v2854_v19  ;;  %v2700_v38 = vld [vmem:[#allocation2 + $0x140] sm:$0x1]  ;;  %v2780_v62 = vld [vmem:[#allocation2 + $0x147] sm:$0x1]  ;;  %v2624_v50 = vsel %vm2560_vm11, %v2460_v21, %v2592_v6 }
 0x2a2   : > { %v3094_v54 = vmul.f32 0.25, %v2934_v26  ;;  %v2852_v12 = vld [vmem:[#allocation2 + $0x7f] sm:$0xff]  ;;  %2740 = vst [vmem:[#allocation2 + $0x13f] sm:$0x1] %v2700_v38  ;;  %2820 = vst [vmem:[#allocation2 + $0x148] sm:$0x1] %v2780_v62 }
 0x2a3   : > { %v2932_v37 = vld [vmem:[#allocation2 + $0x81] sm:$0xff]  ;;  %2656 = vst [vmem:[#allocation2 + $0x128] sm:$0xff] %v2624_v50  ;;  %v3054_v45 = vadd.f32 %v3014_v40, %v2974_v3  ;;  %v3012_v7 = vmul.f32 0.25, %v2852_v12  ;;  %v2697_v11 = vld [vmem:[#allocation2 + $0xf8] sm:$0x1]  ;;  %v5883_v35 = vmul.f32 0.75, %v2624_v50 }
 0x2a4   : > { %v3134_v43 = vadd.f32 %v3094_v54, %v2974_v3  ;;  %v3092_v55 = vmul.f32 0.25, %v2932_v37  ;;  %v2698_v16 = vld [vmem:[#allocation2 + $0x110] sm:$0x1]  ;;  %2737 = vst [vmem:[#allocation2 + $0xf7] sm:$0x1] %v2697_v11  ;;  %v2855_v57 = vld [vmem:[#allocation2 + $0xc7] sm:$0xff] }
 0x2a5   : > { %2738 = vst [vmem:[#allocation2 + $0x10f] sm:$0x1] %v2698_v16  ;;  %v2777_v28 = vld [vmem:[#allocation2 + $0xff] sm:$0x1]  ;;  %v2778_v5 = vld [vmem:[#allocation2 + $0x117] sm:$0x1]  ;;  %v3052_v29 = vadd.f32 %v3012_v7, %v2972_v31 }
 0x2a6   : > { %v5877_v41 = vmul.f32 0.75, %v3054_v45  ;;  %v5879_v34 = vmul.f32 0.25, %v3054_v45  ;;  %v5881_v9 = vmul.f32 0.75, %v3134_v43  ;;  %v2856_v13 = vld [vmem:[#allocation2 + $0xdf] sm:$0xff]  ;;  %2817 = vst [vmem:[#allocation2 + $0x100] sm:$0x1] %v2777_v28  ;;  %v3132_v0 = vadd.f32 %v3092_v55, %v2972_v31 }
 0x2a7   : > { %2818 = vst [vmem:[#allocation2 + $0x118] sm:$0x1] %v2778_v5  ;;  %v2935_v8 = vld [vmem:[#allocation2 + $0xc9] sm:$0xff]  ;;  %v2936_v20 = vld [vmem:[#allocation2 + $0xe1] sm:$0xff]  ;;  %v3015_v49 = vmul.f32 0.25, %v2855_v57  ;;  %v3016_v56 = vmul.f32 0.25, %v2856_v13 }
 0x2a8   : > { %v2853_v48 = vld [vmem:[#allocation2 + $0x97] sm:$0xff]  ;;  %v5885_v18 = vmul.f32 0.25, %v3134_v43  ;;  %v3095_v53 = vmul.f32 0.25, %v2935_v8  ;;  %v3096_v4 = vmul.f32 0.25, %v2936_v20  ;;  %v3171_v44 = vmul.f32 0.75, %v3052_v29 }
 0x2a9   : > { %v3013_v1 = vmul.f32 0.25, %v2853_v48  ;;  %v2701_v24 = vld [vmem:[#allocation2 + $0x158] sm:$0x1]  ;;  %v3204_v47 = vmul.f32 0.25, %v3052_v29  ;;  %v5887_v32 = vmul.f32 0.75, %v3132_v0  ;;  %v5889_v27 = vmul.f32 0.25, %v3132_v0 }
 0x2aa   : > { %2741 = vst [vmem:[#allocation2 + $0x157] sm:$0x1] %v2701_v24  ;;  %v2781_v52 = vld [vmem:[#allocation2 + $0x15f] sm:$0x1]  ;;  %v3055_v15 = vadd.f32 %v3015_v49, %v2975_v46  ;;  %v3056_v61 = vadd.f32 %v3016_v56, %v2975_v46  ;;  %v3135_v2 = vadd.f32 %v3095_v53, %v2975_v46  ;;  %v3136_v21 = vadd.f32 %v3096_v4, %v2975_v46  ;;  %v2699_v60 = vld [vmem:[#allocation2 + $0x128] sm:$0x1] }
 0x2ab   : > { %v2933_v14 = vld [vmem:[#allocation2 + $0x99] sm:$0xff]  ;;  %2821 = vst [vmem:[#allocation2 + $0x160] sm:$0x1] %v2781_v52  ;;  %v3235_v58 = vadd.f32 %v5823_v30, %v3171_v44  ;;  %v3331_v59 = vadd.f32 %v5830_v51, %v5887_v32  ;;  %v3370_v23 = vadd.f32 %v3204_v47, %v5821_v10  ;;  %v3410_v22 = vadd.f32 %v5889_v27, %v5825_v33  ;;  %v2779_v42 = vld [vmem:[#allocation2 + $0x12f] sm:$0x1]  ;;  %v2940_v54 = vld [vmem:[#allocation2 + $0x141] sm:$0xff] }
 0x2ac   : > { %2739 = vst [vmem:[#allocation2 + $0x127] sm:$0x1] %v2699_v60  ;;  %v3174_v6 = vmul.f32 0.75, %v3055_v15  ;;  %v3270_v19 = vmul.f32 0.75, %v3135_v2  ;;  %v3359_v26 = vmul.f32 0.25, %v3055_v15  ;;  %v3360_v3 = vmul.f32 0.25, %v3056_v61 }
 0x2ad   : > { %2819 = vst [vmem:[#allocation2 + $0x130] sm:$0x1] %v2779_v42  ;;  %3443 = vst [vmem:[%s5827_s15 + $0x80] sm:$0xff] %v3235_v58  ;;  %v3399_v30 = vmul.f32 0.25, %v3135_v2  ;;  %v3400_v51 = vmul.f32 0.25, %v3136_v21  ;;  %v3053_v10 = vadd.f32 %v3013_v1, %v5869_v36  ;;  %v3093_v33 = vmul.f32 0.25, %v2933_v14 }
 0x2ae   : > { %3475 = vst [vmem:[%s5827_s15 + $0x88] sm:$0xff] %v3331_v59  ;;  %3751 = vst [vmem:[%s5827_s15 + $0x70] sm:$0xff] %v3370_v23  ;;  %v2860_v40 = vld [vmem:[#allocation2 + $0x13f] sm:$0xff]  ;;  %v2857_v38 = vld [vmem:[#allocation2 + $0xf7] sm:$0xff]  ;;  %v3238_v62 = vadd.f32 %v5879_v34, %v3174_v6  ;;  %v3334_v50 = vadd.f32 %v5885_v18, %v3270_v19  ;;  %v3373_v12 = vadd.f32 %v3359_v26, %v5877_v41  ;;  %v3100_v11 = vmul.f32 0.25, %v2940_v54 }
 0x2af   : > { %3783 = vst [vmem:[%s5827_s15 + $0x78] sm:$0xff] %v3410_v22  ;;  %v3374_v37 = vadd.f32 %v3360_v3, %v3174_v6  ;;  %v3413_v31 = vadd.f32 %v3399_v30, %v5881_v9  ;;  %v3414_v46 = vadd.f32 %v3400_v51, %v3270_v19  ;;  %v3133_v45 = vadd.f32 %v3093_v33, %v5869_v36  ;;  %v2858_v29 = vld [vmem:[#allocation2 + $0x10f] sm:$0xff]  ;;  %v5914_v36 = vpop.f32.mrf.mxu1  ;;  %v2937_v56 = vld [vmem:[#allocation2 + $0xf9] sm:$0xff] }
 0x2b0   : > { %v3172_v43 = vmul.f32 0.75, %v3053_v10  ;;  %3446 = vst [vmem:[%s5827_s15 + $0xe0] sm:$0xff] %v3238_v62  ;;  %3478 = vst [vmem:[%s5827_s15 + $0xe8] sm:$0xff] %v3334_v50  ;;  %v3205_v7 = vmul.f32 0.25, %v3053_v10  ;;  %v3020_v55 = vmul.f32 0.25, %v2860_v40  ;;  %v3017_v16 = vmul.f32 0.25, %v2857_v38 }
 0x2b1   : > { %3754 = vst [vmem:[%s5827_s15 + $0xd0] sm:$0xff] %v3373_v12  ;;  %3755 = vst [vmem:[%s5827_s15 + $0xf0] sm:$0xff] %v3374_v37  ;;  %v3268_v5 = vmul.f32 0.75, %v3133_v45  ;;  %v3301_v57 = vmul.f32 0.25, %v3133_v45  ;;  %v3140_v49 = vadd.f32 %v3100_v11, %v5871_v17  ;;  %v2938_v48 = vld [vmem:[#allocation2 + $0x111] sm:$0xff]  ;;  %v3097_v61 = vmul.f32 0.25, %v2937_v56  ;;  %v2472_v2 = vpop.f32.mrf.mxu1 }
 0x2b2   : > { %3786 = vst [vmem:[%s5827_s15 + $0xd8] sm:$0xff] %v3413_v31  ;;  %3787 = vst [vmem:[%s5827_s15 + $0xf8] sm:$0xff] %v3414_v46  ;;  %v3236_v28 = vadd.f32 %v3204_v47, %v3172_v43  ;;  %v3372_v13 = vadd.f32 %v5879_v34, %v3172_v43  ;;  %v3237_v0 = vadd.f32 %v3205_v7, %v5877_v41  ;;  %v2861_v53 = vld [vmem:[#allocation2 + $0x157] sm:$0xff] }
 0x2b3   : > { %v3371_v8 = vadd.f32 %v3205_v7, %v3171_v44  ;;  %v3060_v20 = vadd.f32 %v3020_v55, %v5871_v17  ;;  %v3332_v4 = vadd.f32 %v5889_v27, %v3268_v5  ;;  %v3333_v34 = vadd.f32 %v3301_v57, %v5881_v9  ;;  %v2941_v24 = vld [vmem:[#allocation2 + $0x159] sm:$0xff]  ;;  %v2859_v44 = vld [vmem:[#allocation2 + $0x127] sm:$0xff]  ;;  %v3949_v40 = vpop.f32.mrf.mxu1 }
 0x2b4   : > { %v3411_v1 = vadd.f32 %v3301_v57, %v5887_v32  ;;  %v3412_v41 = vadd.f32 %v5885_v18, %v3268_v5  ;;  %3444 = vst [vmem:[%s5827_s15 + $0xa0] sm:$0xff] %v3236_v28  ;;  %3753 = vst [vmem:[%s5827_s15 + $0xb0] sm:$0xff] %v3372_v13  ;;  %v2939_v17 = vld [vmem:[#allocation2 + $0x129] sm:$0xff]  ;;  %v3273_v15 = vmul.f32 0.75, %v3140_v49  ;;  %v3306_v27 = vmul.f32 0.25, %v3140_v49 }
 0x2b5   : > { %3445 = vst [vmem:[%s5827_s15 + $0xc0] sm:$0xff] %v3237_v0  ;;  %3752 = vst [vmem:[%s5827_s15 + $0x90] sm:$0xff] %v3371_v8  ;;  %v3177_v47 = vmul.f32 0.75, %v3060_v20  ;;  %v3210_v52 = vmul.f32 0.25, %v3060_v20  ;;  %v3018_v9 = vmul.f32 0.25, %v2858_v29  ;;  %v3057_v32 = vadd.f32 %v3017_v16, %v5873_v63  ;;  %v2475_v16 = vpop.f32.mrf.mxu1 }
 0x2b6   : > { %3476 = vst [vmem:[%s5827_s15 + $0xa8] sm:$0xff] %v3332_v4  ;;  %3477 = vst [vmem:[%s5827_s15 + $0xc8] sm:$0xff] %v3333_v34  ;;  %v3098_v18 = vmul.f32 0.25, %v2938_v48  ;;  %v3021_v21 = vmul.f32 0.25, %v2861_v53  ;;  %v3101_v14 = vmul.f32 0.25, %v2941_v24  ;;  %v3019_v60 = vmul.f32 0.25, %v2859_v44 }
 0x2b7   : > { %3784 = vst [vmem:[%s5827_s15 + $0x98] sm:$0xff] %v3411_v1  ;;  %3785 = vst [vmem:[%s5827_s15 + $0xb8] sm:$0xff] %v3412_v41  ;;  %v3099_v58 = vmul.f32 0.25, %v2939_v17  ;;  %v3058_v59 = vadd.f32 %v3018_v9, %v5873_v63  ;;  %v3137_v23 = vadd.f32 %v3097_v61, %v5873_v63  ;;  %v3207_v42 = vmul.f32 0.25, %v3057_v32 }
 0x2b8   : > { %v3138_v22 = vadd.f32 %v3098_v18, %v5873_v63  ;;  %v3061_v6 = vadd.f32 %v3021_v21, %v5875_v39  ;;  %v3141_v19 = vadd.f32 %v3101_v14, %v5875_v39  ;;  %v3059_v26 = vadd.f32 %v3019_v60, %v5883_v35 }
 0x2b9   : > { %v3139_v3 = vadd.f32 %v3099_v58, %v5883_v35  ;;  %v3175_v30 = vmul.f32 0.75, %v3058_v59  ;;  %v3208_v51 = vmul.f32 0.25, %v3058_v59  ;;  %v3303_v33 = vmul.f32 0.25, %v3137_v23 }
 0x2ba   : > { %v3271_v10 = vmul.f32 0.75, %v3138_v22  ;;  %v3304_v54 = vmul.f32 0.25, %v3138_v22  ;;  %v5939_v38 = vmul.f32 0.75, %v3061_v6  ;;  %v5941_v63 = vmul.f32 0.25, %v3061_v6 }
 0x2bb   : > { %v5943_v62 = vmul.f32 0.75, %v3141_v19  ;;  %v3239_v39 = vadd.f32 %v3207_v42, %v3175_v30  ;;  %v5945_v35 = vmul.f32 0.25, %v3141_v19  ;;  %v3176_v12 = vmul.f32 0.75, %v3059_v26 }
 0x2bc   : > { %v3335_v50 = vadd.f32 %v3303_v33, %v3271_v10  ;;  %v3242_v37 = vadd.f32 %v3210_v52, %v5939_v38  ;;  %v3377_v46 = vadd.f32 %v5941_v63, %v3177_v47  ;;  %v3209_v45 = vmul.f32 0.25, %v3059_v26 }
 0x2bd   : > { %v3338_v31 = vadd.f32 %v3306_v27, %v5943_v62  ;;  %3447 = vst [vmem:[%s5827_s15 + $0x100] sm:$0xff] %v3239_v39  ;;  %v3417_v43 = vadd.f32 %v5945_v35, %v3273_v15  ;;  %v3240_v7 = vadd.f32 %v3208_v51, %v3176_v12  ;;  %v3272_v55 = vmul.f32 0.75, %v3139_v3  ;;  %v3952_v53 = vpop.f32.mrf.mxu1 }
 0x2be   : > { %3479 = vst [vmem:[%s5827_s15 + $0x108] sm:$0xff] %v3335_v50  ;;  %v3305_v11 = vmul.f32 0.25, %v3139_v3  ;;  %3450 = vst [vmem:[%s5827_s15 + $0x160] sm:$0xff] %v3242_v37  ;;  %v3241_v28 = vadd.f32 %v3209_v45, %v3177_v47  ;;  %v3375_v5 = vadd.f32 %v3209_v45, %v3175_v30  ;;  %v3376_v57 = vadd.f32 %v3210_v52, %v3176_v12 }
 0x2bf   : > { %3482 = vst [vmem:[%s5827_s15 + $0x168] sm:$0xff] %v3338_v31  ;;  %3758 = vst [vmem:[%s5827_s15 + $0x150] sm:$0xff] %v3377_v46  ;;  %v2481_v13 = vadd.f32 %v5914_v36, %v5806_v25  ;;  %v3336_v29 = vadd.f32 %v3304_v54, %v3272_v55  ;;  %v3416_v20 = vadd.f32 %v3306_v27, %v3272_v55  ;;  %v2488_v24 = vpop.f32.mrf.mxu1 }
 0x2c0   : > { %3790 = vst [vmem:[%s5827_s15 + $0x158] sm:$0xff] %v3417_v43  ;;  %v3337_v0 = vadd.f32 %v3305_v11, %v3273_v15  ;;  %v3415_v8 = vadd.f32 %v3305_v11, %v3271_v10  ;;  %3448 = vst [vmem:[%s5827_s15 + $0x120] sm:$0xff] %v3240_v7  ;;  %v2473_v56 = vadd.f32 %v5806_v25, %v2472_v2 }
 0x2c1   : > { %3449 = vst [vmem:[%s5827_s15 + $0x140] sm:$0xff] %v3241_v28  ;;  %3756 = vst [vmem:[%s5827_s15 + $0x110] sm:$0xff] %v3375_v5  ;;  %vm2565_vm12 = vcmp.gt.f32.partialorder %v2481_v13, 0.0  ;;  %v2597_v49 = vmul.f32 0.01, %v2481_v13  ;;  %v2484_v48 = vadd.f32 %v3949_v40, %v5806_v25  ;;  %v2476_v36 = vadd.f32 %v5806_v25, %v2475_v16  ;;  %v3953_v27 = vpop.f32.mrf.mxu1 }
 0x2c2   : > { %3757 = vst [vmem:[%s5827_s15 + $0x130] sm:$0xff] %v3376_v57  ;;  %3480 = vst [vmem:[%s5827_s15 + $0x128] sm:$0xff] %v3336_v29  ;;  %vm2563_vm13 = vcmp.gt.f32.partialorder %v2473_v56, 0.0  ;;  %v2595_v34 = vmul.f32 0.01, %v2473_v56  ;;  %v2497_v17 = vadd.f32 %v3952_v53, %v5806_v25  ;;  %v2489_v47 = vadd.f32 %v5806_v25, %v2488_v24 }
 0x2c3   : > { %3481 = vst [vmem:[%s5827_s15 + $0x148] sm:$0xff] %v3337_v0  ;;  %3788 = vst [vmem:[%s5827_s15 + $0x118] sm:$0xff] %v3415_v8  ;;  %v2629_v4 = vsel %vm2565_vm12, %v2481_v13, %v2597_v49  ;;  %vm2566_vm14 = vcmp.gt.f32.partialorder %v2484_v48, 0.0  ;;  %v2598_v1 = vmul.f32 0.01, %v2484_v48  ;;  %vm2564_vm15 = vcmp.gt.f32.partialorder %v2476_v36, 0.0  ;;  %v2491_v18 = vpop.f32.mrf.mxu1 }
 0x2c4   : > { %3789 = vst [vmem:[%s5827_s15 + $0x138] sm:$0xff] %v3416_v20  ;;  %2661 = vst [vmem:[#allocation2 + $0x1a0] sm:$0xff] %v2629_v4  ;;  %v2596_v41 = vmul.f32 0.01, %v2476_v36  ;;  %v2627_v44 = vsel %vm2563_vm13, %v2473_v56, %v2595_v34  ;;  %vm2569_vm0 = vcmp.gt.f32.partialorder %v2497_v17, 0.0  ;;  %vm2567_vm1 = vcmp.gt.f32.partialorder %v2489_v47, 0.0 }
 0x2c5   : > { %2659 = vst [vmem:[#allocation2 + $0x170] sm:$0xff] %v2627_v44  ;;  %v2630_v52 = vsel %vm2566_vm14, %v2484_v48, %v2598_v1  ;;  %v2601_v9 = vmul.f32 0.01, %v2497_v17  ;;  %v2599_v32 = vmul.f32 0.01, %v2489_v47  ;;  %v2500_v61 = vadd.f32 %v3953_v27, %v5806_v25 }
 0x2c6   : > { %v2628_v15 = vsel %vm2564_vm15, %v2476_v36, %v2596_v41  ;;  %2662 = vst [vmem:[#allocation2 + $0x1b8] sm:$0xff] %v2630_v52  ;;  %2684 = vst [vmem:[#allocation2 + $0x1d0] sm:$0xff] %v2630_v52  ;;  %v2492_v21 = vadd.f32 %v5806_v25, %v2491_v18  ;;  %v2984_v33 = vmul.f32 0.75, %v2629_v4  ;;  %v2982_v40 = vmul.f32 0.75, %v2627_v44 }
 0x2c7   : > { %2660 = vst [vmem:[#allocation2 + $0x188] sm:$0xff] %v2628_v15  ;;  %v2633_v2 = vsel %vm2569_vm0, %v2497_v17, %v2601_v9  ;;  %v2631_v14 = vsel %vm2567_vm1, %v2489_v47, %v2599_v32  ;;  %vm2570_vm2 = vcmp.gt.f32.partialorder %v2500_v61, 0.0  ;;  %v2602_v60 = vmul.f32 0.01, %v2500_v61 }
 0x2c8   : > { %2665 = vst [vmem:[#allocation2 + $0x230] sm:$0xff] %v2633_v2  ;;  %2663 = vst [vmem:[#allocation2 + $0x200] sm:$0xff] %v2631_v14  ;;  %vm2568_vm3 = vcmp.gt.f32.partialorder %v2492_v21, 0.0  ;;  %v2600_v22 = vmul.f32 0.01, %v2492_v21  ;;  %v2985_v45 = vmul.f32 0.75, %v2630_v52 }
 0x2c9   : > { %2681 = vst [vmem:[#allocation2 + $0x1e8] sm:$0xff] %v2631_v14  ;;  %v2634_v23 = vsel %vm2570_vm2, %v2500_v61, %v2602_v60  ;;  %v5974_v43 = vmul.f32 0.75, %v2628_v15  ;;  %v5976_v13 = vmul.f32 0.75, %v2633_v2  ;;  %v5978_v29 = vmul.f32 0.75, %v2631_v14 }
 0x2ca   : > { %2666 = vst [vmem:[#allocation2 + $0x248] sm:$0xff] %v2634_v23  ;;  %v2632_v3 = vsel %vm2568_vm3, %v2492_v21, %v2600_v22  ;;  %v5980_v0 = vmul.f32 0.75, %v2634_v23 }
 0x2cb   : > { %v2704_v58 = vld [vmem:[#allocation2 + $0x1a0] sm:$0x1]  ;;  %v2784_v59 = vld [vmem:[#allocation2 + $0x1a7] sm:$0x1]  ;;  %2664 = vst [vmem:[#allocation2 + $0x218] sm:$0xff] %v2632_v3  ;;  %v5982_v8 = vmul.f32 0.75, %v2632_v3 }
 0x2cc   : > { %2744 = vst [vmem:[#allocation2 + $0x19f] sm:$0x1] %v2704_v58  ;;  %2824 = vst [vmem:[#allocation2 + $0x1a8] sm:$0x1] %v2784_v59  ;;  %v2702_v42 = vld [vmem:[#allocation2 + $0x170] sm:$0x1] }
 0x2cd   : > { %v2782_v6 = vld [vmem:[#allocation2 + $0x177] sm:$0x1]  ;;  %2742 = vst [vmem:[#allocation2 + $0x16f] sm:$0x1] %v2702_v42  ;;  %v2705_v19 = vld [vmem:[#allocation2 + $0x1b8] sm:$0x1] }
 0x2ce   : > { %2822 = vst [vmem:[#allocation2 + $0x178] sm:$0x1] %v2782_v6  ;;  %v2706_v25 = vld [vmem:[#allocation2 + $0x1d0] sm:$0x1]  ;;  %v2785_v26 = vld [vmem:[#allocation2 + $0x1bf] sm:$0x1] }
 0x2cf   : > { %2745 = vst [vmem:[#allocation2 + $0x1b7] sm:$0x1] %v2705_v19  ;;  %2746 = vst [vmem:[#allocation2 + $0x1cf] sm:$0x1] %v2706_v25  ;;  %v2786_v30 = vld [vmem:[#allocation2 + $0x1d7] sm:$0x1] }
 0x2d0   : > { %2825 = vst [vmem:[#allocation2 + $0x1c0] sm:$0x1] %v2785_v26  ;;  %v2703_v51 = vld [vmem:[#allocation2 + $0x188] sm:$0x1]  ;;  %v2783_v10 = vld [vmem:[#allocation2 + $0x18f] sm:$0x1] }
 0x2d1   : > { %2826 = vst [vmem:[#allocation2 + $0x1d8] sm:$0x1] %v2786_v30  ;;  %2743 = vst [vmem:[#allocation2 + $0x187] sm:$0x1] %v2703_v51  ;;  %v2710_v54 = vld [vmem:[#allocation2 + $0x230] sm:$0x1] }
 0x2d2   : > { %2823 = vst [vmem:[#allocation2 + $0x190] sm:$0x1] %v2783_v10  ;;  %v2790_v39 = vld [vmem:[#allocation2 + $0x237] sm:$0x1]  ;;  %2750 = vst [vmem:[#allocation2 + $0x22f] sm:$0x1] %v2710_v54 }
 0x2d3   : > { %2830 = vst [vmem:[#allocation2 + $0x238] sm:$0x1] %v2790_v39  ;;  %v2707_v50 = vld [vmem:[#allocation2 + $0x1e8] sm:$0x1]  ;;  %v2708_v12 = vld [vmem:[#allocation2 + $0x200] sm:$0x1] }
 0x2d4   : > { %v2787_v37 = vld [vmem:[#allocation2 + $0x1ef] sm:$0x1]  ;;  %v2864_v31 = vld [vmem:[#allocation2 + $0x19f] sm:$0xff]  ;;  %2747 = vst [vmem:[#allocation2 + $0x1e7] sm:$0x1] %v2707_v50  ;;  %v5992_v32 = vpop.f32.mrf.mxu1 }
 0x2d5   : > { %v2944_v46 = vld [vmem:[#allocation2 + $0x1a1] sm:$0xff]  ;;  %2748 = vst [vmem:[#allocation2 + $0x1ff] sm:$0x1] %v2708_v12  ;;  %2827 = vst [vmem:[#allocation2 + $0x1f0] sm:$0x1] %v2787_v37  ;;  %v3024_v55 = vmul.f32 0.25, %v2864_v31 }
 0x2d6   : > { %v2788_v7 = vld [vmem:[#allocation2 + $0x207] sm:$0x1]  ;;  %v3104_v11 = vmul.f32 0.25, %v2944_v46  ;;  %v2711_v16 = vld [vmem:[#allocation2 + $0x248] sm:$0x1]  ;;  %v2862_v5 = vld [vmem:[#allocation2 + $0x16f] sm:$0xff]  ;;  %v5994_v51 = vpop.f32.mrf.mxu1 }
 0x2d7   : > { %2828 = vst [vmem:[#allocation2 + $0x208] sm:$0x1] %v2788_v7  ;;  %v2791_v28 = vld [vmem:[#allocation2 + $0x24f] sm:$0x1]  ;;  %v2942_v57 = vld [vmem:[#allocation2 + $0x171] sm:$0xff]  ;;  %v3064_v20 = vadd.f32 %v3024_v55, %v2984_v33  ;;  %v3022_v56 = vmul.f32 0.25, %v2862_v5 }
 0x2d8   : > { %2751 = vst [vmem:[#allocation2 + $0x247] sm:$0x1] %v2711_v16  ;;  %2831 = vst [vmem:[#allocation2 + $0x250] sm:$0x1] %v2791_v28  ;;  %v3144_v49 = vadd.f32 %v3104_v11, %v2984_v33  ;;  %v3102_v48 = vmul.f32 0.25, %v2942_v57  ;;  %v2865_v36 = vld [vmem:[#allocation2 + $0x1b7] sm:$0xff]  ;;  %v6012_v28 = vpop.f32.mrf.mxu1 }
 0x2d9   : > { %v2866_v53 = vld [vmem:[#allocation2 + $0x1cf] sm:$0xff]  ;;  %v2945_v4 = vld [vmem:[#allocation2 + $0x1b9] sm:$0xff]  ;;  %v3025_v1 = vmul.f32 0.25, %v2865_v36  ;;  %v2863_v44 = vld [vmem:[#allocation2 + $0x187] sm:$0xff]  ;;  %v5984_v47 = vmul.f32 0.75, %v3064_v20  ;;  %v5986_v52 = vmul.f32 0.25, %v3064_v20  ;;  %v3062_v61 = vadd.f32 %v3022_v56, %v2982_v40 }
 0x2da   : > { %v2946_v34 = vld [vmem:[#allocation2 + $0x1d1] sm:$0xff]  ;;  %v3026_v41 = vmul.f32 0.25, %v2866_v53  ;;  %v3105_v24 = vmul.f32 0.25, %v2945_v4  ;;  %v2943_v17 = vld [vmem:[#allocation2 + $0x189] sm:$0xff]  ;;  %v5988_v15 = vmul.f32 0.75, %v3144_v49  ;;  %v5990_v27 = vmul.f32 0.25, %v3144_v49 }
 0x2db   : > { %v2709_v9 = vld [vmem:[#allocation2 + $0x218] sm:$0x1]  ;;  %v3142_v18 = vadd.f32 %v3102_v48, %v2982_v40  ;;  %v3065_v2 = vadd.f32 %v3025_v1, %v2985_v45  ;;  %v2789_v14 = vld [vmem:[#allocation2 + $0x21f] sm:$0x1]  ;;  %v3106_v60 = vmul.f32 0.25, %v2946_v34  ;;  %v3023_v59 = vmul.f32 0.25, %v2863_v44 }
 0x2dc   : > { %v3066_v21 = vadd.f32 %v3026_v41, %v2985_v45  ;;  %2749 = vst [vmem:[#allocation2 + $0x217] sm:$0x1] %v2709_v9  ;;  %v3145_v58 = vadd.f32 %v3105_v24, %v2985_v45  ;;  %v3103_v23 = vmul.f32 0.25, %v2943_v17  ;;  %2829 = vst [vmem:[#allocation2 + $0x220] sm:$0x1] %v2789_v14  ;;  %v3179_v22 = vmul.f32 0.75, %v3062_v61  ;;  %v6024_v14 = vpop.f32.mrf.mxu1 }
 0x2dd   : > { %v3212_v42 = vmul.f32 0.25, %v3062_v61  ;;  %v3275_v6 = vmul.f32 0.75, %v3142_v18  ;;  %v3308_v19 = vmul.f32 0.25, %v3142_v18  ;;  %v3146_v25 = vadd.f32 %v3106_v60, %v2985_v45  ;;  %v2870_v39 = vld [vmem:[#allocation2 + $0x22f] sm:$0xff]  ;;  %v2867_v12 = vld [vmem:[#allocation2 + $0x1e7] sm:$0xff]  ;;  %v2868_v53 = vld [vmem:[#allocation2 + $0x1ff] sm:$0xff] }
 0x2de   : > { %v3182_v26 = vmul.f32 0.75, %v3065_v2  ;;  %v3278_v3 = vmul.f32 0.75, %v3145_v58  ;;  %v3361_v30 = vmul.f32 0.25, %v3065_v2  ;;  %v3243_v10 = vadd.f32 %v5941_v63, %v3179_v22  ;;  %v2950_v50 = vld [vmem:[#allocation2 + $0x231] sm:$0xff]  ;;  %v2947_v24 = vld [vmem:[#allocation2 + $0x1e9] sm:$0xff]  ;;  %v2948_v44 = vld [vmem:[#allocation2 + $0x201] sm:$0xff] }
 0x2df   : > { %v3339_v33 = vadd.f32 %v5945_v35, %v3275_v6  ;;  %v3378_v40 = vadd.f32 %v3212_v42, %v5939_v38  ;;  %v3418_v54 = vadd.f32 %v3308_v19, %v5943_v62  ;;  %v3362_v46 = vmul.f32 0.25, %v3066_v21  ;;  %v2871_v17 = vld [vmem:[#allocation2 + $0x247] sm:$0xff] }
 0x2e0   : > { %v3246_v37 = vadd.f32 %v5986_v52, %v3182_v26  ;;  %v3342_v31 = vadd.f32 %v5990_v27, %v3278_v3  ;;  %v3381_v45 = vadd.f32 %v3361_v30, %v5984_v47  ;;  %3451 = vst [vmem:[%s5827_s15 + $0x180] sm:$0xff] %v3243_v10  ;;  %v3401_v38 = vmul.f32 0.25, %v3145_v58  ;;  %v2951_v2 = vld [vmem:[#allocation2 + $0x249] sm:$0xff] }
 0x2e1   : > { %3483 = vst [vmem:[%s5827_s15 + $0x188] sm:$0xff] %v3339_v33  ;;  %3759 = vst [vmem:[%s5827_s15 + $0x170] sm:$0xff] %v3378_v40  ;;  %v3402_v63 = vmul.f32 0.25, %v3146_v25  ;;  %v3063_v62 = vadd.f32 %v3023_v59, %v5974_v43  ;;  %v3143_v35 = vadd.f32 %v3103_v23, %v5974_v43  ;;  %v3382_v7 = vadd.f32 %v3362_v46, %v3182_v26 }
 0x2e2   : > { %3791 = vst [vmem:[%s5827_s15 + $0x178] sm:$0xff] %v3418_v54  ;;  %3454 = vst [vmem:[%s5827_s15 + $0x1e0] sm:$0xff] %v3246_v37  ;;  %v3030_v55 = vmul.f32 0.25, %v2870_v39  ;;  %v3110_v11 = vmul.f32 0.25, %v2950_v50  ;;  %v3027_v16 = vmul.f32 0.25, %v2867_v12  ;;  %v3421_v5 = vadd.f32 %v3401_v38, %v5988_v15 }
 0x2e3   : > { %3486 = vst [vmem:[%s5827_s15 + $0x1e8] sm:$0xff] %v3342_v31  ;;  %3762 = vst [vmem:[%s5827_s15 + $0x1d0] sm:$0xff] %v3381_v45  ;;  %v3422_v57 = vadd.f32 %v3402_v63, %v3278_v3  ;;  %v3180_v20 = vmul.f32 0.75, %v3063_v62  ;;  %v3213_v49 = vmul.f32 0.25, %v3063_v62  ;;  %v3276_v56 = vmul.f32 0.75, %v3143_v35  ;;  %v2949_v21 = vld [vmem:[#allocation2 + $0x219] sm:$0xff]  ;;  %v3960_v33 = vpop.f32.mrf.mxu1 }
 0x2e4   : > { %3763 = vst [vmem:[%s5827_s15 + $0x1f0] sm:$0xff] %v3382_v7  ;;  %v3309_v48 = vmul.f32 0.25, %v3143_v35  ;;  %v3070_v43 = vadd.f32 %v3030_v55, %v5976_v13  ;;  %v3150_v36 = vadd.f32 %v3110_v11, %v5976_v13  ;;  %3794 = vst [vmem:[%s5827_s15 + $0x1d8] sm:$0xff] %v3421_v5  ;;  %v3107_v23 = vmul.f32 0.25, %v2947_v24 }
 0x2e5   : > { %3795 = vst [vmem:[%s5827_s15 + $0x1f8] sm:$0xff] %v3422_v57  ;;  %v3244_v4 = vadd.f32 %v3212_v42, %v3180_v20  ;;  %v3245_v34 = vadd.f32 %v3213_v49, %v5984_v47  ;;  %v3379_v1 = vadd.f32 %v3213_v49, %v3179_v22  ;;  %v3380_v41 = vadd.f32 %v5986_v52, %v3180_v20  ;;  %v2869_v47 = vld [vmem:[#allocation2 + $0x217] sm:$0xff]  ;;  %v2520_v62 = vpop.f32.mrf.mxu1 }
 0x2e6   : > { %v3340_v9 = vadd.f32 %v3308_v19, %v3276_v56  ;;  %v3341_v13 = vadd.f32 %v3309_v48, %v5988_v15  ;;  %v3419_v61 = vadd.f32 %v3309_v48, %v3275_v6  ;;  %v3420_v18 = vadd.f32 %v5990_v27, %v3276_v56 }
 0x2e7   : > { %3452 = vst [vmem:[%s5827_s15 + $0x1a0] sm:$0xff] %v3244_v4  ;;  %3453 = vst [vmem:[%s5827_s15 + $0x1c0] sm:$0xff] %v3245_v34  ;;  %v3185_v52 = vmul.f32 0.75, %v3070_v43  ;;  %v3218_v60 = vmul.f32 0.25, %v3070_v43  ;;  %v3281_v58 = vmul.f32 0.75, %v3150_v36  ;;  %v3314_v59 = vmul.f32 0.25, %v3150_v36  ;;  %v3961_v34 = vpop.f32.mrf.mxu1 }
 0x2e8   : > { %3760 = vst [vmem:[%s5827_s15 + $0x190] sm:$0xff] %v3379_v1  ;;  %3761 = vst [vmem:[%s5827_s15 + $0x1b0] sm:$0xff] %v3380_v41  ;;  %v3028_v15 = vmul.f32 0.25, %v2868_v53  ;;  %v3067_v27 = vadd.f32 %v3027_v16, %v5978_v29  ;;  %v3108_v22 = vmul.f32 0.25, %v2948_v44  ;;  %v3031_v42 = vmul.f32 0.25, %v2871_v17 }
 0x2e9   : > { %3484 = vst [vmem:[%s5827_s15 + $0x1a8] sm:$0xff] %v3340_v9  ;;  %3485 = vst [vmem:[%s5827_s15 + $0x1c8] sm:$0xff] %v3341_v13  ;;  %v3111_v6 = vmul.f32 0.25, %v2951_v2  ;;  %v3029_v19 = vmul.f32 0.25, %v2869_v47  ;;  %v3109_v25 = vmul.f32 0.25, %v2949_v21  ;;  %v3147_v3 = vadd.f32 %v3107_v23, %v5978_v29 }
 0x2ea   : > { %3792 = vst [vmem:[%s5827_s15 + $0x198] sm:$0xff] %v3419_v61  ;;  %3793 = vst [vmem:[%s5827_s15 + $0x1b8] sm:$0xff] %v3420_v18  ;;  %v3068_v26 = vadd.f32 %v3028_v15, %v5978_v29  ;;  %v3148_v30 = vadd.f32 %v3108_v22, %v5978_v29  ;;  %v3215_v10 = vmul.f32 0.25, %v3067_v27  ;;  %v3071_v40 = vadd.f32 %v3031_v42, %v5980_v0  ;;  %v6062_v53 = vld [vmem:[%s6312_s6] ss:$0 sm:$0xff] }
 0x2eb   : > { %v3151_v54 = vadd.f32 %v3111_v6, %v5980_v0  ;;  %v3069_v39 = vadd.f32 %v3029_v19, %v5982_v8  ;;  %v3149_v50 = vadd.f32 %v3109_v25, %v5982_v8  ;;  %v3311_v46 = vmul.f32 0.25, %v3147_v3 }
 0x2ec   : > { %v3183_v12 = vmul.f32 0.75, %v3068_v26  ;;  %v3216_v37 = vmul.f32 0.25, %v3068_v26  ;;  %v3279_v31 = vmul.f32 0.75, %v3148_v30  ;;  %v3312_v45 = vmul.f32 0.25, %v3148_v30 }
 0x2ed   : > { %v6042_v38 = vmul.f32 0.75, %v3071_v40  ;;  %v6044_v29 = vmul.f32 0.25, %v3071_v40  ;;  %v6046_v63 = vmul.f32 0.75, %v3151_v54  ;;  %v6048_v8 = vmul.f32 0.25, %v3151_v54 }
 0x2ee   : > { %v3247_v0 = vadd.f32 %v3215_v10, %v3183_v12  ;;  %v3343_v35 = vadd.f32 %v3311_v46, %v3279_v31  ;;  %v3184_v7 = vmul.f32 0.75, %v3069_v39  ;;  %v3217_v5 = vmul.f32 0.25, %v3069_v39 }
 0x2ef   : > { %v3250_v55 = vadd.f32 %v3218_v60, %v6042_v38  ;;  %v3346_v11 = vadd.f32 %v3314_v59, %v6046_v63  ;;  %v3385_v16 = vadd.f32 %v6044_v29, %v3185_v52  ;;  %v3425_v57 = vadd.f32 %v6048_v8, %v3281_v58 }
 0x2f0   : > { %3455 = vst [vmem:[%s5827_s15 + $0x200] sm:$0xff] %v3247_v0  ;;  %3487 = vst [vmem:[%s5827_s15 + $0x208] sm:$0xff] %v3343_v35  ;;  %v3248_v20 = vadd.f32 %v3216_v37, %v3184_v7  ;;  %v3280_v49 = vmul.f32 0.75, %v3149_v50  ;;  %v3313_v56 = vmul.f32 0.25, %v3149_v50  ;;  %v3249_v48 = vadd.f32 %v3217_v5, %v3185_v52 }
 0x2f1   : > { %3458 = vst [vmem:[%s5827_s15 + $0x260] sm:$0xff] %v3250_v55  ;;  %3490 = vst [vmem:[%s5827_s15 + $0x268] sm:$0xff] %v3346_v11  ;;  %v3383_v43 = vadd.f32 %v3217_v5, %v3183_v12  ;;  %v3384_v36 = vadd.f32 %v3218_v60, %v3184_v7  ;;  %v2513_v4 = vadd.f32 %v6062_v53, %v5992_v32 }
 0x2f2   : > { %3766 = vst [vmem:[%s5827_s15 + $0x250] sm:$0xff] %v3385_v16  ;;  %3798 = vst [vmem:[%s5827_s15 + $0x258] sm:$0xff] %v3425_v57  ;;  %v3344_v1 = vadd.f32 %v3312_v45, %v3280_v49  ;;  %v3345_v41 = vadd.f32 %v3313_v56, %v3281_v58  ;;  %v3423_v24 = vadd.f32 %v3313_v56, %v3279_v31  ;;  %v2523_v58 = vpop.f32.mrf.mxu1 }
 0x2f3   : > { %v3424_v44 = vadd.f32 %v3314_v59, %v3280_v49  ;;  %3456 = vst [vmem:[%s5827_s15 + $0x220] sm:$0xff] %v3248_v20  ;;  %3457 = vst [vmem:[%s5827_s15 + $0x240] sm:$0xff] %v3249_v48  ;;  %vm2573_vm4 = vcmp.gt.f32.partialorder %v2513_v4, 0.0  ;;  %v2605_v17 = vmul.f32 0.01, %v2513_v4  ;;  %v2505_v9 = vadd.f32 %v6062_v53, %v5994_v51 }
 0x2f4   : > { %3764 = vst [vmem:[%s5827_s15 + $0x210] sm:$0xff] %v3383_v43  ;;  %3765 = vst [vmem:[%s5827_s15 + $0x230] sm:$0xff] %v3384_v36  ;;  %v2516_v32 = vadd.f32 %v6062_v53, %v6012_v28  ;;  %v2508_v13 = vadd.f32 %v6062_v53, %v6024_v14  ;;  %v2529_v61 = vadd.f32 %v6062_v53, %v3960_v33  ;;  %v3964_v25 = vpop.f32.mrf.mxu1 }
 0x2f5   : > { %3488 = vst [vmem:[%s5827_s15 + $0x228] sm:$0xff] %v3344_v1  ;;  %3489 = vst [vmem:[%s5827_s15 + $0x248] sm:$0xff] %v3345_v41  ;;  %v2521_v18 = vadd.f32 %v6062_v53, %v2520_v62  ;;  %v2532_v2 = vadd.f32 %v6062_v53, %v3961_v34  ;;  %v2637_v47 = vsel %vm2573_vm4, %v2513_v4, %v2605_v17  ;;  %vm2571_vm5 = vcmp.gt.f32.partialorder %v2505_v9, 0.0 }
 0x2f6   : > { %3796 = vst [vmem:[%s5827_s15 + $0x218] sm:$0xff] %v3423_v24  ;;  %3797 = vst [vmem:[%s5827_s15 + $0x238] sm:$0xff] %v3424_v44  ;;  %v2603_v21 = vmul.f32 0.01, %v2505_v9  ;;  %vm2574_vm6 = vcmp.gt.f32.partialorder %v2516_v32, 0.0  ;;  %vm2572_vm7 = vcmp.gt.f32.partialorder %v2508_v13, 0.0  ;;  %v2524_v42 = vadd.f32 %v6062_v53, %v2523_v58  ;;  %v2536_v39 = vpop.f32.mrf.mxu1 }
 0x2f7   : > { %2669 = vst [vmem:[#allocation2 + $0x290] sm:$0xff] %v2637_v47  ;;  %v2606_v51 = vmul.f32 0.01, %v2516_v32  ;;  %v2604_v28 = vmul.f32 0.01, %v2508_v13  ;;  %vm2577_vm8 = vcmp.gt.f32.partialorder %v2529_v61, 0.0  ;;  %v2545_v30 = vadd.f32 %v6062_v53, %v3964_v25 }
 0x2f8   : > { %v2635_v52 = vsel %vm2571_vm5, %v2505_v9, %v2603_v21  ;;  %v2609_v60 = vmul.f32 0.01, %v2529_v61  ;;  %vm2575_vm9 = vcmp.gt.f32.partialorder %v2521_v18, 0.0  ;;  %v2607_v15 = vmul.f32 0.01, %v2521_v18  ;;  %v3965_v0 = vpop.f32.mrf.mxu1 }
 0x2f9   : > { %2667 = vst [vmem:[#allocation2 + $0x260] sm:$0xff] %v2635_v52  ;;  %v2638_v14 = vsel %vm2574_vm6, %v2516_v32, %v2606_v51  ;;  %v2636_v59 = vsel %vm2572_vm7, %v2508_v13, %v2604_v28  ;;  %vm2578_vm10 = vcmp.gt.f32.partialorder %v2532_v2, 0.0  ;;  %v2610_v22 = vmul.f32 0.01, %v2532_v2 }
 0x2fa   : > { %2670 = vst [vmem:[#allocation2 + $0x2a8] sm:$0xff] %v2638_v14  ;;  %2685 = vst [vmem:[#allocation2 + $0x2c0] sm:$0xff] %v2638_v14  ;;  %v2641_v27 = vsel %vm2577_vm8, %v2529_v61, %v2609_v60  ;;  %v2639_v23 = vsel %vm2575_vm9, %v2521_v18, %v2607_v15  ;;  %v6085_v6 = vmul.f32 0.75, %v2637_v47  ;;  %v6087_v19 = vmul.f32 0.75, %v2635_v52  ;;  %v2539_v56 = vpop.f32.mrf.mxu1 }
 0x2fb   : > { %2668 = vst [vmem:[#allocation2 + $0x278] sm:$0xff] %v2636_v59  ;;  %2673 = vst [vmem:[#allocation2 + $0x320] sm:$0xff] %v2641_v27  ;;  %v2642_v26 = vsel %vm2578_vm10, %v2532_v2, %v2610_v22  ;;  %vm2576_vm11 = vcmp.gt.f32.partialorder %v2524_v42, 0.0  ;;  %v2608_v3 = vmul.f32 0.01, %v2524_v42  ;;  %v6090_v40 = vmul.f32 0.75, %v2638_v14 }
 0x2fc   : > { %2671 = vst [vmem:[#allocation2 + $0x2f0] sm:$0xff] %v2639_v23  ;;  %2682 = vst [vmem:[#allocation2 + $0x2d8] sm:$0xff] %v2639_v23  ;;  %v6092_v54 = vmul.f32 0.75, %v2636_v59  ;;  %v6094_v50 = vmul.f32 0.75, %v2641_v27  ;;  %vm2581_vm12 = vcmp.gt.f32.partialorder %v2545_v30, 0.0  ;;  %v6096_v45 = vmul.f32 0.75, %v2639_v23 }
 0x2fd   : > { %2674 = vst [vmem:[#allocation2 + $0x338] sm:$0xff] %v2642_v26  ;;  %v2640_v12 = vsel %vm2576_vm11, %v2524_v42, %v2608_v3  ;;  %v2613_v37 = vmul.f32 0.01, %v2545_v30  ;;  %v6098_v62 = vmul.f32 0.75, %v2642_v26  ;;  %v2537_v16 = vadd.f32 %v6062_v53, %v2536_v39 }
 0x2fe   : > { %v2714_v10 = vld [vmem:[#allocation2 + $0x290] sm:$0x1]  ;;  %v2794_v33 = vld [vmem:[#allocation2 + $0x297] sm:$0x1]  ;;  %2672 = vst [vmem:[#allocation2 + $0x308] sm:$0xff] %v2640_v12  ;;  %v2548_v49 = vadd.f32 %v6062_v53, %v3965_v0  ;;  %v6103_v41 = vadd.f32 %v6062_v53, %v2539_v56  ;;  %v6105_v17 = vmul.f32 0.75, %v2640_v12 }
 0x2ff   : > { %2754 = vst [vmem:[#allocation2 + $0x28f] sm:$0x1] %v2714_v10  ;;  %2834 = vst [vmem:[#allocation2 + $0x298] sm:$0x1] %v2794_v33  ;;  %v2645_v11 = vsel %vm2581_vm12, %v2545_v30, %v2613_v37  ;;  %vm2579_vm13 = vcmp.gt.f32.partialorder %v2537_v16, 0.0 }
 0x300   : > { %v2712_v31 = vld [vmem:[#allocation2 + $0x260] sm:$0x1]  ;;  %v2792_v46 = vld [vmem:[#allocation2 + $0x267] sm:$0x1]  ;;  %2677 = vst [vmem:[#allocation2 + $0x380] sm:$0xff] %v2645_v11  ;;  %v6107_v13 = vmul.f32 0.75, %v2645_v11 }
 0x301   : > { %2752 = vst [vmem:[#allocation2 + $0x25f] sm:$0x1] %v2712_v31  ;;  %2832 = vst [vmem:[#allocation2 + $0x268] sm:$0x1] %v2792_v46  ;;  %v2715_v35 = vld [vmem:[#allocation2 + $0x2a8] sm:$0x1] }
 0x302   : > { %v2716_v7 = vld [vmem:[#allocation2 + $0x2c0] sm:$0x1]  ;;  %v2795_v55 = vld [vmem:[#allocation2 + $0x2af] sm:$0x1]  ;;  %2755 = vst [vmem:[#allocation2 + $0x2a7] sm:$0x1] %v2715_v35 }
 0x303   : > { %2756 = vst [vmem:[#allocation2 + $0x2bf] sm:$0x1] %v2716_v7  ;;  %v2796_v5 = vld [vmem:[#allocation2 + $0x2c7] sm:$0x1]  ;;  %2835 = vst [vmem:[#allocation2 + $0x2b0] sm:$0x1] %v2795_v55 }
 0x304   : > { %v2713_v57 = vld [vmem:[#allocation2 + $0x278] sm:$0x1]  ;;  %v2793_v20 = vld [vmem:[#allocation2 + $0x27f] sm:$0x1]  ;;  %2836 = vst [vmem:[#allocation2 + $0x2c8] sm:$0x1] %v2796_v5 }
 0x305   : > { %2753 = vst [vmem:[#allocation2 + $0x277] sm:$0x1] %v2713_v57  ;;  %2833 = vst [vmem:[#allocation2 + $0x280] sm:$0x1] %v2793_v20  ;;  %v2720_v48 = vld [vmem:[#allocation2 + $0x320] sm:$0x1] }
 0x306   : > { %v2800_v43 = vld [vmem:[#allocation2 + $0x327] sm:$0x1]  ;;  %v2717_v36 = vld [vmem:[#allocation2 + $0x2d8] sm:$0x1]  ;;  %2760 = vst [vmem:[#allocation2 + $0x31f] sm:$0x1] %v2720_v48 }
 0x307   : > { %2840 = vst [vmem:[#allocation2 + $0x328] sm:$0x1] %v2800_v43  ;;  %v2718_v4 = vld [vmem:[#allocation2 + $0x2f0] sm:$0x1]  ;;  %2757 = vst [vmem:[#allocation2 + $0x2d7] sm:$0x1] %v2717_v36 }
 0x308   : > { %v2797_v34 = vld [vmem:[#allocation2 + $0x2df] sm:$0x1]  ;;  %v2798_v1 = vld [vmem:[#allocation2 + $0x2f7] sm:$0x1]  ;;  %2758 = vst [vmem:[#allocation2 + $0x2ef] sm:$0x1] %v2718_v4 }
 0x309   : > { %2837 = vst [vmem:[#allocation2 + $0x2e0] sm:$0x1] %v2797_v34  ;;  %2838 = vst [vmem:[#allocation2 + $0x2f8] sm:$0x1] %v2798_v1  ;;  %v2721_v24 = vld [vmem:[#allocation2 + $0x338] sm:$0x1] }
 0x30a   : > { %v2801_v44 = vld [vmem:[#allocation2 + $0x33f] sm:$0x1]  ;;  %v2874_v9 = vld [vmem:[#allocation2 + $0x28f] sm:$0xff]  ;;  %2761 = vst [vmem:[#allocation2 + $0x337] sm:$0x1] %v2721_v24  ;;  %vm2582_vm14 = vcmp.gt.f32.partialorder %v2548_v49, 0.0 }
 0x30b   : > { %v2954_v32 = vld [vmem:[#allocation2 + $0x291] sm:$0xff]  ;;  %2841 = vst [vmem:[#allocation2 + $0x340] sm:$0x1] %v2801_v44  ;;  %v2611_v61 = vmul.f32 0.01, %v2537_v16  ;;  %v3034_v18 = vmul.f32 0.25, %v2874_v9 }
 0x30c   : > { %v3114_v2 = vmul.f32 0.25, %v2954_v32  ;;  %v2719_v53 = vld [vmem:[#allocation2 + $0x308] sm:$0x1]  ;;  %v2799_v47 = vld [vmem:[#allocation2 + $0x30f] sm:$0x1]  ;;  %v2872_v21 = vld [vmem:[#allocation2 + $0x25f] sm:$0xff] }
 0x30d   : > { %v2952_v51 = vld [vmem:[#allocation2 + $0x261] sm:$0xff]  ;;  %2759 = vst [vmem:[#allocation2 + $0x307] sm:$0x1] %v2719_v53  ;;  %2839 = vst [vmem:[#allocation2 + $0x310] sm:$0x1] %v2799_v47  ;;  %v6110_v28 = vsel %vm2579_vm13, %v2537_v16, %v2611_v61  ;;  %v3074_v58 = vadd.f32 %v3034_v18, %v6085_v6  ;;  %v3032_v59 = vmul.f32 0.25, %v2872_v21 }
 0x30e   : > { %v2614_v52 = vmul.f32 0.01, %v2548_v49  ;;  %v6113_v60 = vmul.f32 0.01, %v6103_v41  ;;  %v3154_v14 = vadd.f32 %v3114_v2, %v6085_v6  ;;  %v3112_v15 = vmul.f32 0.25, %v2952_v51  ;;  %v2875_v27 = vld [vmem:[#allocation2 + $0x2a7] sm:$0xff] }
 0x30f   : > { %v2876_v23 = vld [vmem:[#allocation2 + $0x2bf] sm:$0xff]  ;;  %v2955_v22 = vld [vmem:[#allocation2 + $0x2a9] sm:$0xff]  ;;  %2675 = vst [vmem:[#allocation2 + $0x350] sm:$0xff] %v6110_v28  ;;  %v3035_v25 = vmul.f32 0.25, %v2875_v27  ;;  %v2873_v30 = vld [vmem:[#allocation2 + $0x277] sm:$0xff]  ;;  %v6121_v39 = vmul.f32 0.75, %v3074_v58  ;;  %v3072_v31 = vadd.f32 %v3032_v59, %v6087_v19 }
 0x310   : > { %v2956_v42 = vld [vmem:[#allocation2 + $0x2c1] sm:$0xff]  ;;  %v3036_v26 = vmul.f32 0.25, %v2876_v23  ;;  %v3115_v3 = vmul.f32 0.25, %v2955_v22  ;;  %v2953_v10 = vld [vmem:[#allocation2 + $0x279] sm:$0xff]  ;;  %v6119_v33 = vsel %vm2582_vm14, %v2548_v49, %v2614_v52  ;;  %v6123_v12 = vmul.f32 0.25, %v3074_v58 }
 0x311   : > { %v6125_v6 = vmul.f32 0.75, %v3154_v14  ;;  %v6127_v37 = vmul.f32 0.25, %v3154_v14  ;;  %2678 = vst [vmem:[#allocation2 + $0x398] sm:$0xff] %v6119_v33  ;;  %2686 = vst [vmem:[#allocation2 + $0x3b0] sm:$0xff] %v6119_v33  ;;  %v3152_v46 = vadd.f32 %v3112_v15, %v6087_v19  ;;  %v3075_v0 = vadd.f32 %v3035_v25, %v6090_v40  ;;  %v2724_v56 = vld [vmem:[#allocation2 + $0x380] sm:$0x1] }
 0x312   : > { %v3076_v35 = vadd.f32 %v3036_v26, %v6090_v40  ;;  %v3116_v7 = vmul.f32 0.25, %v2956_v42  ;;  %v3155_v55 = vadd.f32 %v3115_v3, %v6090_v40  ;;  %v3033_v11 = vmul.f32 0.25, %v2873_v30  ;;  %v2880_v4 = vld [vmem:[#allocation2 + $0x31f] sm:$0xff]  ;;  %v2877_v1 = vld [vmem:[#allocation2 + $0x2d7] sm:$0xff]  ;;  %2764 = vst [vmem:[#allocation2 + $0x37f] sm:$0x1] %v2724_v56 }
 0x313   : > { %v3113_v16 = vmul.f32 0.25, %v2953_v10  ;;  %v6136_v5 = vmul.f32 0.75, %v3072_v31  ;;  %v3220_v57 = vmul.f32 0.25, %v3072_v31  ;;  %v6138_v20 = vmul.f32 0.75, %v3152_v46  ;;  %v2960_v34 = vld [vmem:[#allocation2 + $0x321] sm:$0xff]  ;;  %v2878_v31 = vld [vmem:[#allocation2 + $0x2ef] sm:$0xff] }
 0x314   : > { %v6140_v49 = vmul.f32 0.25, %v3152_v46  ;;  %v3156_v48 = vadd.f32 %v3116_v7, %v6090_v40  ;;  %v3190_v19 = vmul.f32 0.75, %v3075_v0  ;;  %v3286_v43 = vmul.f32 0.75, %v3155_v55  ;;  %v2804_v32 = vld [vmem:[#allocation2 + $0x387] sm:$0x1] }
 0x315   : > { %v3363_v36 = vmul.f32 0.25, %v3075_v0  ;;  %v3251_v24 = vadd.f32 %v6044_v29, %v6136_v5  ;;  %v3347_v44 = vadd.f32 %v6048_v8, %v6138_v20  ;;  %v3386_v9 = vadd.f32 %v3220_v57, %v6042_v38  ;;  %2844 = vst [vmem:[#allocation2 + $0x388] sm:$0x1] %v2804_v32 }
 0x316   : > { %v3426_v40 = vadd.f32 %v6140_v49, %v6046_v63  ;;  %v2722_v61 = vld [vmem:[#allocation2 + $0x350] sm:$0x1]  ;;  %v2802_v18 = vld [vmem:[#allocation2 + $0x357] sm:$0x1]  ;;  %v3254_v2 = vadd.f32 %v6123_v12, %v3190_v19  ;;  %v3350_v53 = vadd.f32 %v6127_v37, %v3286_v43  ;;  %v3364_v47 = vmul.f32 0.25, %v3076_v35 }
 0x317   : > { %v3389_v29 = vadd.f32 %v3363_v36, %v6121_v39  ;;  %2762 = vst [vmem:[#allocation2 + $0x34f] sm:$0x1] %v2722_v61  ;;  %2842 = vst [vmem:[#allocation2 + $0x358] sm:$0x1] %v2802_v18  ;;  %v3403_v38 = vmul.f32 0.25, %v3155_v55  ;;  %v3404_v63 = vmul.f32 0.25, %v3156_v48  ;;  %v3073_v8 = vadd.f32 %v3033_v11, %v6092_v54 }
 0x318   : > { %3459 = vst [vmem:[%s5827_s15 + $0x280] sm:$0xff] %v3251_v24  ;;  %3491 = vst [vmem:[%s5827_s15 + $0x288] sm:$0xff] %v3347_v44  ;;  %v3153_v21 = vadd.f32 %v3113_v16, %v6092_v54  ;;  %v2725_v51 = vld [vmem:[#allocation2 + $0x398] sm:$0x1]  ;;  %v2726_v52 = vld [vmem:[#allocation2 + $0x3b0] sm:$0x1]  ;;  %v3390_v58 = vadd.f32 %v3364_v47, %v3190_v19 }
 0x319   : > { %3767 = vst [vmem:[%s5827_s15 + $0x270] sm:$0xff] %v3386_v9  ;;  %3799 = vst [vmem:[%s5827_s15 + $0x278] sm:$0xff] %v3426_v40  ;;  %v3040_v14 = vmul.f32 0.25, %v2880_v4  ;;  %v3120_v59 = vmul.f32 0.25, %v2960_v34  ;;  %v3037_v15 = vmul.f32 0.25, %v2877_v1  ;;  %v3429_v23 = vadd.f32 %v3403_v38, %v6125_v6  ;;  %v2957_v55 = vld [vmem:[#allocation2 + $0x2d9] sm:$0xff] }
 0x31a   : > { %3462 = vst [vmem:[%s5827_s15 + $0x2e0] sm:$0xff] %v3254_v2  ;;  %3494 = vst [vmem:[%s5827_s15 + $0x2e8] sm:$0xff] %v3350_v53  ;;  %v2805_v27 = vld [vmem:[#allocation2 + $0x39f] sm:$0x1]  ;;  %v3430_v22 = vadd.f32 %v3404_v63, %v3286_v43  ;;  %v3188_v42 = vmul.f32 0.75, %v3073_v8  ;;  %v3221_v54 = vmul.f32 0.25, %v3073_v8 }
 0x31b   : > { %3770 = vst [vmem:[%s5827_s15 + $0x2d0] sm:$0xff] %v3389_v29  ;;  %2765 = vst [vmem:[#allocation2 + $0x397] sm:$0x1] %v2725_v51  ;;  %v2806_v25 = vld [vmem:[#allocation2 + $0x3b7] sm:$0x1]  ;;  %v3284_v26 = vmul.f32 0.75, %v3153_v21  ;;  %v3080_v30 = vadd.f32 %v3040_v14, %v6094_v50  ;;  %v3160_v10 = vadd.f32 %v3120_v59, %v6094_v50 }
 0x31c   : > { %2766 = vst [vmem:[#allocation2 + $0x3af] sm:$0x1] %v2726_v52  ;;  %2845 = vst [vmem:[#allocation2 + $0x3a0] sm:$0x1] %v2805_v27  ;;  %v3317_v3 = vmul.f32 0.25, %v3153_v21  ;;  %v3252_v46 = vadd.f32 %v3220_v57, %v3188_v42  ;;  %v3253_v0 = vadd.f32 %v3221_v54, %v6121_v39  ;;  %v3387_v35 = vadd.f32 %v3221_v54, %v6136_v5  ;;  %v2958_v11 = vld [vmem:[#allocation2 + $0x2f1] sm:$0xff] }
 0x31d   : > { %3771 = vst [vmem:[%s5827_s15 + $0x2f0] sm:$0xff] %v3390_v58  ;;  %2846 = vst [vmem:[#allocation2 + $0x3b8] sm:$0x1] %v2806_v25  ;;  %v3388_v7 = vadd.f32 %v6123_v12, %v3188_v42  ;;  %v2881_v16 = vld [vmem:[#allocation2 + $0x337] sm:$0xff]  ;;  %v3348_v50 = vadd.f32 %v6140_v49, %v3284_v26  ;;  %v3428_v39 = vadd.f32 %v6127_v37, %v3284_v26  ;;  %v2879_v19 = vld [vmem:[#allocation2 + $0x307] sm:$0xff]  ;;  %v3193_v12 = vmul.f32 0.75, %v3080_v30 }
 0x31e   : > { %3802 = vst [vmem:[%s5827_s15 + $0x2d8] sm:$0xff] %v3429_v23  ;;  %3803 = vst [vmem:[%s5827_s15 + $0x2f8] sm:$0xff] %v3430_v22  ;;  %v3349_v56 = vadd.f32 %v3317_v3, %v6125_v6  ;;  %v3427_v57 = vadd.f32 %v3317_v3, %v6138_v20  ;;  %v2961_v48 = vld [vmem:[#allocation2 + $0x339] sm:$0xff]  ;;  %v2959_v5 = vld [vmem:[#allocation2 + $0x309] sm:$0xff]  ;;  %v3226_v43 = vmul.f32 0.25, %v3080_v30  ;;  %v3289_v36 = vmul.f32 0.75, %v3160_v10 }
 0x31f   : > { %3460 = vst [vmem:[%s5827_s15 + $0x2a0] sm:$0xff] %v3252_v46  ;;  %3461 = vst [vmem:[%s5827_s15 + $0x2c0] sm:$0xff] %v3253_v0  ;;  %v3322_v49 = vmul.f32 0.25, %v3160_v10  ;;  %v3038_v6 = vmul.f32 0.25, %v2878_v31  ;;  %v3077_v20 = vadd.f32 %v3037_v15, %v6096_v45  ;;  %v3117_v4 = vmul.f32 0.25, %v2957_v55  ;;  %v2884_v59 = vld [vmem:[#allocation2 + $0x37f] sm:$0xff] }
 0x320   : > { %3768 = vst [vmem:[%s5827_s15 + $0x290] sm:$0xff] %v3387_v35  ;;  %3769 = vst [vmem:[%s5827_s15 + $0x2b0] sm:$0xff] %v3388_v7  ;;  %v3118_v37 = vmul.f32 0.25, %v2958_v11  ;;  %v3041_v34 = vmul.f32 0.25, %v2881_v16  ;;  %v3121_v1 = vmul.f32 0.25, %v2961_v48  ;;  %v3039_v24 = vmul.f32 0.25, %v2879_v19 }
 0x321   : > { %3492 = vst [vmem:[%s5827_s15 + $0x2a8] sm:$0xff] %v3348_v50  ;;  %3493 = vst [vmem:[%s5827_s15 + $0x2c8] sm:$0xff] %v3349_v56  ;;  %v3119_v44 = vmul.f32 0.25, %v2959_v5  ;;  %v3078_v9 = vadd.f32 %v3038_v6, %v6096_v45  ;;  %v3157_v40 = vadd.f32 %v3117_v4, %v6096_v45  ;;  %v3223_v61 = vmul.f32 0.25, %v3077_v20  ;;  %v2964_v3 = vld [vmem:[#allocation2 + $0x381] sm:$0xff]  ;;  %v2882_v30 = vld [vmem:[#allocation2 + $0x34f] sm:$0xff] }
 0x322   : > { %3800 = vst [vmem:[%s5827_s15 + $0x298] sm:$0xff] %v3427_v57  ;;  %3801 = vst [vmem:[%s5827_s15 + $0x2b8] sm:$0xff] %v3428_v39  ;;  %v3158_v32 = vadd.f32 %v3118_v37, %v6096_v45  ;;  %v3081_v18 = vadd.f32 %v3041_v34, %v6098_v62  ;;  %v3161_v2 = vadd.f32 %v3121_v1, %v6098_v62  ;;  %v3044_v0 = vmul.f32 0.25, %v2884_v59  ;;  %v2962_v35 = vld [vmem:[#allocation2 + $0x351] sm:$0xff] }
 0x323   : > { %v3079_v53 = vadd.f32 %v3039_v24, %v6105_v17  ;;  %v3159_v47 = vadd.f32 %v3119_v44, %v6105_v17  ;;  %v3191_v29 = vmul.f32 0.75, %v3078_v9  ;;  %v3224_v38 = vmul.f32 0.25, %v3078_v9  ;;  %v2885_v7 = vld [vmem:[#allocation2 + $0x397] sm:$0xff]  ;;  %v2886_v55 = vld [vmem:[#allocation2 + $0x3af] sm:$0xff] }
 0x324   : > { %v3287_v63 = vmul.f32 0.75, %v3158_v32  ;;  %v3319_v8 = vmul.f32 0.25, %v3157_v40  ;;  %v3320_v21 = vmul.f32 0.25, %v3158_v32  ;;  %v6191_v51 = vmul.f32 0.75, %v3081_v18  ;;  %v2965_v5 = vld [vmem:[#allocation2 + $0x399] sm:$0xff]  ;;  %v2966_v34 = vld [vmem:[#allocation2 + $0x3b1] sm:$0xff] }
 0x325   : > { %v6193_v52 = vmul.f32 0.25, %v3081_v18  ;;  %v6195_v45 = vmul.f32 0.75, %v3161_v2  ;;  %v3255_v58 = vadd.f32 %v3223_v61, %v3191_v29  ;;  %v6197_v62 = vmul.f32 0.25, %v3161_v2 }
 0x326   : > { %v3351_v14 = vadd.f32 %v3319_v8, %v3287_v63  ;;  %v3192_v17 = vmul.f32 0.75, %v3079_v53  ;;  %v3258_v15 = vadd.f32 %v3226_v43, %v6191_v51  ;;  %v3225_v22 = vmul.f32 0.25, %v3079_v53 }
 0x327   : > { %v3354_v27 = vadd.f32 %v3322_v49, %v6195_v45  ;;  %v3393_v23 = vadd.f32 %v6193_v52, %v3193_v12  ;;  %3463 = vst [vmem:[%s5827_s15 + $0x300] sm:$0xff] %v3255_v58  ;;  %v3433_v42 = vadd.f32 %v6197_v62, %v3289_v36  ;;  %v3288_v25 = vmul.f32 0.75, %v3159_v47 }
 0x328   : > { %3495 = vst [vmem:[%s5827_s15 + $0x308] sm:$0xff] %v3351_v14  ;;  %v3256_v54 = vadd.f32 %v3224_v38, %v3192_v17  ;;  %v3321_v26 = vmul.f32 0.25, %v3159_v47  ;;  %3466 = vst [vmem:[%s5827_s15 + $0x360] sm:$0xff] %v3258_v15  ;;  %v3257_v10 = vadd.f32 %v3225_v22, %v3193_v12  ;;  %v3391_v31 = vadd.f32 %v3225_v22, %v3191_v29 }
 0x329   : > { %3498 = vst [vmem:[%s5827_s15 + $0x368] sm:$0xff] %v3354_v27  ;;  %3774 = vst [vmem:[%s5827_s15 + $0x350] sm:$0xff] %v3393_v23  ;;  %v3392_v46 = vadd.f32 %v3226_v43, %v3192_v17  ;;  %vm2580_vm15 = vcmp.gt.f32.partialorder %v6103_v41, 0.0  ;;  %v3352_v11 = vadd.f32 %v3320_v21, %v3288_v25  ;;  %v3432_v56 = vadd.f32 %v3322_v49, %v3288_v25 }
 0x32a   : > { %3806 = vst [vmem:[%s5827_s15 + $0x358] sm:$0xff] %v3433_v42  ;;  %v3353_v16 = vadd.f32 %v3321_v26, %v3289_v36  ;;  %v3431_v50 = vadd.f32 %v3321_v26, %v3287_v63  ;;  %3464 = vst [vmem:[%s5827_s15 + $0x320] sm:$0xff] %v3256_v54  ;;  %v3084_v57 = vadd.f32 %v3044_v0, %v6107_v13  ;;  %v3124_v39 = vmul.f32 0.25, %v2964_v3 }
 0x32b   : > { %3465 = vst [vmem:[%s5827_s15 + $0x340] sm:$0xff] %v3257_v10  ;;  %3772 = vst [vmem:[%s5827_s15 + $0x310] sm:$0xff] %v3391_v31  ;;  %v3002_v48 = vmul.f32 0.75, %v6110_v28  ;;  %v3042_v19 = vmul.f32 0.25, %v2882_v30  ;;  %v3122_v12 = vmul.f32 0.25, %v2962_v35  ;;  %v3005_v43 = vmul.f32 0.75, %v6119_v33 }
 0x32c   : > { %3773 = vst [vmem:[%s5827_s15 + $0x330] sm:$0xff] %v3392_v46  ;;  %3496 = vst [vmem:[%s5827_s15 + $0x328] sm:$0xff] %v3352_v11  ;;  %v3045_v36 = vmul.f32 0.25, %v2885_v7  ;;  %v3046_v49 = vmul.f32 0.25, %v2886_v55  ;;  %v3164_v6 = vadd.f32 %v3124_v39, %v6107_v13  ;;  %v6222_v20 = vmul.f32 0.75, %v3084_v57 }
 0x32d   : > { %3497 = vst [vmem:[%s5827_s15 + $0x348] sm:$0xff] %v3353_v16  ;;  %3804 = vst [vmem:[%s5827_s15 + $0x318] sm:$0xff] %v3431_v50  ;;  %v6224_v4 = vmul.f32 0.25, %v3084_v57  ;;  %v3082_v37 = vadd.f32 %v3042_v19, %v3002_v48  ;;  %v3162_v28 = vadd.f32 %v3122_v12, %v3002_v48  ;;  %v3125_v44 = vmul.f32 0.25, %v2965_v5 }
 0x32e   : > { %3805 = vst [vmem:[%s5827_s15 + $0x338] sm:$0xff] %v3432_v56  ;;  %v3085_v1 = vadd.f32 %v3045_v36, %v3005_v43  ;;  %v3086_v24 = vadd.f32 %v3046_v49, %v3005_v43  ;;  %v3293_v9 = vmul.f32 0.75, %v3164_v6  ;;  %v3326_v40 = vmul.f32 0.25, %v3164_v6 }
 0x32f   : > { %v3195_v32 = vmul.f32 0.75, %v3082_v37  ;;  %v3228_v33 = vmul.f32 0.25, %v3082_v37  ;;  %v3291_v61 = vmul.f32 0.75, %v3162_v28  ;;  %v3324_v18 = vmul.f32 0.25, %v3162_v28 }
 0x330   : > { %v3126_v2 = vmul.f32 0.25, %v2966_v34  ;;  %v3165_v13 = vadd.f32 %v3125_v44, %v3005_v43  ;;  %v3198_v29 = vmul.f32 0.75, %v3085_v1  ;;  %v3365_v38 = vmul.f32 0.25, %v3085_v1 }
 0x331   : > { %v3259_v53 = vadd.f32 %v6193_v52, %v3195_v32  ;;  %v3394_v47 = vadd.f32 %v3228_v33, %v6191_v51  ;;  %v3355_v63 = vadd.f32 %v6197_v62, %v3291_v61  ;;  %v3434_v8 = vadd.f32 %v3324_v18, %v6195_v45 }
 0x332   : > { %v3166_v21 = vadd.f32 %v3126_v2, %v3005_v43  ;;  %v3294_v58 = vmul.f32 0.75, %v3165_v13  ;;  %v3262_v14 = vadd.f32 %v6224_v4, %v3198_v29  ;;  %v3366_v17 = vmul.f32 0.25, %v3086_v24 }
 0x333   : > { %3467 = vst [vmem:[%s5827_s15 + $0x380] sm:$0xff] %v3259_v53  ;;  %3775 = vst [vmem:[%s5827_s15 + $0x370] sm:$0xff] %v3394_v47  ;;  %v3397_v51 = vadd.f32 %v3365_v38, %v6222_v20  ;;  %v3405_v52 = vmul.f32 0.25, %v3165_v13  ;;  %v2644_v59 = vsel %vm2580_vm15, %v6103_v41, %v6113_v60 }
 0x334   : > { %3499 = vst [vmem:[%s5827_s15 + $0x388] sm:$0xff] %v3355_v63  ;;  %3807 = vst [vmem:[%s5827_s15 + $0x378] sm:$0xff] %v3434_v8  ;;  %v3358_v62 = vadd.f32 %v3326_v40, %v3294_v58  ;;  %v3406_v45 = vmul.f32 0.25, %v3166_v21  ;;  %v3398_v15 = vadd.f32 %v3366_v17, %v3198_v29  ;;  %v3003_v26 = vmul.f32 0.75, %v2644_v59 }
 0x335   : > { %v3437_v27 = vadd.f32 %v3405_v52, %v3293_v9  ;;  %3470 = vst [vmem:[%s5827_s15 + $0x3e0] sm:$0xff] %v3262_v14  ;;  %3778 = vst [vmem:[%s5827_s15 + $0x3d0] sm:$0xff] %v3397_v51 }
 0x336   : > { %2676 = vst [vmem:[#allocation2 + $0x368] sm:$0xff] %v2644_v59  ;;  %v3438_v23 = vadd.f32 %v3406_v45, %v3294_v58  ;;  %3502 = vst [vmem:[%s5827_s15 + $0x3e8] sm:$0xff] %v3358_v62 }
 0x337   : > { %3779 = vst [vmem:[%s5827_s15 + $0x3f0] sm:$0xff] %v3398_v15  ;;  %3810 = vst [vmem:[%s5827_s15 + $0x3d8] sm:$0xff] %v3437_v27 }
 0x338   : > { %3811 = vst [vmem:[%s5827_s15 + $0x3f8] sm:$0xff] %v3438_v23 }
 0x33d   : > { %v2723_v22 = vld [vmem:[#allocation2 + $0x368] sm:$0x1]  ;;  %v2803_v42 = vld [vmem:[#allocation2 + $0x36f] sm:$0x1] }
 0x33e   : > { %2763 = vst [vmem:[#allocation2 + $0x367] sm:$0x1] %v2723_v22  ;;  %2843 = vst [vmem:[#allocation2 + $0x370] sm:$0x1] %v2803_v42 }
 0x345   : > { %v2883_v54 = vld [vmem:[#allocation2 + $0x367] sm:$0xff] }
 0x346   : > { %v2963_v25 = vld [vmem:[#allocation2 + $0x369] sm:$0xff]  ;;  %v3043_v41 = vmul.f32 0.25, %v2883_v54 }
 0x347   : > { %v3123_v60 = vmul.f32 0.25, %v2963_v25 }
 0x348   : > { %v3083_v3 = vadd.f32 %v3043_v41, %v3003_v26 }
 0x349   : > { %v3163_v30 = vadd.f32 %v3123_v60, %v3003_v26 }
 0x34a   : > { %v3196_v10 = vmul.f32 0.75, %v3083_v3  ;;  %v3229_v31 = vmul.f32 0.25, %v3083_v3 }
 0x34b   : > { %v3292_v46 = vmul.f32 0.75, %v3163_v30  ;;  %v3325_v0 = vmul.f32 0.25, %v3163_v30 }
 0x34c   : > { %v3260_v35 = vadd.f32 %v3228_v33, %v3196_v10  ;;  %v3261_v7 = vadd.f32 %v3229_v31, %v6222_v20  ;;  %v3395_v16 = vadd.f32 %v3229_v31, %v3195_v32  ;;  %v3396_v50 = vadd.f32 %v6224_v4, %v3196_v10 }
 0x34d   : > { %v3356_v55 = vadd.f32 %v3324_v18, %v3292_v46  ;;  %v3357_v11 = vadd.f32 %v3325_v0, %v3293_v9  ;;  %v3435_v56 = vadd.f32 %v3325_v0, %v3291_v61  ;;  %v3436_v57 = vadd.f32 %v3326_v40, %v3292_v46 }
 0x34e   : > { %3468 = vst [vmem:[%s5827_s15 + $0x3a0] sm:$0xff] %v3260_v35  ;;  %3469 = vst [vmem:[%s5827_s15 + $0x3c0] sm:$0xff] %v3261_v7 }
 0x34f   : > { %3500 = vst [vmem:[%s5827_s15 + $0x3a8] sm:$0xff] %v3356_v55  ;;  %3501 = vst [vmem:[%s5827_s15 + $0x3c8] sm:$0xff] %v3357_v11 }
 0x350   : > { %3776 = vst [vmem:[%s5827_s15 + $0x390] sm:$0xff] %v3395_v16  ;;  %3777 = vst [vmem:[%s5827_s15 + $0x3b0] sm:$0xff] %v3396_v50 }
 0x351   : > { %3808 = vst [vmem:[%s5827_s15 + $0x398] sm:$0xff] %v3435_v56  ;;  %3809 = vst [vmem:[%s5827_s15 + $0x3b8] sm:$0xff] %v3436_v57 }
 0x352   : > { %4245 = shalt.err (!%p4242_p5)
}
 0x353   : > { %s4246_s20 = scalar_lea.hbm %s6251_s30, 16384  ;;  %s4250_s22 = scalar_lea.hbm %s6313_s7, 32768 }
 0x354   : > { %p4247_p3 = scmp.ne.s32.totalorder %s6251_s30, %s4246_s20  ;;  %p4251_p8 = scmp.lt.s32.totalorder %s6251_s30, %s6313_s7 }
 0x355   : > { %p4252_p9 = scmp.lt.s32.totalorder %s4250_s22, %s4246_s20 }
 0x356   : > { %p4248_p4 = pnand %p4247_p3, %p6348_p12 }
 0x357   : > { %p4253_p2 = por %p4252_p9, %p4251_p8 }
 0x358   : > { %p4249_p6 = pneg %p4248_p4 }
 0x35a   : > { %p4254_p10 = pnand %p4253_p2, %p4249_p6 }
 0x35c   : > { %4257 = shalt.err (!%p4254_p10)
}
 0x35d   : > { %s4317_s19 = smov 256   ;;  %s4318_s13 = smov 16  }
 0x35e   : > { %3984 = dma.vmem_to_hbm [thread:$0]  (%p6348_p12), %s6254_s1, 16384, %s6251_s30, %s3569_s28, %s4317_s19, %s4317_s19, %s4318_s13  }
 0x35f PF: > { %s3598_s9 = sand.u32 1, %s4292_s24   ;;  %p6349_p7 = scmp.ne.s32.totalorder %s6328_s8, 0 }
 0x360   : > { %p6350_p1 = scmp.ge.s32.totalorder %s4304_s27, 2  ;;  %s3599_s14 = scalar_lea.sflag [#allocation5], %s3598_s9 }
 0x362   : > { %p4004_p13 = pnand %p6350_p1, %p6349_p7 }
 0x364   : > { %p4005_p0 = pneg %p4004_p13 }
 0x366   : > { %4287 = dma.done.wait (%p4005_p0), %s3599_s14, 16384  }
 0x367   : > { %4289 = vsyncadd (%p4005_p0), %s3599_s14, 4294950912  ;;  %p22_p11 = scmp.ge.s32.totalorder %s4459_s21, 4   ;;  %s6351_s24 = smov %s4296_s25 }
 0x368   : > { %s6352_s25 = smov %s4300_s26  ;;  %s6353_s26 = smov %s4475_s29 }
 0x369   : > { %s6354_s27 = smov %s4459_s21  ;;  %24 = sbr.rel (!%p22_p11) target bundleno = 9 (0x9), region = 116 }
 0x36e   :  { %3604 = vsyncpa [#allocation4], 1 }
 0x36f   :  { %3606 = vsyncpa [#allocation4 + $0x1], 1 }
 0x370   :  { %3607 = vsyncpa [#allocation7], 1 }
 0x371   :  { %3608 = vsyncpa [#allocation10], 1 }
 0x372   :  { %3609 = vsyncpa [#allocation5], 1 }
 0x373   :  { %3611 = vsyncpa [#allocation5 + $0x1], 1 }

</bundles_post_ra>
